<compile_context>
chip_gen: v7x
topology: tpu7x:2x2x1
jax: 0.10.0
libtpu: 0.0.40
codegen_flags: <defaults>
</compile_context>

<pallas_src>
import functools

import jax
import jax.numpy as jnp
from jax.experimental import pallas as pl
from jax.experimental.pallas import tpu as pltpu


def _fused_add_relu_conv1x1_kernel(a_ref, b_ref, w_ref, o_ref, *, mxu_dtype):
    # a_ref, b_ref: (1, C_in, bm) activation tiles (channels-first, lane = spatial)
    # w_ref:        (C_out, C_in) 1x1-conv weight as a matmul operand (VMEM-resident)
    # o_ref:        (1, C_out, bm) output tile
    x = jnp.maximum(a_ref[0] + b_ref[0], 0.0)  # (C_in, bm), add + ReLU on the VPU (f32)
    w = w_ref[...]
    if mxu_dtype is not None:
        # bf16 MXU operands, f32 accumulate (3x fewer vmatmul passes than f32).
        x = x.astype(mxu_dtype)
        w = w.astype(mxu_dtype)
    o_ref[0] = jnp.dot(w, x, preferred_element_type=jnp.float32).astype(o_ref.dtype)


def _default_num_hw_blocks():
    """2 spatial blocks on v7x (2 TensorCores/chip), 1 on single-TC v5e/v6e."""
    try:
        kind = jax.devices()[0].device_kind.lower()
    except Exception:  # pragma: no cover - non-TPU / odd backends
        return 1
    return 2 if "v7" in kind else 1


def fused_add_relu_conv1x1(x96, x88, weight, *, num_hw_blocks=None,
                           mxu_dtype=jnp.bfloat16):
    """x96, x88: (N, C_in, H, W); weight: (C_out, C_in, 1, 1).

    Returns (N, C_out, H, W), matching
        conv2d(relu(x96 + x88), weight, bias=None, kernel=1x1, stride=1).
    """
    n, c_in, h, w = x96.shape
    c_out = weight.shape[0]
    hw = h * w

    # NCHW -> (N, C_in, H*W): pure reshape, no transpose, no extra HBM traffic.
    a3d = x96.reshape(n, c_in, hw)
    b3d = x88.reshape(n, c_in, hw)
    # (C_out, C_in, 1, 1) -> (C_out, C_in): free reshape.
    w2d = weight.reshape(c_out, c_in)

    if num_hw_blocks is None:
        num_hw_blocks = _default_num_hw_blocks()

    if num_hw_blocks <= 1 or hw <= 128:
        # Single contiguous block over the whole spatial extent (legal even when
        # hw is not a multiple of 128 because it equals the full array dim).
        bm = hw
    else:
        # Interior blocks must be a multiple of the 128-lane width.
        bm = ((pl.cdiv(hw, num_hw_blocks) + 127) // 128) * 128
        bm = min(bm, hw)
    grid = (n, pl.cdiv(hw, bm))

    act_isz = jnp.dtype(x96.dtype).itemsize
    flops = 2 * n * hw * c_in * c_out
    bytes_accessed = (
        2 * n * c_in * hw * act_isz                      # two activation reads
        + c_out * c_in * jnp.dtype(weight.dtype).itemsize  # weight (resident)
        + n * c_out * hw * act_isz                       # output write
    )

    kernel = functools.partial(_fused_add_relu_conv1x1_kernel, mxu_dtype=mxu_dtype)

    out3d = pl.pallas_call(
        kernel,
        out_shape=jax.ShapeDtypeStruct((n, c_out, hw), x96.dtype),
        grid_spec=pltpu.PrefetchScalarGridSpec(
            num_scalar_prefetch=0,
            grid=grid,
            in_specs=[
                pl.BlockSpec((1, c_in, bm), lambda bi, mi: (bi, 0, mi)),
                pl.BlockSpec((1, c_in, bm), lambda bi, mi: (bi, 0, mi)),
                # Constant index_map: weight stays resident in VMEM, no re-DMA.
                pl.BlockSpec((c_out, c_in), lambda bi, mi: (0, 0)),
            ],
            out_specs=pl.BlockSpec((1, c_out, bm), lambda bi, mi: (bi, 0, mi)),
        ),
        compiler_params=pltpu.CompilerParams(
            dimension_semantics=("parallel", "parallel"),
        ),
        cost_estimate=pl.CostEstimate(
            flops=flops,
            transcendentals=0,
            bytes_accessed=bytes_accessed,
        ),
    )(a3d, b3d, w2d)

    # (N, C_out, H*W) -> (N, C_out, H, W): free reshape, already channels-first.
    return out3d.reshape(n, c_out, h, w)


if __name__ == "__main__":
    key = jax.random.PRNGKey(0)
    k1, k2, k3 = jax.random.split(key, 3)

    # Shapes implied by the module: inputs (1, 512, 28, 28), conv 512 -> 128.
    N, C_IN, H, W = 1, 512, 28, 28
    C_OUT = 128

    x96 = jax.random.normal(k1, (N, C_IN, H, W), dtype=jnp.float32)
    x88 = jax.random.normal(k2, (N, C_IN, H, W), dtype=jnp.float32)
    # Deterministic Kaiming-uniform-ish init for Conv2d(512, 128, 1, bias=False).
    bound = 1.0 / (C_IN ** 0.5)
    weight = jax.random.uniform(
        k3, (C_OUT, C_IN, 1, 1), dtype=jnp.float32, minval=-bound, maxval=bound
    )

    # Pure-JAX f32 reference.
    ref = jax.lax.conv_general_dilated(
        jnp.maximum(x96 + x88, 0.0),
        weight,
        window_strides=(1, 1),
        padding="VALID",
        dimension_numbers=("NCHW", "OIHW", "NCHW"),
    )

    # Default path (auto: 1 block on v5e/v6e, 2 blocks on v7x).
    out = fused_add_relu_conv1x1(x96, x88, weight)
    jax.block_until_ready(out)
    assert out.shape == (N, C_OUT, H, W), out.shape
    # bf16 MXU operands + f32 accumulation over a 512-term reduction.
    assert jnp.allclose(out, ref, atol=2e-2, rtol=2e-2), float(
        jnp.max(jnp.abs(out - ref))
    )

    # Also exercise the 2-block (v7x-style) split so that code path is verified
    # regardless of which generation this runs on.
    out2 = fused_add_relu_conv1x1(x96, x88, weight, num_hw_blocks=2)
    jax.block_until_ready(out2)
    assert jnp.allclose(out2, ref, atol=2e-2, rtol=2e-2), float(
        jnp.max(jnp.abs(out2 - ref))
    )

    print("KERNEL_OK")
</pallas_src>

<mosaic_0001>
module attributes {stable_mosaic.version = 11 : i64} {
  func.func @_fused_add_relu_conv1x1_kernel(%arg0: i32, %arg1: i32, %arg2: memref<1x512x784xf32, #tpu.memory_space<vmem>>, %arg3: memref<1x512x784xf32, #tpu.memory_space<vmem>>, %arg4: memref<128x512xf32, #tpu.memory_space<vmem>>, %arg5: memref<1x128x784xf32, #tpu.memory_space<vmem>>) attributes {dimension_semantics = [#tpu.dimension_semantics<parallel>, #tpu.dimension_semantics<parallel>], iteration_bounds = array<i64: 1, 1>, scalar_prefetch = 0 : i64, scratch_operands = 0 : i64, tpu.core_type = #tpu.core_type<tc>, window_params = [{transform_indices = @transform_0, window_bounds = array<i64: 1, 512, 784>}, {transform_indices = @transform_1, window_bounds = array<i64: 1, 512, 784>}, {pipeline_mode = #tpu.pipeline_mode<synchronous>, transform_indices = @transform_2, window_bounds = array<i64: 128, 512>}, {transform_indices = @transform_3, window_bounds = array<i64: 1, 128, 784>}]} {
    %c0 = arith.constant 0 : index
    %c0_0 = arith.constant 0 : index
    %c0_1 = arith.constant 0 : index
    %0 = vector.load %arg2[%c0, %c0_0, %c0_1] : memref<1x512x784xf32, #tpu.memory_space<vmem>>, vector<1x512x784xf32>
    %1 = vector.shape_cast %0 : vector<1x512x784xf32> to vector<512x784xf32>
    %c0_2 = arith.constant 0 : index
    %c0_3 = arith.constant 0 : index
    %c0_4 = arith.constant 0 : index
    %2 = vector.load %arg3[%c0_2, %c0_3, %c0_4] : memref<1x512x784xf32, #tpu.memory_space<vmem>>, vector<1x512x784xf32>
    %3 = vector.shape_cast %2 : vector<1x512x784xf32> to vector<512x784xf32>
    %4 = arith.addf %1, %3 : vector<512x784xf32>
    %cst = arith.constant 0.000000e+00 : f32
    %5 = vector.broadcast %cst : f32 to vector<512x784xf32>
    %6 = arith.maximumf %4, %5 : vector<512x784xf32>
    %c0_5 = arith.constant 0 : index
    %c0_6 = arith.constant 0 : index
    %7 = vector.load %arg4[%c0_5, %c0_6] : memref<128x512xf32, #tpu.memory_space<vmem>>, vector<128x512xf32>
    %8 = arith.truncf %6 : vector<512x784xf32> to vector<512x784xbf16>
    %9 = arith.truncf %7 : vector<128x512xf32> to vector<128x512xbf16>
    %cst_7 = arith.constant dense<0.000000e+00> : vector<128x784xf32>
    %10 = tpu.matmul %9, %8, %cst_7 {dimension_numbers = #tpu.dot_dimension_numbers<[1], [0], [0], [1], [0, 0, 1, 1], [], []>} : vector<128x512xbf16>, vector<512x784xbf16>, vector<128x784xf32> -> vector<128x784xf32>
    %c0_8 = arith.constant 0 : index
    %c0_9 = arith.constant 0 : index
    %c0_10 = arith.constant 0 : index
    %11 = vector.load %arg5[%c0_8, %c0_9, %c0_10] : memref<1x128x784xf32, #tpu.memory_space<vmem>>, vector<1x128x784xf32>
    %12 = vector.shape_cast %11 : vector<1x128x784xf32> to vector<128x784xf32>
    %13 = vector.shape_cast %10 : vector<128x784xf32> to vector<1x128x784xf32>
    tpu.vector_store %arg5[%c0_8, %c0_9, %c0_10], %13 {strides = array<i32>} : memref<1x128x784xf32, #tpu.memory_space<vmem>>, vector<1x128x784xf32>,
    return
  }
  func.func @transform_0(%arg0: i32, %arg1: i32) -> (i32, i32, i32) {
    %c0_i32 = arith.constant 0 : i32
    %c0_i32_0 = arith.constant 0 : i32
    return %arg0, %c0_i32, %arg1 : i32, i32, i32
  }
  func.func @transform_1(%arg0: i32, %arg1: i32) -> (i32, i32, i32) {
    %c0_i32 = arith.constant 0 : i32
    %c0_i32_0 = arith.constant 0 : i32
    return %arg0, %c0_i32, %arg1 : i32, i32, i32
  }
  func.func @transform_2(%arg0: i32, %arg1: i32) -> (i32, i32) {
    %c0_i32 = arith.constant 0 : i32
    %c0_i32_0 = arith.constant 0 : i32
    %c0_i32_1 = arith.constant 0 : i32
    return %c0_i32, %c0_i32_0 : i32, i32
  }
  func.func @transform_3(%arg0: i32, %arg1: i32) -> (i32, i32, i32) {
    %c0_i32 = arith.constant 0 : i32
    %c0_i32_0 = arith.constant 0 : i32
    return %arg0, %c0_i32, %arg1 : i32, i32, i32
  }
}

</mosaic_0001>

<bundles_post_ra>
// kernel: tpu_custom_call.1
= control target key start
LH: loop header
LB: loop body
LE: loop exit
PB: predicated region body
PF: predicated region fallthrough
CT: control target
= control target key end

     0   :  { %vm3005_vm0 = vcmask 130048   ;;  %s6826_s0 = inlined_call_operand.vmem [shape: f32[1,512,784], index: 0, kind: input, shape index: {}]   ;;  %s6827_s1 = inlined_call_operand.vmem [shape: f32[1,512,784], index: 1, kind: input, shape index: {}]   ;;  %s6828_s2 = inlined_call_operand.vmem [shape: f32[128,512], index: 2, kind: input, shape index: {}]   ;;  %s6829_s3 = inlined_call_operand.vmem [shape: f32[1,128,784], index: 3, kind: output, shape index: {}]  }
   0x1   :  { %v16_v0 = vld [vmem:[%s6826_s0 + $0x8] sm:$0xff]  ;;  %v23_v1 = vld [vmem:[%s6826_s0 + $0x40] sm:$0xff]  ;;  %v18_v5 = vld [vmem:[%s6826_s0 + $0x18] sm:$0xff] }
   0x2   :  { %v464_v2 = vld [vmem:[%s6827_s1 + $0x8] sm:$0xff]  ;;  %v471_v3 = vld [vmem:[%s6827_s1 + $0x40] sm:$0xff]  ;;  %v25_v6 = vld [vmem:[%s6826_s0 + $0x50] sm:$0xff] }
   0x3   :  { %v912_v4 = vadd.f32 %v464_v2, %v16_v0  ;;  %v919_v7 = vadd.f32 %v471_v3, %v23_v1  ;;  %v466_v8 = vld [vmem:[%s6827_s1 + $0x18] sm:$0xff]  ;;  %v473_v9 = vld [vmem:[%s6827_s1 + $0x50] sm:$0xff]  ;;  %v15_v10 = vld [vmem:[%s6826_s0] sm:$0xff] }
   0x4   :  { %v914_v12 = vadd.f32 %v466_v8, %v18_v5  ;;  %v921_v13 = vadd.f32 %v473_v9, %v25_v6  ;;  %v22_v14 = vld [vmem:[%s6826_s0 + $0x38] sm:$0xff]  ;;  %v463_v15 = vld [vmem:[%s6827_s1] sm:$0xff]  ;;  %v17_v20 = vld [vmem:[%s6826_s0 + $0x10] sm:$0xff] }
   0x5   :  { %v1360_v11 = vmax.f32 %v912_v4, 0.0  ;;  %v470_v16 = vld [vmem:[%s6827_s1 + $0x38] sm:$0xff]  ;;  %v1367_v17 = vmax.f32 %v919_v7, 0.0  ;;  %v911_v18 = vadd.f32 %v463_v15, %v15_v10  ;;  %v24_v21 = vld [vmem:[%s6826_s0 + $0x48] sm:$0xff]  ;;  %v465_v22 = vld [vmem:[%s6827_s1 + $0x10] sm:$0xff] }
   0x6   :  { %v918_v19 = vadd.f32 %v470_v16, %v22_v14  ;;  %v1362_v23 = vmax.f32 %v914_v12, 0.0  ;;  %v1369_v24 = vmax.f32 %v921_v13, 0.0  ;;  %v472_v25 = vld [vmem:[%s6827_s1 + $0x48] sm:$0xff]  ;;  %v913_v26 = vadd.f32 %v465_v22, %v17_v20  ;;  %v30_v27 = vld [vmem:[%s6826_s0 + $0x78] sm:$0xff]  ;;  %v37_v28 = vld [vmem:[%s6826_s0 + $0xb0] sm:$0xff] }
   0x7   :  { %v1872_v29 = vpack.c.bf16 %v1367_v17, %v1360_v11  ;;  %v1359_v30 = vmax.f32 %v911_v18, 0.0  ;;  %v920_v32 = vadd.f32 %v472_v25, %v24_v21  ;;  %v478_v33 = vld [vmem:[%s6827_s1 + $0x78] sm:$0xff]  ;;  %v485_v34 = vld [vmem:[%s6827_s1 + $0xb0] sm:$0xff]  ;;  %v32_v35 = vld [vmem:[%s6826_s0 + $0x88] sm:$0xff] }
   0x8   :  { %v1366_v31 = vmax.f32 %v918_v19, 0.0  ;;  %v1874_v36 = vpack.c.bf16 %v1369_v24, %v1362_v23  ;;  %v1361_v37 = vmax.f32 %v913_v26, 0.0  ;;  %v926_v38 = vadd.f32 %v478_v33, %v30_v27  ;;  %v39_v40 = vld [vmem:[%s6826_s0 + $0xc0] sm:$0xff]  ;;  %v480_v41 = vld [vmem:[%s6827_s1 + $0x88] sm:$0xff]  ;;  %v29_v47 = vld [vmem:[%s6826_s0 + $0x70] sm:$0xff] }
   0x9   :  { %v933_v39 = vadd.f32 %v485_v34, %v37_v28  ;;  %v487_v42 = vld [vmem:[%s6827_s1 + $0xc0] sm:$0xff]  ;;  %2127 = vmatprep.subr.bf16.mxu0 %v1872_v29  ;;  %v1368_v44 = vmax.f32 %v920_v32, 0.0  ;;  %v928_v45 = vadd.f32 %v480_v41, %v32_v35  ;;  %v36_v48 = vld [vmem:[%s6826_s0 + $0xa8] sm:$0xff]  ;;  %v477_v49 = vld [vmem:[%s6827_s1 + $0x70] sm:$0xff] }
   0xa   :  { %v1871_v43 = vpack.c.bf16 %v1366_v31, %v1359_v30  ;;  %v935_v46 = vadd.f32 %v487_v42, %v39_v40  ;;  %2353 = vmatprep.subr.bf16.mxu1 %v1874_v36  ;;  %v1374_v50 = vmax.f32 %v926_v38, 0.0  ;;  %v484_v52 = vld [vmem:[%s6827_s1 + $0xa8] sm:$0xff]  ;;  %v925_v53 = vadd.f32 %v477_v49, %v29_v47  ;;  %v31_v54 = vld [vmem:[%s6826_s0 + $0x80] sm:$0xff]  ;;  %v38_v55 = vld [vmem:[%s6826_s0 + $0xb8] sm:$0xff] }
   0xb   :  { %v1381_v51 = vmax.f32 %v933_v39, 0.0  ;;  %v1873_v56 = vpack.c.bf16 %v1368_v44, %v1361_v37  ;;  %v1376_v57 = vmax.f32 %v928_v45, 0.0  ;;  %v932_v59 = vadd.f32 %v484_v52, %v36_v48  ;;  %v479_v60 = vld [vmem:[%s6827_s1 + $0x80] sm:$0xff]  ;;  %v486_v61 = vld [vmem:[%s6827_s1 + $0xb8] sm:$0xff]  ;;  %v44_v62 = vld [vmem:[%s6826_s0 + $0xe8] sm:$0xff] }
   0xc   :  { %2128 = vmatpush1.bf16.msra.mxu0 %v1871_v43  ;;  %v1383_v58 = vmax.f32 %v935_v46, 0.0  ;;  %v1373_v0 = vmax.f32 %v925_v53, 0.0  ;;  %v927_v1 = vadd.f32 %v479_v60, %v31_v54  ;;  %v934_v2 = vadd.f32 %v486_v61, %v38_v55  ;;  %v51_v3 = vld [vmem:[%s6826_s0 + $0x120] sm:$0xff]  ;;  %v492_v4 = vld [vmem:[%s6827_s1 + $0xe8] sm:$0xff]  ;;  %v46_v10 = vld [vmem:[%s6826_s0 + $0xf8] sm:$0xff] }
   0xd   :  { %v1879_v63 = vpack.c.bf16 %v1381_v51, %v1374_v50  ;;  %v499_v5 = vld [vmem:[%s6827_s1 + $0x120] sm:$0xff]  ;;  %2354 = vmatpush1.bf16.msra.mxu1 %v1873_v56  ;;  %v1380_v7 = vmax.f32 %v932_v59, 0.0  ;;  %v940_v8 = vadd.f32 %v492_v4, %v44_v62  ;;  %v53_v11 = vld [vmem:[%s6826_s0 + $0x130] sm:$0xff]  ;;  %v494_v12 = vld [vmem:[%s6827_s1 + $0xf8] sm:$0xff] }
   0xe   :  { %v1881_v6 = vpack.c.bf16 %v1383_v58, %v1376_v57  ;;  %v947_v9 = vadd.f32 %v499_v5, %v51_v3  ;;  %v1375_v13 = vmax.f32 %v927_v1, 0.0  ;;  %v1382_v14 = vmax.f32 %v934_v2, 0.0  ;;  %v501_v15 = vld [vmem:[%s6827_s1 + $0x130] sm:$0xff]  ;;  %v43_v17 = vld [vmem:[%s6826_s0 + $0xe0] sm:$0xff]  ;;  %v50_v18 = vld [vmem:[%s6826_s0 + $0x118] sm:$0xff] }
   0xf   :  { %2129 = vmatprep.subr.bf16.mxu0 %v1879_v63  ;;  %v942_v16 = vadd.f32 %v494_v12, %v46_v10  ;;  %v1878_v19 = vpack.c.bf16 %v1380_v7, %v1373_v0  ;;  %v1388_v20 = vmax.f32 %v940_v8, 0.0  ;;  %v949_v22 = vadd.f32 %v501_v15, %v53_v11  ;;  %v491_v23 = vld [vmem:[%s6827_s1 + $0xe0] sm:$0xff]  ;;  %v498_v24 = vld [vmem:[%s6827_s1 + $0x118] sm:$0xff]  ;;  %v45_v25 = vld [vmem:[%s6826_s0 + $0xf0] sm:$0xff] }
  0x10   :  { %2355 = vmatprep.subr.bf16.mxu1 %v1881_v6  ;;  %v1395_v21 = vmax.f32 %v947_v9, 0.0  ;;  %v1880_v26 = vpack.c.bf16 %v1382_v14, %v1375_v13  ;;  %v939_v28 = vadd.f32 %v491_v23, %v43_v17  ;;  %v946_v29 = vadd.f32 %v498_v24, %v50_v18  ;;  %v52_v30 = vld [vmem:[%s6826_s0 + $0x128] sm:$0xff]  ;;  %v493_v31 = vld [vmem:[%s6827_s1 + $0xf0] sm:$0xff]  ;;  %v58_v37 = vld [vmem:[%s6826_s0 + $0x158] sm:$0xff] }
  0x11   :  { %v1390_v27 = vmax.f32 %v942_v16, 0.0  ;;  %v500_v32 = vld [vmem:[%s6827_s1 + $0x128] sm:$0xff]  ;;  %2130 = vmatpush1.bf16.msra.mxu0 %v1878_v19  ;;  %v1397_v34 = vmax.f32 %v949_v22, 0.0  ;;  %v941_v35 = vadd.f32 %v493_v31, %v45_v25  ;;  %v65_v38 = vld [vmem:[%s6826_s0 + $0x190] sm:$0xff]  ;;  %v506_v39 = vld [vmem:[%s6827_s1 + $0x158] sm:$0xff] }
  0x12   :  { %v1886_v33 = vpack.c.bf16 %v1395_v21, %v1388_v20  ;;  %v948_v36 = vadd.f32 %v500_v32, %v52_v30  ;;  %2356 = vmatpush1.bf16.msra.mxu1 %v1880_v26  ;;  %v1387_v40 = vmax.f32 %v939_v28, 0.0  ;;  %v1394_v41 = vmax.f32 %v946_v29, 0.0  ;;  %v513_v42 = vld [vmem:[%s6827_s1 + $0x190] sm:$0xff]  ;;  %v60_v44 = vld [vmem:[%s6826_s0 + $0x168] sm:$0xff]  ;;  %v67_v45 = vld [vmem:[%s6826_s0 + $0x1a0] sm:$0xff] }
  0x13   :  { %v954_v43 = vadd.f32 %v506_v39, %v58_v37  ;;  %v1888_v46 = vpack.c.bf16 %v1397_v34, %v1390_v27  ;;  %v1389_v47 = vmax.f32 %v941_v35, 0.0  ;;  %v961_v49 = vadd.f32 %v513_v42, %v65_v38  ;;  %v508_v50 = vld [vmem:[%s6827_s1 + $0x168] sm:$0xff]  ;;  %v515_v51 = vld [vmem:[%s6827_s1 + $0x1a0] sm:$0xff]  ;;  %v57_v52 = vld [vmem:[%s6826_s0 + $0x150] sm:$0xff] }
  0x14   :  { %2131 = vmatprep.subr.bf16.mxu0 %v1886_v33  ;;  %v1396_v48 = vmax.f32 %v948_v36, 0.0  ;;  %v1885_v53 = vpack.c.bf16 %v1394_v41, %v1387_v40  ;;  %v956_v55 = vadd.f32 %v508_v50, %v60_v44  ;;  %v963_v56 = vadd.f32 %v515_v51, %v67_v45  ;;  %v64_v57 = vld [vmem:[%s6826_s0 + $0x188] sm:$0xff]  ;;  %v505_v58 = vld [vmem:[%s6827_s1 + $0x150] sm:$0xff]  ;;  %v59_v0 = vld [vmem:[%s6826_s0 + $0x160] sm:$0xff] }
  0x15   :  { %v1402_v54 = vmax.f32 %v954_v43, 0.0  ;;  %v512_v59 = vld [vmem:[%s6827_s1 + $0x188] sm:$0xff]  ;;  %2357 = vmatprep.subr.bf16.mxu1 %v1888_v46  ;;  %v1409_v61 = vmax.f32 %v961_v49, 0.0  ;;  %v953_v62 = vadd.f32 %v505_v58, %v57_v52  ;;  %v66_v1 = vld [vmem:[%s6826_s0 + $0x198] sm:$0xff]  ;;  %v507_v2 = vld [vmem:[%s6827_s1 + $0x160] sm:$0xff] }
  0x16   :  { %v1887_v60 = vpack.c.bf16 %v1396_v48, %v1389_v47  ;;  %v960_v63 = vadd.f32 %v512_v59, %v64_v57  ;;  %2132 = vmatpush1.bf16.msra.mxu0 %v1885_v53  ;;  %v1404_v3 = vmax.f32 %v956_v55, 0.0  ;;  %v1411_v4 = vmax.f32 %v963_v56, 0.0  ;;  %v514_v5 = vld [vmem:[%s6827_s1 + $0x198] sm:$0xff]  ;;  %v72_v7 = vld [vmem:[%s6826_s0 + $0x1c8] sm:$0xff]  ;;  %v79_v8 = vld [vmem:[%s6826_s0 + $0x200] sm:$0xff] }
  0x17   :  { %v955_v6 = vadd.f32 %v507_v2, %v59_v0  ;;  %v1893_v9 = vpack.c.bf16 %v1409_v61, %v1402_v54  ;;  %v1401_v10 = vmax.f32 %v953_v62, 0.0  ;;  %v962_v12 = vadd.f32 %v514_v5, %v66_v1  ;;  %v520_v13 = vld [vmem:[%s6827_s1 + $0x1c8] sm:$0xff]  ;;  %v527_v14 = vld [vmem:[%s6827_s1 + $0x200] sm:$0xff]  ;;  %v74_v15 = vld [vmem:[%s6826_s0 + $0x1d8] sm:$0xff] }
  0x18   :  { %2358 = vmatpush1.bf16.msra.mxu1 %v1887_v60  ;;  %v1408_v11 = vmax.f32 %v960_v63, 0.0  ;;  %v1895_v16 = vpack.c.bf16 %v1411_v4, %v1404_v3  ;;  %v968_v18 = vadd.f32 %v520_v13, %v72_v7  ;;  %v975_v19 = vadd.f32 %v527_v14, %v79_v8  ;;  %v81_v20 = vld [vmem:[%s6826_s0 + $0x210] sm:$0xff]  ;;  %v522_v21 = vld [vmem:[%s6827_s1 + $0x1d8] sm:$0xff]  ;;  %v71_v27 = vld [vmem:[%s6826_s0 + $0x1c0] sm:$0xff] }
  0x19   :  { %v1403_v17 = vmax.f32 %v955_v6, 0.0  ;;  %v529_v22 = vld [vmem:[%s6827_s1 + $0x210] sm:$0xff]  ;;  %2133 = vmatprep.subr.bf16.mxu0 %v1893_v9  ;;  %v1410_v24 = vmax.f32 %v962_v12, 0.0  ;;  %v970_v25 = vadd.f32 %v522_v21, %v74_v15  ;;  %v78_v28 = vld [vmem:[%s6826_s0 + $0x1f8] sm:$0xff]  ;;  %v519_v29 = vld [vmem:[%s6827_s1 + $0x1c0] sm:$0xff] }
  0x1a   :  { %v1892_v23 = vpack.c.bf16 %v1408_v11, %v1401_v10  ;;  %v977_v26 = vadd.f32 %v529_v22, %v81_v20  ;;  %2359 = vmatprep.subr.bf16.mxu1 %v1895_v16  ;;  %v1416_v30 = vmax.f32 %v968_v18, 0.0  ;;  %v1423_v31 = vmax.f32 %v975_v19, 0.0  ;;  %v526_v32 = vld [vmem:[%s6827_s1 + $0x1f8] sm:$0xff]  ;;  %v73_v34 = vld [vmem:[%s6826_s0 + $0x1d0] sm:$0xff]  ;;  %v80_v35 = vld [vmem:[%s6826_s0 + $0x208] sm:$0xff] }
  0x1b   :  { %v967_v33 = vadd.f32 %v519_v29, %v71_v27  ;;  %v1894_v36 = vpack.c.bf16 %v1410_v24, %v1403_v17  ;;  %v1418_v37 = vmax.f32 %v970_v25, 0.0  ;;  %v974_v39 = vadd.f32 %v526_v32, %v78_v28  ;;  %v521_v40 = vld [vmem:[%s6827_s1 + $0x1d0] sm:$0xff]  ;;  %v528_v41 = vld [vmem:[%s6827_s1 + $0x208] sm:$0xff]  ;;  %v86_v42 = vld [vmem:[%s6826_s0 + $0x238] sm:$0xff] }
  0x1c   :  { %2134 = vmatpush1.bf16.msra.mxu0 %v1892_v23  ;;  %v1425_v38 = vmax.f32 %v977_v26, 0.0  ;;  %v1900_v43 = vpack.c.bf16 %v1423_v31, %v1416_v30  ;;  %v969_v45 = vadd.f32 %v521_v40, %v73_v34  ;;  %v976_v46 = vadd.f32 %v528_v41, %v80_v35  ;;  %v93_v47 = vld [vmem:[%s6826_s0 + $0x270] sm:$0xff]  ;;  %v534_v48 = vld [vmem:[%s6827_s1 + $0x238] sm:$0xff]  ;;  %v88_v54 = vld [vmem:[%s6826_s0 + $0x248] sm:$0xff] }
  0x1d   :  { %v1415_v44 = vmax.f32 %v967_v33, 0.0  ;;  %v541_v49 = vld [vmem:[%s6827_s1 + $0x270] sm:$0xff]  ;;  %2360 = vmatpush1.bf16.msra.mxu1 %v1894_v36  ;;  %v1422_v51 = vmax.f32 %v974_v39, 0.0  ;;  %v982_v52 = vadd.f32 %v534_v48, %v86_v42  ;;  %v95_v55 = vld [vmem:[%s6826_s0 + $0x280] sm:$0xff]  ;;  %v536_v56 = vld [vmem:[%s6827_s1 + $0x248] sm:$0xff] }
  0x1e   :  { %v1902_v50 = vpack.c.bf16 %v1425_v38, %v1418_v37  ;;  %v989_v53 = vadd.f32 %v541_v49, %v93_v47  ;;  %2135 = vmatprep.subr.bf16.mxu0 %v1900_v43  ;;  %v1417_v57 = vmax.f32 %v969_v45, 0.0  ;;  %v1424_v58 = vmax.f32 %v976_v46, 0.0  ;;  %v543_v59 = vld [vmem:[%s6827_s1 + $0x280] sm:$0xff]  ;;  %v85_v61 = vld [vmem:[%s6826_s0 + $0x230] sm:$0xff]  ;;  %v92_v62 = vld [vmem:[%s6826_s0 + $0x268] sm:$0xff] }
  0x1f   :  { %v984_v60 = vadd.f32 %v536_v56, %v88_v54  ;;  %v1899_v63 = vpack.c.bf16 %v1422_v51, %v1415_v44  ;;  %v1430_v0 = vmax.f32 %v982_v52, 0.0  ;;  %v991_v2 = vadd.f32 %v543_v59, %v95_v55  ;;  %v533_v3 = vld [vmem:[%s6827_s1 + $0x230] sm:$0xff]  ;;  %v540_v4 = vld [vmem:[%s6827_s1 + $0x268] sm:$0xff]  ;;  %v87_v5 = vld [vmem:[%s6826_s0 + $0x240] sm:$0xff] }
  0x20   :  { %2361 = vmatprep.subr.bf16.mxu1 %v1902_v50  ;;  %v1437_v1 = vmax.f32 %v989_v53, 0.0  ;;  %v1901_v6 = vpack.c.bf16 %v1424_v58, %v1417_v57  ;;  %v981_v8 = vadd.f32 %v533_v3, %v85_v61  ;;  %v988_v9 = vadd.f32 %v540_v4, %v92_v62  ;;  %v94_v10 = vld [vmem:[%s6826_s0 + $0x278] sm:$0xff]  ;;  %v535_v11 = vld [vmem:[%s6827_s1 + $0x240] sm:$0xff]  ;;  %v100_v17 = vld [vmem:[%s6826_s0 + $0x2a8] sm:$0xff] }
  0x21   :  { %v1432_v7 = vmax.f32 %v984_v60, 0.0  ;;  %v542_v12 = vld [vmem:[%s6827_s1 + $0x278] sm:$0xff]  ;;  %2136 = vmatpush1.bf16.msra.mxu0 %v1899_v63  ;;  %v1439_v14 = vmax.f32 %v991_v2, 0.0  ;;  %v983_v15 = vadd.f32 %v535_v11, %v87_v5  ;;  %v107_v18 = vld [vmem:[%s6826_s0 + $0x2e0] sm:$0xff]  ;;  %v548_v19 = vld [vmem:[%s6827_s1 + $0x2a8] sm:$0xff] }
  0x22   :  { %v1907_v13 = vpack.c.bf16 %v1437_v1, %v1430_v0  ;;  %v990_v16 = vadd.f32 %v542_v12, %v94_v10  ;;  %2362 = vmatpush1.bf16.msra.mxu1 %v1901_v6  ;;  %v1429_v20 = vmax.f32 %v981_v8, 0.0  ;;  %v1436_v21 = vmax.f32 %v988_v9, 0.0  ;;  %v555_v22 = vld [vmem:[%s6827_s1 + $0x2e0] sm:$0xff]  ;;  %v102_v24 = vld [vmem:[%s6826_s0 + $0x2b8] sm:$0xff]  ;;  %v109_v25 = vld [vmem:[%s6826_s0 + $0x2f0] sm:$0xff] }
  0x23   :  { %v996_v23 = vadd.f32 %v548_v19, %v100_v17  ;;  %v1909_v26 = vpack.c.bf16 %v1439_v14, %v1432_v7  ;;  %v1431_v27 = vmax.f32 %v983_v15, 0.0  ;;  %v1003_v29 = vadd.f32 %v555_v22, %v107_v18  ;;  %v550_v30 = vld [vmem:[%s6827_s1 + $0x2b8] sm:$0xff]  ;;  %v557_v31 = vld [vmem:[%s6827_s1 + $0x2f0] sm:$0xff]  ;;  %v99_v32 = vld [vmem:[%s6826_s0 + $0x2a0] sm:$0xff] }
  0x24   :  { %2137 = vmatprep.subr.bf16.mxu0 %v1907_v13  ;;  %v1438_v28 = vmax.f32 %v990_v16, 0.0  ;;  %v1906_v33 = vpack.c.bf16 %v1436_v21, %v1429_v20  ;;  %v998_v35 = vadd.f32 %v550_v30, %v102_v24  ;;  %v1005_v36 = vadd.f32 %v557_v31, %v109_v25  ;;  %v106_v37 = vld [vmem:[%s6826_s0 + $0x2d8] sm:$0xff]  ;;  %v547_v38 = vld [vmem:[%s6827_s1 + $0x2a0] sm:$0xff]  ;;  %v101_v44 = vld [vmem:[%s6826_s0 + $0x2b0] sm:$0xff] }
  0x25   :  { %v1444_v34 = vmax.f32 %v996_v23, 0.0  ;;  %v554_v39 = vld [vmem:[%s6827_s1 + $0x2d8] sm:$0xff]  ;;  %2363 = vmatprep.subr.bf16.mxu1 %v1909_v26  ;;  %v1451_v41 = vmax.f32 %v1003_v29, 0.0  ;;  %v995_v42 = vadd.f32 %v547_v38, %v99_v32  ;;  %v108_v45 = vld [vmem:[%s6826_s0 + $0x2e8] sm:$0xff]  ;;  %v549_v46 = vld [vmem:[%s6827_s1 + $0x2b0] sm:$0xff] }
  0x26   :  { %v1908_v40 = vpack.c.bf16 %v1438_v28, %v1431_v27  ;;  %v1002_v43 = vadd.f32 %v554_v39, %v106_v37  ;;  %2138 = vmatpush1.bf16.msra.mxu0 %v1906_v33  ;;  %v1446_v47 = vmax.f32 %v998_v35, 0.0  ;;  %v1453_v48 = vmax.f32 %v1005_v36, 0.0  ;;  %v556_v49 = vld [vmem:[%s6827_s1 + $0x2e8] sm:$0xff]  ;;  %v114_v51 = vld [vmem:[%s6826_s0 + $0x318] sm:$0xff]  ;;  %v121_v52 = vld [vmem:[%s6826_s0 + $0x350] sm:$0xff] }
  0x27   :  { %v997_v50 = vadd.f32 %v549_v46, %v101_v44  ;;  %v1914_v53 = vpack.c.bf16 %v1451_v41, %v1444_v34  ;;  %v1443_v54 = vmax.f32 %v995_v42, 0.0  ;;  %v1004_v56 = vadd.f32 %v556_v49, %v108_v45  ;;  %v562_v57 = vld [vmem:[%s6827_s1 + $0x318] sm:$0xff]  ;;  %v569_v58 = vld [vmem:[%s6827_s1 + $0x350] sm:$0xff]  ;;  %v116_v59 = vld [vmem:[%s6826_s0 + $0x328] sm:$0xff] }
  0x28   :  { %2364 = vmatpush1.bf16.msra.mxu1 %v1908_v40  ;;  %v1450_v55 = vmax.f32 %v1002_v43, 0.0  ;;  %v1916_v60 = vpack.c.bf16 %v1453_v48, %v1446_v47  ;;  %v1010_v62 = vadd.f32 %v562_v57, %v114_v51  ;;  %v1017_v63 = vadd.f32 %v569_v58, %v121_v52  ;;  %v123_v0 = vld [vmem:[%s6826_s0 + $0x360] sm:$0xff]  ;;  %v564_v1 = vld [vmem:[%s6827_s1 + $0x328] sm:$0xff]  ;;  %v113_v7 = vld [vmem:[%s6826_s0 + $0x310] sm:$0xff] }
  0x29   :  { %v1445_v61 = vmax.f32 %v997_v50, 0.0  ;;  %v571_v2 = vld [vmem:[%s6827_s1 + $0x360] sm:$0xff]  ;;  %2139 = vmatprep.subr.bf16.mxu0 %v1914_v53  ;;  %v1452_v4 = vmax.f32 %v1004_v56, 0.0  ;;  %v1012_v5 = vadd.f32 %v564_v1, %v116_v59  ;;  %v120_v8 = vld [vmem:[%s6826_s0 + $0x348] sm:$0xff]  ;;  %v561_v9 = vld [vmem:[%s6827_s1 + $0x310] sm:$0xff] }
  0x2a   :  { %v1913_v3 = vpack.c.bf16 %v1450_v55, %v1443_v54  ;;  %v1019_v6 = vadd.f32 %v571_v2, %v123_v0  ;;  %2365 = vmatprep.subr.bf16.mxu1 %v1916_v60  ;;  %v1458_v10 = vmax.f32 %v1010_v62, 0.0  ;;  %v1465_v11 = vmax.f32 %v1017_v63, 0.0  ;;  %v568_v12 = vld [vmem:[%s6827_s1 + $0x348] sm:$0xff]  ;;  %v115_v14 = vld [vmem:[%s6826_s0 + $0x320] sm:$0xff]  ;;  %v122_v15 = vld [vmem:[%s6826_s0 + $0x358] sm:$0xff] }
  0x2b   :  { %v1009_v13 = vadd.f32 %v561_v9, %v113_v7  ;;  %v1915_v16 = vpack.c.bf16 %v1452_v4, %v1445_v61  ;;  %v1460_v17 = vmax.f32 %v1012_v5, 0.0  ;;  %v1016_v19 = vadd.f32 %v568_v12, %v120_v8  ;;  %v563_v20 = vld [vmem:[%s6827_s1 + $0x320] sm:$0xff]  ;;  %v570_v21 = vld [vmem:[%s6827_s1 + $0x358] sm:$0xff]  ;;  %v128_v22 = vld [vmem:[%s6826_s0 + $0x388] sm:$0xff] }
  0x2c   :  { %2140 = vmatpush1.bf16.msra.mxu0 %v1913_v3  ;;  %v1467_v18 = vmax.f32 %v1019_v6, 0.0  ;;  %v1921_v23 = vpack.c.bf16 %v1465_v11, %v1458_v10  ;;  %v1011_v25 = vadd.f32 %v563_v20, %v115_v14  ;;  %v1018_v26 = vadd.f32 %v570_v21, %v122_v15  ;;  %v135_v27 = vld [vmem:[%s6826_s0 + $0x3c0] sm:$0xff]  ;;  %v576_v28 = vld [vmem:[%s6827_s1 + $0x388] sm:$0xff]  ;;  %v130_v34 = vld [vmem:[%s6826_s0 + $0x398] sm:$0xff] }
  0x2d   :  { %v1457_v24 = vmax.f32 %v1009_v13, 0.0  ;;  %v583_v29 = vld [vmem:[%s6827_s1 + $0x3c0] sm:$0xff]  ;;  %2366 = vmatpush1.bf16.msra.mxu1 %v1915_v16  ;;  %v1464_v31 = vmax.f32 %v1016_v19, 0.0  ;;  %v1024_v32 = vadd.f32 %v576_v28, %v128_v22  ;;  %v137_v35 = vld [vmem:[%s6826_s0 + $0x3d0] sm:$0xff]  ;;  %v578_v36 = vld [vmem:[%s6827_s1 + $0x398] sm:$0xff] }
  0x2e   :  { %v1923_v30 = vpack.c.bf16 %v1467_v18, %v1460_v17  ;;  %v1031_v33 = vadd.f32 %v583_v29, %v135_v27  ;;  %2141 = vmatprep.subr.bf16.mxu0 %v1921_v23  ;;  %v1459_v37 = vmax.f32 %v1011_v25, 0.0  ;;  %v1466_v38 = vmax.f32 %v1018_v26, 0.0  ;;  %v585_v39 = vld [vmem:[%s6827_s1 + $0x3d0] sm:$0xff]  ;;  %v127_v41 = vld [vmem:[%s6826_s0 + $0x380] sm:$0xff]  ;;  %v134_v42 = vld [vmem:[%s6826_s0 + $0x3b8] sm:$0xff] }
  0x2f   :  { %v1026_v40 = vadd.f32 %v578_v36, %v130_v34  ;;  %v1920_v43 = vpack.c.bf16 %v1464_v31, %v1457_v24  ;;  %v1472_v44 = vmax.f32 %v1024_v32, 0.0  ;;  %v1033_v46 = vadd.f32 %v585_v39, %v137_v35  ;;  %v575_v47 = vld [vmem:[%s6827_s1 + $0x380] sm:$0xff]  ;;  %v582_v48 = vld [vmem:[%s6827_s1 + $0x3b8] sm:$0xff]  ;;  %v129_v49 = vld [vmem:[%s6826_s0 + $0x390] sm:$0xff] }
  0x30   :  { %2367 = vmatprep.subr.bf16.mxu1 %v1923_v30  ;;  %v1479_v45 = vmax.f32 %v1031_v33, 0.0  ;;  %v1922_v50 = vpack.c.bf16 %v1466_v38, %v1459_v37  ;;  %v1023_v52 = vadd.f32 %v575_v47, %v127_v41  ;;  %v1030_v53 = vadd.f32 %v582_v48, %v134_v42  ;;  %v136_v54 = vld [vmem:[%s6826_s0 + $0x3c8] sm:$0xff]  ;;  %v577_v55 = vld [vmem:[%s6827_s1 + $0x390] sm:$0xff]  ;;  %v142_v61 = vld [vmem:[%s6826_s0 + $0x3f8] sm:$0xff] }
  0x31   :  { %v1474_v51 = vmax.f32 %v1026_v40, 0.0  ;;  %v584_v56 = vld [vmem:[%s6827_s1 + $0x3c8] sm:$0xff]  ;;  %2142 = vmatpush1.bf16.msra.mxu0 %v1920_v43  ;;  %v1481_v58 = vmax.f32 %v1033_v46, 0.0  ;;  %v1025_v59 = vadd.f32 %v577_v55, %v129_v49  ;;  %v149_v62 = vld [vmem:[%s6826_s0 + $0x430] sm:$0xff]  ;;  %v590_v63 = vld [vmem:[%s6827_s1 + $0x3f8] sm:$0xff] }
  0x32   :  { %v1928_v57 = vpack.c.bf16 %v1479_v45, %v1472_v44  ;;  %v1032_v60 = vadd.f32 %v584_v56, %v136_v54  ;;  %2368 = vmatpush1.bf16.msra.mxu1 %v1922_v50  ;;  %v1471_v0 = vmax.f32 %v1023_v52, 0.0  ;;  %v1478_v1 = vmax.f32 %v1030_v53, 0.0  ;;  %v597_v2 = vld [vmem:[%s6827_s1 + $0x430] sm:$0xff]  ;;  %v144_v4 = vld [vmem:[%s6826_s0 + $0x408] sm:$0xff]  ;;  %v151_v5 = vld [vmem:[%s6826_s0 + $0x440] sm:$0xff] }
  0x33   :  { %v1038_v3 = vadd.f32 %v590_v63, %v142_v61  ;;  %v1930_v6 = vpack.c.bf16 %v1481_v58, %v1474_v51  ;;  %v1473_v7 = vmax.f32 %v1025_v59, 0.0  ;;  %v1045_v9 = vadd.f32 %v597_v2, %v149_v62  ;;  %v592_v10 = vld [vmem:[%s6827_s1 + $0x408] sm:$0xff]  ;;  %v599_v11 = vld [vmem:[%s6827_s1 + $0x440] sm:$0xff]  ;;  %v141_v12 = vld [vmem:[%s6826_s0 + $0x3f0] sm:$0xff] }
  0x34   :  { %2143 = vmatprep.subr.bf16.mxu0 %v1928_v57  ;;  %v1480_v8 = vmax.f32 %v1032_v60, 0.0  ;;  %v1927_v13 = vpack.c.bf16 %v1478_v1, %v1471_v0  ;;  %v1040_v15 = vadd.f32 %v592_v10, %v144_v4  ;;  %v1047_v16 = vadd.f32 %v599_v11, %v151_v5  ;;  %v148_v17 = vld [vmem:[%s6826_s0 + $0x428] sm:$0xff]  ;;  %v589_v18 = vld [vmem:[%s6827_s1 + $0x3f0] sm:$0xff]  ;;  %v143_v24 = vld [vmem:[%s6826_s0 + $0x400] sm:$0xff] }
  0x35   :  { %v1486_v14 = vmax.f32 %v1038_v3, 0.0  ;;  %v596_v19 = vld [vmem:[%s6827_s1 + $0x428] sm:$0xff]  ;;  %2369 = vmatprep.subr.bf16.mxu1 %v1930_v6  ;;  %v1493_v21 = vmax.f32 %v1045_v9, 0.0  ;;  %v1037_v22 = vadd.f32 %v589_v18, %v141_v12  ;;  %v150_v25 = vld [vmem:[%s6826_s0 + $0x438] sm:$0xff]  ;;  %v591_v26 = vld [vmem:[%s6827_s1 + $0x400] sm:$0xff] }
  0x36   :  { %v1929_v20 = vpack.c.bf16 %v1480_v8, %v1473_v7  ;;  %v1044_v23 = vadd.f32 %v596_v19, %v148_v17  ;;  %2144 = vmatpush1.bf16.msra.mxu0 %v1927_v13  ;;  %v1488_v27 = vmax.f32 %v1040_v15, 0.0  ;;  %v1495_v28 = vmax.f32 %v1047_v16, 0.0  ;;  %v598_v29 = vld [vmem:[%s6827_s1 + $0x438] sm:$0xff]  ;;  %v156_v31 = vld [vmem:[%s6826_s0 + $0x468] sm:$0xff]  ;;  %v163_v32 = vld [vmem:[%s6826_s0 + $0x4a0] sm:$0xff] }
  0x37   :  { %v1039_v30 = vadd.f32 %v591_v26, %v143_v24  ;;  %v1935_v33 = vpack.c.bf16 %v1493_v21, %v1486_v14  ;;  %v1485_v34 = vmax.f32 %v1037_v22, 0.0  ;;  %v1046_v36 = vadd.f32 %v598_v29, %v150_v25  ;;  %v604_v37 = vld [vmem:[%s6827_s1 + $0x468] sm:$0xff]  ;;  %v611_v38 = vld [vmem:[%s6827_s1 + $0x4a0] sm:$0xff]  ;;  %v158_v39 = vld [vmem:[%s6826_s0 + $0x478] sm:$0xff] }
  0x38   :  { %2370 = vmatpush1.bf16.msra.mxu1 %v1929_v20  ;;  %v1492_v35 = vmax.f32 %v1044_v23, 0.0  ;;  %v1937_v40 = vpack.c.bf16 %v1495_v28, %v1488_v27  ;;  %v1052_v42 = vadd.f32 %v604_v37, %v156_v31  ;;  %v1059_v43 = vadd.f32 %v611_v38, %v163_v32  ;;  %v165_v44 = vld [vmem:[%s6826_s0 + $0x4b0] sm:$0xff]  ;;  %v606_v45 = vld [vmem:[%s6827_s1 + $0x478] sm:$0xff]  ;;  %v155_v51 = vld [vmem:[%s6826_s0 + $0x460] sm:$0xff] }
  0x39   :  { %v1487_v41 = vmax.f32 %v1039_v30, 0.0  ;;  %v613_v46 = vld [vmem:[%s6827_s1 + $0x4b0] sm:$0xff]  ;;  %2145 = vmatprep.subr.bf16.mxu0 %v1935_v33  ;;  %v1494_v48 = vmax.f32 %v1046_v36, 0.0  ;;  %v1054_v49 = vadd.f32 %v606_v45, %v158_v39  ;;  %v162_v52 = vld [vmem:[%s6826_s0 + $0x498] sm:$0xff]  ;;  %v603_v53 = vld [vmem:[%s6827_s1 + $0x460] sm:$0xff] }
  0x3a   :  { %v1934_v47 = vpack.c.bf16 %v1492_v35, %v1485_v34  ;;  %v1061_v50 = vadd.f32 %v613_v46, %v165_v44  ;;  %2371 = vmatprep.subr.bf16.mxu1 %v1937_v40  ;;  %v1500_v54 = vmax.f32 %v1052_v42, 0.0  ;;  %v1507_v55 = vmax.f32 %v1059_v43, 0.0  ;;  %v610_v56 = vld [vmem:[%s6827_s1 + $0x498] sm:$0xff]  ;;  %v157_v58 = vld [vmem:[%s6826_s0 + $0x470] sm:$0xff]  ;;  %v164_v59 = vld [vmem:[%s6826_s0 + $0x4a8] sm:$0xff] }
  0x3b   :  { %v1051_v57 = vadd.f32 %v603_v53, %v155_v51  ;;  %v1936_v60 = vpack.c.bf16 %v1494_v48, %v1487_v41  ;;  %v1502_v61 = vmax.f32 %v1054_v49, 0.0  ;;  %v1058_v63 = vadd.f32 %v610_v56, %v162_v52  ;;  %v605_v0 = vld [vmem:[%s6827_s1 + $0x470] sm:$0xff]  ;;  %v612_v1 = vld [vmem:[%s6827_s1 + $0x4a8] sm:$0xff]  ;;  %v170_v2 = vld [vmem:[%s6826_s0 + $0x4d8] sm:$0xff] }
  0x3c   :  { %2146 = vmatpush1.bf16.msra.mxu0 %v1934_v47  ;;  %v1509_v62 = vmax.f32 %v1061_v50, 0.0  ;;  %v1942_v3 = vpack.c.bf16 %v1507_v55, %v1500_v54  ;;  %v1053_v5 = vadd.f32 %v605_v0, %v157_v58  ;;  %v1060_v6 = vadd.f32 %v612_v1, %v164_v59  ;;  %v177_v7 = vld [vmem:[%s6826_s0 + $0x510] sm:$0xff]  ;;  %v618_v8 = vld [vmem:[%s6827_s1 + $0x4d8] sm:$0xff]  ;;  %v172_v14 = vld [vmem:[%s6826_s0 + $0x4e8] sm:$0xff] }
  0x3d   :  { %v1499_v4 = vmax.f32 %v1051_v57, 0.0  ;;  %v625_v9 = vld [vmem:[%s6827_s1 + $0x510] sm:$0xff]  ;;  %2372 = vmatpush1.bf16.msra.mxu1 %v1936_v60  ;;  %v1506_v11 = vmax.f32 %v1058_v63, 0.0  ;;  %v1066_v12 = vadd.f32 %v618_v8, %v170_v2  ;;  %v179_v15 = vld [vmem:[%s6826_s0 + $0x520] sm:$0xff]  ;;  %v620_v16 = vld [vmem:[%s6827_s1 + $0x4e8] sm:$0xff] }
  0x3e   :  { %v1944_v10 = vpack.c.bf16 %v1509_v62, %v1502_v61  ;;  %v1073_v13 = vadd.f32 %v625_v9, %v177_v7  ;;  %2147 = vmatprep.subr.bf16.mxu0 %v1942_v3  ;;  %v1501_v17 = vmax.f32 %v1053_v5, 0.0  ;;  %v1508_v18 = vmax.f32 %v1060_v6, 0.0  ;;  %v627_v19 = vld [vmem:[%s6827_s1 + $0x520] sm:$0xff]  ;;  %v169_v21 = vld [vmem:[%s6826_s0 + $0x4d0] sm:$0xff]  ;;  %v176_v22 = vld [vmem:[%s6826_s0 + $0x508] sm:$0xff] }
  0x3f   :  { %v1068_v20 = vadd.f32 %v620_v16, %v172_v14  ;;  %v1941_v23 = vpack.c.bf16 %v1506_v11, %v1499_v4  ;;  %v1514_v24 = vmax.f32 %v1066_v12, 0.0  ;;  %v1075_v26 = vadd.f32 %v627_v19, %v179_v15  ;;  %v617_v27 = vld [vmem:[%s6827_s1 + $0x4d0] sm:$0xff]  ;;  %v624_v28 = vld [vmem:[%s6827_s1 + $0x508] sm:$0xff]  ;;  %v171_v29 = vld [vmem:[%s6826_s0 + $0x4e0] sm:$0xff] }
  0x40   :  { %2373 = vmatprep.subr.bf16.mxu1 %v1944_v10  ;;  %v1521_v25 = vmax.f32 %v1073_v13, 0.0  ;;  %v1943_v30 = vpack.c.bf16 %v1508_v18, %v1501_v17  ;;  %v1065_v32 = vadd.f32 %v617_v27, %v169_v21  ;;  %v1072_v33 = vadd.f32 %v624_v28, %v176_v22  ;;  %v178_v34 = vld [vmem:[%s6826_s0 + $0x518] sm:$0xff]  ;;  %v619_v35 = vld [vmem:[%s6827_s1 + $0x4e0] sm:$0xff]  ;;  %v184_v41 = vld [vmem:[%s6826_s0 + $0x548] sm:$0xff] }
  0x41   :  { %v1516_v31 = vmax.f32 %v1068_v20, 0.0  ;;  %v626_v36 = vld [vmem:[%s6827_s1 + $0x518] sm:$0xff]  ;;  %2148 = vmatpush1.bf16.msra.mxu0 %v1941_v23  ;;  %v1523_v38 = vmax.f32 %v1075_v26, 0.0  ;;  %v1067_v39 = vadd.f32 %v619_v35, %v171_v29  ;;  %v191_v42 = vld [vmem:[%s6826_s0 + $0x580] sm:$0xff]  ;;  %v632_v43 = vld [vmem:[%s6827_s1 + $0x548] sm:$0xff] }
  0x42   :  { %v1949_v37 = vpack.c.bf16 %v1521_v25, %v1514_v24  ;;  %v1074_v40 = vadd.f32 %v626_v36, %v178_v34  ;;  %2374 = vmatpush1.bf16.msra.mxu1 %v1943_v30  ;;  %v1513_v44 = vmax.f32 %v1065_v32, 0.0  ;;  %v1520_v45 = vmax.f32 %v1072_v33, 0.0  ;;  %v639_v46 = vld [vmem:[%s6827_s1 + $0x580] sm:$0xff]  ;;  %v186_v48 = vld [vmem:[%s6826_s0 + $0x558] sm:$0xff]  ;;  %v193_v49 = vld [vmem:[%s6826_s0 + $0x590] sm:$0xff] }
  0x43   :  { %v1080_v47 = vadd.f32 %v632_v43, %v184_v41  ;;  %v1951_v50 = vpack.c.bf16 %v1523_v38, %v1516_v31  ;;  %v1515_v51 = vmax.f32 %v1067_v39, 0.0  ;;  %v1087_v53 = vadd.f32 %v639_v46, %v191_v42  ;;  %v634_v54 = vld [vmem:[%s6827_s1 + $0x558] sm:$0xff]  ;;  %v641_v55 = vld [vmem:[%s6827_s1 + $0x590] sm:$0xff]  ;;  %v183_v56 = vld [vmem:[%s6826_s0 + $0x540] sm:$0xff] }
  0x44   :  { %2149 = vmatprep.subr.bf16.mxu0 %v1949_v37  ;;  %v1522_v52 = vmax.f32 %v1074_v40, 0.0  ;;  %v1948_v57 = vpack.c.bf16 %v1520_v45, %v1513_v44  ;;  %v1082_v59 = vadd.f32 %v634_v54, %v186_v48  ;;  %v1089_v60 = vadd.f32 %v641_v55, %v193_v49  ;;  %v190_v61 = vld [vmem:[%s6826_s0 + $0x578] sm:$0xff]  ;;  %v631_v62 = vld [vmem:[%s6827_s1 + $0x540] sm:$0xff]  ;;  %v185_v4 = vld [vmem:[%s6826_s0 + $0x550] sm:$0xff] }
  0x45   :  { %v1528_v58 = vmax.f32 %v1080_v47, 0.0  ;;  %v638_v63 = vld [vmem:[%s6827_s1 + $0x578] sm:$0xff]  ;;  %2375 = vmatprep.subr.bf16.mxu1 %v1951_v50  ;;  %v1535_v1 = vmax.f32 %v1087_v53, 0.0  ;;  %v1079_v2 = vadd.f32 %v631_v62, %v183_v56  ;;  %v192_v5 = vld [vmem:[%s6826_s0 + $0x588] sm:$0xff]  ;;  %v633_v6 = vld [vmem:[%s6827_s1 + $0x550] sm:$0xff] }
  0x46   :  { %v1950_v0 = vpack.c.bf16 %v1522_v52, %v1515_v51  ;;  %v1086_v3 = vadd.f32 %v638_v63, %v190_v61  ;;  %2150 = vmatpush1.bf16.msra.mxu0 %v1948_v57  ;;  %v1530_v7 = vmax.f32 %v1082_v59, 0.0  ;;  %v1537_v8 = vmax.f32 %v1089_v60, 0.0  ;;  %v640_v9 = vld [vmem:[%s6827_s1 + $0x588] sm:$0xff]  ;;  %v198_v11 = vld [vmem:[%s6826_s0 + $0x5b8] sm:$0xff]  ;;  %v205_v12 = vld [vmem:[%s6826_s0 + $0x5f0] sm:$0xff] }
  0x47   :  { %v1081_v10 = vadd.f32 %v633_v6, %v185_v4  ;;  %v1956_v13 = vpack.c.bf16 %v1535_v1, %v1528_v58  ;;  %v1527_v14 = vmax.f32 %v1079_v2, 0.0  ;;  %v1088_v16 = vadd.f32 %v640_v9, %v192_v5  ;;  %v646_v17 = vld [vmem:[%s6827_s1 + $0x5b8] sm:$0xff]  ;;  %v653_v18 = vld [vmem:[%s6827_s1 + $0x5f0] sm:$0xff]  ;;  %v200_v19 = vld [vmem:[%s6826_s0 + $0x5c8] sm:$0xff] }
  0x48   :  { %2376 = vmatpush1.bf16.msra.mxu1 %v1950_v0  ;;  %v1534_v15 = vmax.f32 %v1086_v3, 0.0  ;;  %v1958_v20 = vpack.c.bf16 %v1537_v8, %v1530_v7  ;;  %v1094_v22 = vadd.f32 %v646_v17, %v198_v11  ;;  %v1101_v23 = vadd.f32 %v653_v18, %v205_v12  ;;  %v207_v24 = vld [vmem:[%s6826_s0 + $0x600] sm:$0xff]  ;;  %v648_v25 = vld [vmem:[%s6827_s1 + $0x5c8] sm:$0xff]  ;;  %v197_v31 = vld [vmem:[%s6826_s0 + $0x5b0] sm:$0xff] }
  0x49   :  { %v1529_v21 = vmax.f32 %v1081_v10, 0.0  ;;  %v655_v26 = vld [vmem:[%s6827_s1 + $0x600] sm:$0xff]  ;;  %2151 = vmatprep.subr.bf16.mxu0 %v1956_v13  ;;  %v1536_v28 = vmax.f32 %v1088_v16, 0.0  ;;  %v1096_v29 = vadd.f32 %v648_v25, %v200_v19  ;;  %v204_v32 = vld [vmem:[%s6826_s0 + $0x5e8] sm:$0xff]  ;;  %v645_v33 = vld [vmem:[%s6827_s1 + $0x5b0] sm:$0xff] }
  0x4a   :  { %v1955_v27 = vpack.c.bf16 %v1534_v15, %v1527_v14  ;;  %v1103_v30 = vadd.f32 %v655_v26, %v207_v24  ;;  %2377 = vmatprep.subr.bf16.mxu1 %v1958_v20  ;;  %v1542_v34 = vmax.f32 %v1094_v22, 0.0  ;;  %v1549_v35 = vmax.f32 %v1101_v23, 0.0  ;;  %v652_v36 = vld [vmem:[%s6827_s1 + $0x5e8] sm:$0xff]  ;;  %v199_v38 = vld [vmem:[%s6826_s0 + $0x5c0] sm:$0xff]  ;;  %v206_v39 = vld [vmem:[%s6826_s0 + $0x5f8] sm:$0xff] }
  0x4b   :  { %v1093_v37 = vadd.f32 %v645_v33, %v197_v31  ;;  %v1957_v40 = vpack.c.bf16 %v1536_v28, %v1529_v21  ;;  %v1544_v41 = vmax.f32 %v1096_v29, 0.0  ;;  %v1100_v43 = vadd.f32 %v652_v36, %v204_v32  ;;  %v647_v44 = vld [vmem:[%s6827_s1 + $0x5c0] sm:$0xff]  ;;  %v654_v45 = vld [vmem:[%s6827_s1 + $0x5f8] sm:$0xff]  ;;  %v212_v46 = vld [vmem:[%s6826_s0 + $0x628] sm:$0xff] }
  0x4c   :  { %2152 = vmatpush1.bf16.msra.mxu0 %v1955_v27  ;;  %v1551_v42 = vmax.f32 %v1103_v30, 0.0  ;;  %v1963_v47 = vpack.c.bf16 %v1549_v35, %v1542_v34  ;;  %v1095_v49 = vadd.f32 %v647_v44, %v199_v38  ;;  %v1102_v50 = vadd.f32 %v654_v45, %v206_v39  ;;  %v219_v51 = vld [vmem:[%s6826_s0 + $0x660] sm:$0xff]  ;;  %v660_v52 = vld [vmem:[%s6827_s1 + $0x628] sm:$0xff]  ;;  %v214_v58 = vld [vmem:[%s6826_s0 + $0x638] sm:$0xff] }
  0x4d   :  { %v1541_v48 = vmax.f32 %v1093_v37, 0.0  ;;  %v667_v53 = vld [vmem:[%s6827_s1 + $0x660] sm:$0xff]  ;;  %2378 = vmatpush1.bf16.msra.mxu1 %v1957_v40  ;;  %v1548_v55 = vmax.f32 %v1100_v43, 0.0  ;;  %v1108_v56 = vadd.f32 %v660_v52, %v212_v46  ;;  %v221_v59 = vld [vmem:[%s6826_s0 + $0x670] sm:$0xff]  ;;  %v662_v60 = vld [vmem:[%s6827_s1 + $0x638] sm:$0xff] }
  0x4e   :  { %v1965_v54 = vpack.c.bf16 %v1551_v42, %v1544_v41  ;;  %v1115_v57 = vadd.f32 %v667_v53, %v219_v51  ;;  %2153 = vmatprep.subr.bf16.mxu0 %v1963_v47  ;;  %v1543_v61 = vmax.f32 %v1095_v49, 0.0  ;;  %v1550_v62 = vmax.f32 %v1102_v50, 0.0  ;;  %v669_v63 = vld [vmem:[%s6827_s1 + $0x670] sm:$0xff]  ;;  %v211_v1 = vld [vmem:[%s6826_s0 + $0x620] sm:$0xff]  ;;  %v218_v2 = vld [vmem:[%s6826_s0 + $0x658] sm:$0xff] }
  0x4f   :  { %v1110_v0 = vadd.f32 %v662_v60, %v214_v58  ;;  %v1962_v3 = vpack.c.bf16 %v1548_v55, %v1541_v48  ;;  %v1556_v4 = vmax.f32 %v1108_v56, 0.0  ;;  %v1117_v6 = vadd.f32 %v669_v63, %v221_v59  ;;  %v659_v7 = vld [vmem:[%s6827_s1 + $0x620] sm:$0xff]  ;;  %v666_v8 = vld [vmem:[%s6827_s1 + $0x658] sm:$0xff]  ;;  %v213_v9 = vld [vmem:[%s6826_s0 + $0x630] sm:$0xff] }
  0x50   :  { %2379 = vmatprep.subr.bf16.mxu1 %v1965_v54  ;;  %v1563_v5 = vmax.f32 %v1115_v57, 0.0  ;;  %v1964_v10 = vpack.c.bf16 %v1550_v62, %v1543_v61  ;;  %v1107_v12 = vadd.f32 %v659_v7, %v211_v1  ;;  %v1114_v13 = vadd.f32 %v666_v8, %v218_v2  ;;  %v220_v14 = vld [vmem:[%s6826_s0 + $0x668] sm:$0xff]  ;;  %v661_v15 = vld [vmem:[%s6827_s1 + $0x630] sm:$0xff]  ;;  %v226_v21 = vld [vmem:[%s6826_s0 + $0x698] sm:$0xff] }
  0x51   :  { %v1558_v11 = vmax.f32 %v1110_v0, 0.0  ;;  %v668_v16 = vld [vmem:[%s6827_s1 + $0x668] sm:$0xff]  ;;  %2154 = vmatpush1.bf16.msra.mxu0 %v1962_v3  ;;  %v1565_v18 = vmax.f32 %v1117_v6, 0.0  ;;  %v1109_v19 = vadd.f32 %v661_v15, %v213_v9  ;;  %v233_v22 = vld [vmem:[%s6826_s0 + $0x6d0] sm:$0xff]  ;;  %v674_v23 = vld [vmem:[%s6827_s1 + $0x698] sm:$0xff] }
  0x52   :  { %v1970_v17 = vpack.c.bf16 %v1563_v5, %v1556_v4  ;;  %v1116_v20 = vadd.f32 %v668_v16, %v220_v14  ;;  %2380 = vmatpush1.bf16.msra.mxu1 %v1964_v10  ;;  %v1555_v24 = vmax.f32 %v1107_v12, 0.0  ;;  %v1562_v25 = vmax.f32 %v1114_v13, 0.0  ;;  %v681_v26 = vld [vmem:[%s6827_s1 + $0x6d0] sm:$0xff]  ;;  %v228_v28 = vld [vmem:[%s6826_s0 + $0x6a8] sm:$0xff]  ;;  %v235_v29 = vld [vmem:[%s6826_s0 + $0x6e0] sm:$0xff] }
  0x53   :  { %v1122_v27 = vadd.f32 %v674_v23, %v226_v21  ;;  %v1972_v30 = vpack.c.bf16 %v1565_v18, %v1558_v11  ;;  %v1557_v31 = vmax.f32 %v1109_v19, 0.0  ;;  %v1129_v33 = vadd.f32 %v681_v26, %v233_v22  ;;  %v676_v34 = vld [vmem:[%s6827_s1 + $0x6a8] sm:$0xff]  ;;  %v683_v35 = vld [vmem:[%s6827_s1 + $0x6e0] sm:$0xff]  ;;  %v225_v36 = vld [vmem:[%s6826_s0 + $0x690] sm:$0xff] }
  0x54   :  { %2155 = vmatprep.subr.bf16.mxu0 %v1970_v17  ;;  %v1564_v32 = vmax.f32 %v1116_v20, 0.0  ;;  %v1969_v37 = vpack.c.bf16 %v1562_v25, %v1555_v24  ;;  %v1124_v39 = vadd.f32 %v676_v34, %v228_v28  ;;  %v1131_v40 = vadd.f32 %v683_v35, %v235_v29  ;;  %v232_v41 = vld [vmem:[%s6826_s0 + $0x6c8] sm:$0xff]  ;;  %v673_v42 = vld [vmem:[%s6827_s1 + $0x690] sm:$0xff]  ;;  %v227_v48 = vld [vmem:[%s6826_s0 + $0x6a0] sm:$0xff] }
  0x55   :  { %v1570_v38 = vmax.f32 %v1122_v27, 0.0  ;;  %v680_v43 = vld [vmem:[%s6827_s1 + $0x6c8] sm:$0xff]  ;;  %2381 = vmatprep.subr.bf16.mxu1 %v1972_v30  ;;  %v1577_v45 = vmax.f32 %v1129_v33, 0.0  ;;  %v1121_v46 = vadd.f32 %v673_v42, %v225_v36  ;;  %v234_v49 = vld [vmem:[%s6826_s0 + $0x6d8] sm:$0xff]  ;;  %v675_v50 = vld [vmem:[%s6827_s1 + $0x6a0] sm:$0xff] }
  0x56   :  { %v1971_v44 = vpack.c.bf16 %v1564_v32, %v1557_v31  ;;  %v1128_v47 = vadd.f32 %v680_v43, %v232_v41  ;;  %2156 = vmatpush1.bf16.msra.mxu0 %v1969_v37  ;;  %v1572_v51 = vmax.f32 %v1124_v39, 0.0  ;;  %v1579_v52 = vmax.f32 %v1131_v40, 0.0  ;;  %v682_v53 = vld [vmem:[%s6827_s1 + $0x6d8] sm:$0xff]  ;;  %v1808_v55 = vld [vmem:[%s6828_s2 + $0x8] sm:$0xff]  ;;  %v1807_v61 = vld [vmem:[%s6828_s2] sm:$0xff] }
  0x57   :  { %v1123_v54 = vadd.f32 %v675_v50, %v227_v48  ;;  %v1812_v56 = vld [vmem:[%s6828_s2 + $0x28] sm:$0xff]  ;;  %v1977_v57 = vpack.c.bf16 %v1577_v45, %v1570_v38  ;;  %v1569_v58 = vmax.f32 %v1121_v46, 0.0  ;;  %v1130_v60 = vadd.f32 %v682_v53, %v234_v49  ;;  %v1811_v62 = vld [vmem:[%s6828_s2 + $0x20] sm:$0xff]  ;;  %v242_v10 = vld [vmem:[%s6826_s0 + $0x718] sm:$0xff] }
  0x58   :  { %2382 = vmatpush1.bf16.msra.mxu1 %v1971_v44  ;;  %v1576_v59 = vmax.f32 %v1128_v47, 0.0  ;;  %v240_v63 = vld [vmem:[%s6826_s0 + $0x708] sm:$0xff]  ;;  %v1979_v0 = vpack.c.bf16 %v1579_v52, %v1572_v51  ;;  %v4143_v2 = vpack.c.bf16 %v1812_v56, %v1808_v55  ;;  %v247_v3 = vld [vmem:[%s6826_s0 + $0x740] sm:$0xff]  ;;  %v249_v11 = vld [vmem:[%s6826_s0 + $0x750] sm:$0xff]  ;;  %v4164_v13 = vpack.c.bf16 %v1811_v62, %v1807_v61 }
  0x59   :  { %v1571_v1 = vmax.f32 %v1123_v54, 0.0  ;;  %v688_v4 = vld [vmem:[%s6827_s1 + $0x708] sm:$0xff]  ;;  %v695_v5 = vld [vmem:[%s6827_s1 + $0x740] sm:$0xff]  ;;  %2157 = vmatprep.subr.bf16.mxu0 %v1977_v57  ;;  %v1578_v7 = vmax.f32 %v1130_v60, 0.0  ;;  %v690_v12 = vld [vmem:[%s6827_s1 + $0x718] sm:$0xff] }
  0x5a   :  { %v1976_v6 = vpack.c.bf16 %v1576_v59, %v1569_v58  ;;  %v1136_v8 = vadd.f32 %v688_v4, %v240_v63  ;;  %v1143_v9 = vadd.f32 %v695_v5, %v247_v3  ;;  %2383 = vmatprep.subr.bf16.mxu1 %v1979_v0  ;;  %2159 = vmatprep.mubr.bf16.mxu0 %v4143_v2  ;;  %v697_v14 = vld [vmem:[%s6827_s1 + $0x750] sm:$0xff]  ;;  %v239_v16 = vld [vmem:[%s6826_s0 + $0x700] sm:$0xff]  ;;  %v246_v17 = vld [vmem:[%s6826_s0 + $0x738] sm:$0xff] }
  0x5b   :  { %v1138_v15 = vadd.f32 %v690_v12, %v242_v10  ;;  %v1978_v18 = vpack.c.bf16 %v1578_v7, %v1571_v1  ;;  %2385 = vmatprep.mubr.bf16.mxu1 %v4143_v2  ;;  %v1145_v21 = vadd.f32 %v697_v14, %v249_v11  ;;  %v687_v22 = vld [vmem:[%s6827_s1 + $0x700] sm:$0xff]  ;;  %v694_v23 = vld [vmem:[%s6827_s1 + $0x738] sm:$0xff]  ;;  %v241_v24 = vld [vmem:[%s6826_s0 + $0x710] sm:$0xff] }
  0x5c   :  { %2158 = vmatpush1.bf16.msra.mxu0 %v1976_v6  ;;  %v1584_v19 = vmax.f32 %v1136_v8, 0.0  ;;  %v1591_v20 = vmax.f32 %v1143_v9, 0.0  ;;  %v1135_v26 = vadd.f32 %v687_v22, %v239_v16  ;;  %v1142_v27 = vadd.f32 %v694_v23, %v246_v17  ;;  %v248_v28 = vld [vmem:[%s6826_s0 + $0x748] sm:$0xff]  ;;  %v689_v29 = vld [vmem:[%s6827_s1 + $0x710] sm:$0xff]  ;;  %v254_v35 = vld [vmem:[%s6826_s0 + $0x778] sm:$0xff] }
  0x5d   :  { %v1586_v25 = vmax.f32 %v1138_v15, 0.0  ;;  %v696_v30 = vld [vmem:[%s6827_s1 + $0x748] sm:$0xff]  ;;  %2384 = vmatpush1.bf16.msra.mxu1 %v1978_v18  ;;  %v1593_v32 = vmax.f32 %v1145_v21, 0.0  ;;  %v1137_v33 = vadd.f32 %v689_v29, %v241_v24  ;;  %v261_v36 = vld [vmem:[%s6826_s0 + $0x7b0] sm:$0xff]  ;;  %v702_v37 = vld [vmem:[%s6827_s1 + $0x778] sm:$0xff] }
  0x5e   :  { %v1984_v31 = vpack.c.bf16 %v1591_v20, %v1584_v19  ;;  %v1144_v34 = vadd.f32 %v696_v30, %v248_v28  ;;  %v1583_v38 = vmax.f32 %v1135_v26, 0.0  ;;  %v1590_v39 = vmax.f32 %v1142_v27, 0.0  ;;  %v709_v40 = vld [vmem:[%s6827_s1 + $0x7b0] sm:$0xff]  ;;  %v256_v42 = vld [vmem:[%s6826_s0 + $0x788] sm:$0xff]  ;;  %v263_v43 = vld [vmem:[%s6826_s0 + $0x7c0] sm:$0xff] }
  0x5f   :  { %2160 = vmatmul.mubr.bf16.vlgmr.msra.gmra.mrb[0].mxu0 %v4164_v13  ;;  %v1150_v41 = vadd.f32 %v702_v37, %v254_v35  ;;  %v1986_v44 = vpack.c.bf16 %v1593_v32, %v1586_v25  ;;  %v1585_v45 = vmax.f32 %v1137_v33, 0.0  ;;  %v1157_v47 = vadd.f32 %v709_v40, %v261_v36  ;;  %v704_v48 = vld [vmem:[%s6827_s1 + $0x788] sm:$0xff]  ;;  %v711_v49 = vld [vmem:[%s6827_s1 + $0x7c0] sm:$0xff]  ;;  %v253_v50 = vld [vmem:[%s6826_s0 + $0x770] sm:$0xff] }
  0x60   :  { %2240 = vmatprep.subr.bf16.mxu0 %v1984_v31  ;;  %v1592_v46 = vmax.f32 %v1144_v34, 0.0  ;;  %2386 = vmatmul.mubr.bf16.vlgmr.msra.gmra.mrb[0].mxu1 %v4164_v13  ;;  %v1983_v51 = vpack.c.bf16 %v1590_v39, %v1583_v38  ;;  %v1152_v53 = vadd.f32 %v704_v48, %v256_v42  ;;  %v1159_v54 = vadd.f32 %v711_v49, %v263_v43  ;;  %v260_v55 = vld [vmem:[%s6826_s0 + $0x7a8] sm:$0xff]  ;;  %v701_v56 = vld [vmem:[%s6827_s1 + $0x770] sm:$0xff]  ;;  %v255_v62 = vld [vmem:[%s6826_s0 + $0x780] sm:$0xff] }
  0x61   :  { %v1598_v52 = vmax.f32 %v1150_v41, 0.0  ;;  %v708_v57 = vld [vmem:[%s6827_s1 + $0x7a8] sm:$0xff]  ;;  %2466 = vmatprep.subr.bf16.mxu1 %v1986_v44  ;;  %v1605_v59 = vmax.f32 %v1157_v47, 0.0  ;;  %v1149_v60 = vadd.f32 %v701_v56, %v253_v50  ;;  %v262_v63 = vld [vmem:[%s6826_s0 + $0x7b8] sm:$0xff]  ;;  %v703_v0 = vld [vmem:[%s6827_s1 + $0x780] sm:$0xff] }
  0x62   :  { %v1985_v58 = vpack.c.bf16 %v1592_v46, %v1585_v45  ;;  %v1156_v61 = vadd.f32 %v708_v57, %v260_v55  ;;  %2241 = vmatpush1.bf16.msra.mxu0 %v1983_v51  ;;  %v1600_v1 = vmax.f32 %v1152_v53, 0.0  ;;  %v1607_v3 = vmax.f32 %v1159_v54, 0.0  ;;  %v710_v4 = vld [vmem:[%s6827_s1 + $0x7b8] sm:$0xff]  ;;  %v1816_v6 = vld [vmem:[%s6828_s2 + $0x48] sm:$0xff]  ;;  %v1815_v12 = vld [vmem:[%s6828_s2 + $0x40] sm:$0xff] }
  0x63   :  { %v1151_v5 = vadd.f32 %v703_v0, %v255_v62  ;;  %v1820_v7 = vld [vmem:[%s6828_s2 + $0x68] sm:$0xff]  ;;  %v1991_v8 = vpack.c.bf16 %v1605_v59, %v1598_v52  ;;  %v1597_v9 = vmax.f32 %v1149_v60, 0.0  ;;  %v1158_v11 = vadd.f32 %v710_v4, %v262_v63  ;;  %v1819_v14 = vld [vmem:[%s6828_s2 + $0x60] sm:$0xff]  ;;  %v270_v27 = vld [vmem:[%s6826_s0 + $0x7f8] sm:$0xff] }
  0x64   :  { %2467 = vmatpush1.bf16.msra.mxu1 %v1985_v58  ;;  %v1604_v10 = vmax.f32 %v1156_v61, 0.0  ;;  %v268_v15 = vld [vmem:[%s6826_s0 + $0x7e8] sm:$0xff]  ;;  %v1993_v16 = vpack.c.bf16 %v1607_v3, %v1600_v1  ;;  %v4259_v18 = vpack.c.bf16 %v1820_v7, %v1816_v6  ;;  %v4261_v19 = vpack.c.bf16 %v1819_v14, %v1815_v12  ;;  %v275_v20 = vld [vmem:[%s6826_s0 + $0x820] sm:$0xff]  ;;  %v277_v28 = vld [vmem:[%s6826_s0 + $0x830] sm:$0xff] }
  0x65   :  { %v1599_v17 = vmax.f32 %v1151_v5, 0.0  ;;  %v716_v21 = vld [vmem:[%s6827_s1 + $0x7e8] sm:$0xff]  ;;  %v723_v22 = vld [vmem:[%s6827_s1 + $0x820] sm:$0xff]  ;;  %2242 = vmatprep.subr.bf16.mxu0 %v1991_v8  ;;  %v1606_v24 = vmax.f32 %v1158_v11, 0.0  ;;  %v718_v29 = vld [vmem:[%s6827_s1 + $0x7f8] sm:$0xff] }
  0x66   :  { %v1990_v23 = vpack.c.bf16 %v1604_v10, %v1597_v9  ;;  %v1164_v25 = vadd.f32 %v716_v21, %v268_v15  ;;  %v1171_v26 = vadd.f32 %v723_v22, %v275_v20  ;;  %2468 = vmatprep.subr.bf16.mxu1 %v1993_v16  ;;  %2169 = vmatprep.mubr.bf16.mxu0 %v4259_v18  ;;  %v725_v30 = vld [vmem:[%s6827_s1 + $0x830] sm:$0xff]  ;;  %v267_v32 = vld [vmem:[%s6826_s0 + $0x7e0] sm:$0xff]  ;;  %v274_v33 = vld [vmem:[%s6826_s0 + $0x818] sm:$0xff] }
  0x67   :  { %v1166_v31 = vadd.f32 %v718_v29, %v270_v27  ;;  %v1992_v34 = vpack.c.bf16 %v1606_v24, %v1599_v17  ;;  %2395 = vmatprep.mubr.bf16.mxu1 %v4259_v18  ;;  %v1173_v37 = vadd.f32 %v725_v30, %v277_v28  ;;  %v715_v38 = vld [vmem:[%s6827_s1 + $0x7e0] sm:$0xff]  ;;  %v722_v39 = vld [vmem:[%s6827_s1 + $0x818] sm:$0xff]  ;;  %v269_v40 = vld [vmem:[%s6826_s0 + $0x7f0] sm:$0xff]  ;;  %2170 = vmatmul.mubr.bf16.gmra.mrb[4].mxu0 %v4261_v19 }
  0x68   :  { %2243 = vmatpush1.bf16.msra.mxu0 %v1990_v23  ;;  %v1612_v35 = vmax.f32 %v1164_v25, 0.0  ;;  %v1619_v36 = vmax.f32 %v1171_v26, 0.0  ;;  %2396 = vmatmul.mubr.bf16.gmra.mrb[4].mxu1 %v4261_v19  ;;  %v1163_v42 = vadd.f32 %v715_v38, %v267_v32  ;;  %v1170_v43 = vadd.f32 %v722_v39, %v274_v33  ;;  %v276_v44 = vld [vmem:[%s6826_s0 + $0x828] sm:$0xff]  ;;  %v717_v45 = vld [vmem:[%s6827_s1 + $0x7f0] sm:$0xff]  ;;  %v282_v51 = vld [vmem:[%s6826_s0 + $0x858] sm:$0xff] }
  0x69   :  { %v1614_v41 = vmax.f32 %v1166_v31, 0.0  ;;  %v724_v46 = vld [vmem:[%s6827_s1 + $0x828] sm:$0xff]  ;;  %2469 = vmatpush1.bf16.msra.mxu1 %v1992_v34  ;;  %v1621_v48 = vmax.f32 %v1173_v37, 0.0  ;;  %v1165_v49 = vadd.f32 %v717_v45, %v269_v40  ;;  %v289_v52 = vld [vmem:[%s6826_s0 + $0x890] sm:$0xff]  ;;  %v730_v53 = vld [vmem:[%s6827_s1 + $0x858] sm:$0xff] }
  0x6a   :  { %v1998_v47 = vpack.c.bf16 %v1619_v36, %v1612_v35  ;;  %v1172_v50 = vadd.f32 %v724_v46, %v276_v44  ;;  %v1611_v54 = vmax.f32 %v1163_v42, 0.0  ;;  %v1618_v55 = vmax.f32 %v1170_v43, 0.0  ;;  %v737_v56 = vld [vmem:[%s6827_s1 + $0x890] sm:$0xff]  ;;  %v284_v58 = vld [vmem:[%s6826_s0 + $0x868] sm:$0xff]  ;;  %v291_v59 = vld [vmem:[%s6826_s0 + $0x8a0] sm:$0xff] }
  0x6b   :  { %v1178_v57 = vadd.f32 %v730_v53, %v282_v51  ;;  %v2000_v60 = vpack.c.bf16 %v1621_v48, %v1614_v41  ;;  %v1613_v61 = vmax.f32 %v1165_v49, 0.0  ;;  %v1185_v63 = vadd.f32 %v737_v56, %v289_v52  ;;  %v732_v0 = vld [vmem:[%s6827_s1 + $0x868] sm:$0xff]  ;;  %v739_v1 = vld [vmem:[%s6827_s1 + $0x8a0] sm:$0xff]  ;;  %v281_v3 = vld [vmem:[%s6826_s0 + $0x850] sm:$0xff] }
  0x6c   :  { %2244 = vmatprep.subr.bf16.mxu0 %v1998_v47  ;;  %v1620_v62 = vmax.f32 %v1172_v50, 0.0  ;;  %v1997_v4 = vpack.c.bf16 %v1618_v55, %v1611_v54  ;;  %v1180_v6 = vadd.f32 %v732_v0, %v284_v58  ;;  %v1187_v7 = vadd.f32 %v739_v1, %v291_v59  ;;  %v288_v8 = vld [vmem:[%s6826_s0 + $0x888] sm:$0xff]  ;;  %v729_v9 = vld [vmem:[%s6827_s1 + $0x850] sm:$0xff]  ;;  %v283_v16 = vld [vmem:[%s6826_s0 + $0x860] sm:$0xff] }
  0x6d   :  { %v1626_v5 = vmax.f32 %v1178_v57, 0.0  ;;  %v736_v10 = vld [vmem:[%s6827_s1 + $0x888] sm:$0xff]  ;;  %2470 = vmatprep.subr.bf16.mxu1 %v2000_v60  ;;  %v1633_v12 = vmax.f32 %v1185_v63, 0.0  ;;  %v1177_v14 = vadd.f32 %v729_v9, %v281_v3  ;;  %v290_v17 = vld [vmem:[%s6826_s0 + $0x898] sm:$0xff]  ;;  %v731_v20 = vld [vmem:[%s6827_s1 + $0x860] sm:$0xff] }
  0x6e   :  { %v1999_v11 = vpack.c.bf16 %v1620_v62, %v1613_v61  ;;  %v1184_v15 = vadd.f32 %v736_v10, %v288_v8  ;;  %2245 = vmatpush1.bf16.msra.mxu0 %v1997_v4  ;;  %v1628_v21 = vmax.f32 %v1180_v6, 0.0  ;;  %v1635_v22 = vmax.f32 %v1187_v7, 0.0  ;;  %v738_v23 = vld [vmem:[%s6827_s1 + $0x898] sm:$0xff]  ;;  %v1824_v25 = vld [vmem:[%s6828_s2 + $0x88] sm:$0xff]  ;;  %v1823_v31 = vld [vmem:[%s6828_s2 + $0x80] sm:$0xff] }
  0x6f   :  { %v1179_v24 = vadd.f32 %v731_v20, %v283_v16  ;;  %v1828_v26 = vld [vmem:[%s6828_s2 + $0xa8] sm:$0xff]  ;;  %v2005_v27 = vpack.c.bf16 %v1633_v12, %v1626_v5  ;;  %v1625_v28 = vmax.f32 %v1177_v14, 0.0  ;;  %v1186_v30 = vadd.f32 %v738_v23, %v290_v17  ;;  %v1827_v32 = vld [vmem:[%s6828_s2 + $0xa0] sm:$0xff]  ;;  %v298_v45 = vld [vmem:[%s6826_s0 + $0x8d8] sm:$0xff] }
  0x70   :  { %2471 = vmatpush1.bf16.msra.mxu1 %v1999_v11  ;;  %v1632_v29 = vmax.f32 %v1184_v15, 0.0  ;;  %v296_v33 = vld [vmem:[%s6826_s0 + $0x8c8] sm:$0xff]  ;;  %v2007_v34 = vpack.c.bf16 %v1635_v22, %v1628_v21  ;;  %v4375_v36 = vpack.c.bf16 %v1828_v26, %v1824_v25  ;;  %v4377_v37 = vpack.c.bf16 %v1827_v32, %v1823_v31  ;;  %v303_v38 = vld [vmem:[%s6826_s0 + $0x900] sm:$0xff]  ;;  %v305_v46 = vld [vmem:[%s6826_s0 + $0x910] sm:$0xff] }
  0x71   :  { %v1627_v35 = vmax.f32 %v1179_v24, 0.0  ;;  %v744_v39 = vld [vmem:[%s6827_s1 + $0x8c8] sm:$0xff]  ;;  %v751_v40 = vld [vmem:[%s6827_s1 + $0x900] sm:$0xff]  ;;  %2246 = vmatprep.subr.bf16.mxu0 %v2005_v27  ;;  %v1634_v42 = vmax.f32 %v1186_v30, 0.0  ;;  %v746_v47 = vld [vmem:[%s6827_s1 + $0x8d8] sm:$0xff] }
  0x72   :  { %v2004_v41 = vpack.c.bf16 %v1632_v29, %v1625_v28  ;;  %v1192_v43 = vadd.f32 %v744_v39, %v296_v33  ;;  %v1199_v44 = vadd.f32 %v751_v40, %v303_v38  ;;  %2472 = vmatprep.subr.bf16.mxu1 %v2007_v34  ;;  %2179 = vmatprep.mubr.bf16.mxu0 %v4375_v36  ;;  %v753_v48 = vld [vmem:[%s6827_s1 + $0x910] sm:$0xff]  ;;  %v295_v50 = vld [vmem:[%s6826_s0 + $0x8c0] sm:$0xff]  ;;  %v302_v51 = vld [vmem:[%s6826_s0 + $0x8f8] sm:$0xff] }
  0x73   :  { %v1194_v49 = vadd.f32 %v746_v47, %v298_v45  ;;  %v2006_v52 = vpack.c.bf16 %v1634_v42, %v1627_v35  ;;  %2405 = vmatprep.mubr.bf16.mxu1 %v4375_v36  ;;  %v1201_v55 = vadd.f32 %v753_v48, %v305_v46  ;;  %v743_v56 = vld [vmem:[%s6827_s1 + $0x8c0] sm:$0xff]  ;;  %v750_v57 = vld [vmem:[%s6827_s1 + $0x8f8] sm:$0xff]  ;;  %v297_v58 = vld [vmem:[%s6826_s0 + $0x8d0] sm:$0xff]  ;;  %2180 = vmatmul.mubr.bf16.gmra.mrb[8].mxu0 %v4377_v37 }
  0x74   :  { %2247 = vmatpush1.bf16.msra.mxu0 %v2004_v41  ;;  %v1640_v53 = vmax.f32 %v1192_v43, 0.0  ;;  %v1647_v54 = vmax.f32 %v1199_v44, 0.0  ;;  %2406 = vmatmul.mubr.bf16.gmra.mrb[8].mxu1 %v4377_v37  ;;  %v1191_v60 = vadd.f32 %v743_v56, %v295_v50  ;;  %v1198_v61 = vadd.f32 %v750_v57, %v302_v51  ;;  %v304_v62 = vld [vmem:[%s6826_s0 + $0x908] sm:$0xff]  ;;  %v745_v63 = vld [vmem:[%s6827_s1 + $0x8d0] sm:$0xff]  ;;  %v310_v6 = vld [vmem:[%s6826_s0 + $0x938] sm:$0xff] }
  0x75   :  { %v1642_v59 = vmax.f32 %v1194_v49, 0.0  ;;  %v752_v0 = vld [vmem:[%s6827_s1 + $0x908] sm:$0xff]  ;;  %2473 = vmatpush1.bf16.msra.mxu1 %v2006_v52  ;;  %v1649_v3 = vmax.f32 %v1201_v55, 0.0  ;;  %v1193_v4 = vadd.f32 %v745_v63, %v297_v58  ;;  %v317_v7 = vld [vmem:[%s6826_s0 + $0x970] sm:$0xff]  ;;  %v758_v8 = vld [vmem:[%s6827_s1 + $0x938] sm:$0xff] }
  0x76   :  { %v2012_v1 = vpack.c.bf16 %v1647_v54, %v1640_v53  ;;  %v1200_v5 = vadd.f32 %v752_v0, %v304_v62  ;;  %v1639_v9 = vmax.f32 %v1191_v60, 0.0  ;;  %v1646_v10 = vmax.f32 %v1198_v61, 0.0  ;;  %v765_v11 = vld [vmem:[%s6827_s1 + $0x970] sm:$0xff]  ;;  %v312_v14 = vld [vmem:[%s6826_s0 + $0x948] sm:$0xff]  ;;  %v319_v15 = vld [vmem:[%s6826_s0 + $0x980] sm:$0xff] }
  0x77   :  { %v1206_v12 = vadd.f32 %v758_v8, %v310_v6  ;;  %v2014_v16 = vpack.c.bf16 %v1649_v3, %v1642_v59  ;;  %v1641_v17 = vmax.f32 %v1193_v4, 0.0  ;;  %v1213_v21 = vadd.f32 %v765_v11, %v317_v7  ;;  %v760_v22 = vld [vmem:[%s6827_s1 + $0x948] sm:$0xff]  ;;  %v767_v23 = vld [vmem:[%s6827_s1 + $0x980] sm:$0xff]  ;;  %v309_v24 = vld [vmem:[%s6826_s0 + $0x930] sm:$0xff] }
  0x78   :  { %2248 = vmatprep.subr.bf16.mxu0 %v2012_v1  ;;  %v1648_v20 = vmax.f32 %v1200_v5, 0.0  ;;  %v2011_v25 = vpack.c.bf16 %v1646_v10, %v1639_v9  ;;  %v1208_v27 = vadd.f32 %v760_v22, %v312_v14  ;;  %v1215_v28 = vadd.f32 %v767_v23, %v319_v15  ;;  %v316_v29 = vld [vmem:[%s6826_s0 + $0x968] sm:$0xff]  ;;  %v757_v30 = vld [vmem:[%s6827_s1 + $0x930] sm:$0xff]  ;;  %v311_v38 = vld [vmem:[%s6826_s0 + $0x940] sm:$0xff] }
  0x79   :  { %v1654_v26 = vmax.f32 %v1206_v12, 0.0  ;;  %v764_v31 = vld [vmem:[%s6827_s1 + $0x968] sm:$0xff]  ;;  %2474 = vmatprep.subr.bf16.mxu1 %v2014_v16  ;;  %v1661_v33 = vmax.f32 %v1213_v21, 0.0  ;;  %v1205_v34 = vadd.f32 %v757_v30, %v309_v24  ;;  %v318_v39 = vld [vmem:[%s6826_s0 + $0x978] sm:$0xff]  ;;  %v759_v40 = vld [vmem:[%s6827_s1 + $0x940] sm:$0xff] }
  0x7a   :  { %v2013_v32 = vpack.c.bf16 %v1648_v20, %v1641_v17  ;;  %v1212_v35 = vadd.f32 %v764_v31, %v316_v29  ;;  %2249 = vmatpush1.bf16.msra.mxu0 %v2011_v25  ;;  %v1656_v41 = vmax.f32 %v1208_v27, 0.0  ;;  %v1663_v42 = vmax.f32 %v1215_v28, 0.0  ;;  %v766_v43 = vld [vmem:[%s6827_s1 + $0x978] sm:$0xff]  ;;  %v1832_v45 = vld [vmem:[%s6828_s2 + $0xc8] sm:$0xff]  ;;  %v1831_v51 = vld [vmem:[%s6828_s2 + $0xc0] sm:$0xff] }
  0x7b   :  { %v1207_v44 = vadd.f32 %v759_v40, %v311_v38  ;;  %v1836_v46 = vld [vmem:[%s6828_s2 + $0xe8] sm:$0xff]  ;;  %v2019_v47 = vpack.c.bf16 %v1661_v33, %v1654_v26  ;;  %v1653_v48 = vmax.f32 %v1205_v34, 0.0  ;;  %v1214_v50 = vadd.f32 %v766_v43, %v318_v39  ;;  %v1835_v52 = vld [vmem:[%s6828_s2 + $0xe0] sm:$0xff]  ;;  %v326_v1 = vld [vmem:[%s6826_s0 + $0x9b8] sm:$0xff] }
  0x7c   :  { %2475 = vmatpush1.bf16.msra.mxu1 %v2013_v32  ;;  %v1660_v49 = vmax.f32 %v1212_v35, 0.0  ;;  %v324_v53 = vld [vmem:[%s6826_s0 + $0x9a8] sm:$0xff]  ;;  %v2021_v54 = vpack.c.bf16 %v1663_v42, %v1656_v41  ;;  %v4491_v56 = vpack.c.bf16 %v1836_v46, %v1832_v45  ;;  %v4493_v57 = vpack.c.bf16 %v1835_v52, %v1831_v51  ;;  %v331_v58 = vld [vmem:[%s6826_s0 + $0x9e0] sm:$0xff]  ;;  %v333_v3 = vld [vmem:[%s6826_s0 + $0x9f0] sm:$0xff] }
  0x7d   :  { %v1655_v55 = vmax.f32 %v1207_v44, 0.0  ;;  %v772_v59 = vld [vmem:[%s6827_s1 + $0x9a8] sm:$0xff]  ;;  %v779_v60 = vld [vmem:[%s6827_s1 + $0x9e0] sm:$0xff]  ;;  %2250 = vmatprep.subr.bf16.mxu0 %v2019_v47  ;;  %v1662_v62 = vmax.f32 %v1214_v50, 0.0  ;;  %v774_v4 = vld [vmem:[%s6827_s1 + $0x9b8] sm:$0xff] }
  0x7e   :  { %v2018_v61 = vpack.c.bf16 %v1660_v49, %v1653_v48  ;;  %v1220_v63 = vadd.f32 %v772_v59, %v324_v53  ;;  %v1227_v0 = vadd.f32 %v779_v60, %v331_v58  ;;  %2476 = vmatprep.subr.bf16.mxu1 %v2021_v54  ;;  %2189 = vmatprep.mubr.bf16.mxu0 %v4491_v56  ;;  %v781_v5 = vld [vmem:[%s6827_s1 + $0x9f0] sm:$0xff]  ;;  %v323_v7 = vld [vmem:[%s6826_s0 + $0x9a0] sm:$0xff]  ;;  %v330_v8 = vld [vmem:[%s6826_s0 + $0x9d8] sm:$0xff] }
  0x7f   :  { %v1222_v6 = vadd.f32 %v774_v4, %v326_v1  ;;  %v2020_v9 = vpack.c.bf16 %v1662_v62, %v1655_v55  ;;  %2415 = vmatprep.mubr.bf16.mxu1 %v4491_v56  ;;  %v1229_v12 = vadd.f32 %v781_v5, %v333_v3  ;;  %v771_v14 = vld [vmem:[%s6827_s1 + $0x9a0] sm:$0xff]  ;;  %v778_v15 = vld [vmem:[%s6827_s1 + $0x9d8] sm:$0xff]  ;;  %v325_v16 = vld [vmem:[%s6826_s0 + $0x9b0] sm:$0xff]  ;;  %2190 = vmatmul.mubr.bf16.gmra.mrb[12].mxu0 %v4493_v57 }
  0x80   :  { %2251 = vmatpush1.bf16.msra.mxu0 %v2018_v61  ;;  %v1668_v10 = vmax.f32 %v1220_v63, 0.0  ;;  %v1675_v11 = vmax.f32 %v1227_v0, 0.0  ;;  %2416 = vmatmul.mubr.bf16.gmra.mrb[12].mxu1 %v4493_v57  ;;  %v1219_v20 = vadd.f32 %v771_v14, %v323_v7  ;;  %v1226_v21 = vadd.f32 %v778_v15, %v330_v8  ;;  %v332_v22 = vld [vmem:[%s6826_s0 + $0x9e8] sm:$0xff]  ;;  %v773_v23 = vld [vmem:[%s6827_s1 + $0x9b0] sm:$0xff]  ;;  %v338_v29 = vld [vmem:[%s6826_s0 + $0xa18] sm:$0xff] }
  0x81   :  { %v1670_v17 = vmax.f32 %v1222_v6, 0.0  ;;  %v780_v24 = vld [vmem:[%s6827_s1 + $0x9e8] sm:$0xff]  ;;  %2477 = vmatpush1.bf16.msra.mxu1 %v2020_v9  ;;  %v1677_v26 = vmax.f32 %v1229_v12, 0.0  ;;  %v1221_v27 = vadd.f32 %v773_v23, %v325_v16  ;;  %v345_v30 = vld [vmem:[%s6826_s0 + $0xa50] sm:$0xff]  ;;  %v786_v31 = vld [vmem:[%s6827_s1 + $0xa18] sm:$0xff] }
  0x82   :  { %v2026_v25 = vpack.c.bf16 %v1675_v11, %v1668_v10  ;;  %v1228_v28 = vadd.f32 %v780_v24, %v332_v22  ;;  %v1667_v32 = vmax.f32 %v1219_v20, 0.0  ;;  %v1674_v33 = vmax.f32 %v1226_v21, 0.0  ;;  %v793_v34 = vld [vmem:[%s6827_s1 + $0xa50] sm:$0xff]  ;;  %v340_v38 = vld [vmem:[%s6826_s0 + $0xa28] sm:$0xff]  ;;  %v347_v39 = vld [vmem:[%s6826_s0 + $0xa60] sm:$0xff] }
  0x83   :  { %v1234_v35 = vadd.f32 %v786_v31, %v338_v29  ;;  %v2028_v40 = vpack.c.bf16 %v1677_v26, %v1670_v17  ;;  %v1669_v41 = vmax.f32 %v1221_v27, 0.0  ;;  %v1241_v43 = vadd.f32 %v793_v34, %v345_v30  ;;  %v788_v44 = vld [vmem:[%s6827_s1 + $0xa28] sm:$0xff]  ;;  %v795_v45 = vld [vmem:[%s6827_s1 + $0xa60] sm:$0xff]  ;;  %v337_v46 = vld [vmem:[%s6826_s0 + $0xa10] sm:$0xff] }
  0x84   :  { %2252 = vmatprep.subr.bf16.mxu0 %v2026_v25  ;;  %v1676_v42 = vmax.f32 %v1228_v28, 0.0  ;;  %v2025_v47 = vpack.c.bf16 %v1674_v33, %v1667_v32  ;;  %v1236_v49 = vadd.f32 %v788_v44, %v340_v38  ;;  %v1243_v50 = vadd.f32 %v795_v45, %v347_v39  ;;  %v344_v51 = vld [vmem:[%s6826_s0 + $0xa48] sm:$0xff]  ;;  %v785_v52 = vld [vmem:[%s6827_s1 + $0xa10] sm:$0xff]  ;;  %v339_v60 = vld [vmem:[%s6826_s0 + $0xa20] sm:$0xff] }
  0x85   :  { %v1682_v48 = vmax.f32 %v1234_v35, 0.0  ;;  %v792_v53 = vld [vmem:[%s6827_s1 + $0xa48] sm:$0xff]  ;;  %2478 = vmatprep.subr.bf16.mxu1 %v2028_v40  ;;  %v1689_v55 = vmax.f32 %v1241_v43, 0.0  ;;  %v1233_v58 = vadd.f32 %v785_v52, %v337_v46  ;;  %v346_v61 = vld [vmem:[%s6826_s0 + $0xa58] sm:$0xff]  ;;  %v787_v62 = vld [vmem:[%s6827_s1 + $0xa20] sm:$0xff] }
  0x86   :  { %v2027_v54 = vpack.c.bf16 %v1676_v42, %v1669_v41  ;;  %v1240_v59 = vadd.f32 %v792_v53, %v344_v51  ;;  %2253 = vmatpush1.bf16.msra.mxu0 %v2025_v47  ;;  %v1684_v63 = vmax.f32 %v1236_v49, 0.0  ;;  %v1691_v0 = vmax.f32 %v1243_v50, 0.0  ;;  %v794_v1 = vld [vmem:[%s6827_s1 + $0xa58] sm:$0xff]  ;;  %v1840_v4 = vld [vmem:[%s6828_s2 + $0x108] sm:$0xff]  ;;  %v1839_v10 = vld [vmem:[%s6828_s2 + $0x100] sm:$0xff] }
  0x87   :  { %v1235_v3 = vadd.f32 %v787_v62, %v339_v60  ;;  %v1844_v5 = vld [vmem:[%s6828_s2 + $0x128] sm:$0xff]  ;;  %v2033_v6 = vpack.c.bf16 %v1689_v55, %v1682_v48  ;;  %v1681_v7 = vmax.f32 %v1233_v58, 0.0  ;;  %v1242_v9 = vadd.f32 %v794_v1, %v346_v61  ;;  %v1843_v11 = vld [vmem:[%s6828_s2 + $0x120] sm:$0xff]  ;;  %v354_v27 = vld [vmem:[%s6826_s0 + $0xa98] sm:$0xff] }
  0x88   :  { %2479 = vmatpush1.bf16.msra.mxu1 %v2027_v54  ;;  %v1688_v8 = vmax.f32 %v1240_v59, 0.0  ;;  %v352_v12 = vld [vmem:[%s6826_s0 + $0xa88] sm:$0xff]  ;;  %v2035_v14 = vpack.c.bf16 %v1691_v0, %v1684_v63  ;;  %v4607_v16 = vpack.c.bf16 %v1844_v5, %v1840_v4  ;;  %v4609_v17 = vpack.c.bf16 %v1843_v11, %v1839_v10  ;;  %v359_v20 = vld [vmem:[%s6826_s0 + $0xac0] sm:$0xff]  ;;  %v361_v28 = vld [vmem:[%s6826_s0 + $0xad0] sm:$0xff] }
  0x89   :  { %v1683_v15 = vmax.f32 %v1235_v3, 0.0  ;;  %v800_v21 = vld [vmem:[%s6827_s1 + $0xa88] sm:$0xff]  ;;  %v807_v22 = vld [vmem:[%s6827_s1 + $0xac0] sm:$0xff]  ;;  %2254 = vmatprep.subr.bf16.mxu0 %v2033_v6  ;;  %v1690_v24 = vmax.f32 %v1242_v9, 0.0  ;;  %v802_v29 = vld [vmem:[%s6827_s1 + $0xa98] sm:$0xff] }
  0x8a   :  { %v2032_v23 = vpack.c.bf16 %v1688_v8, %v1681_v7  ;;  %v1248_v25 = vadd.f32 %v800_v21, %v352_v12  ;;  %v1255_v26 = vadd.f32 %v807_v22, %v359_v20  ;;  %2480 = vmatprep.subr.bf16.mxu1 %v2035_v14  ;;  %2199 = vmatprep.mubr.bf16.mxu0 %v4607_v16  ;;  %v809_v30 = vld [vmem:[%s6827_s1 + $0xad0] sm:$0xff]  ;;  %v351_v32 = vld [vmem:[%s6826_s0 + $0xa80] sm:$0xff]  ;;  %v358_v33 = vld [vmem:[%s6826_s0 + $0xab8] sm:$0xff] }
  0x8b   :  { %v1250_v31 = vadd.f32 %v802_v29, %v354_v27  ;;  %v2034_v34 = vpack.c.bf16 %v1690_v24, %v1683_v15  ;;  %2425 = vmatprep.mubr.bf16.mxu1 %v4607_v16  ;;  %v1257_v39 = vadd.f32 %v809_v30, %v361_v28  ;;  %v799_v40 = vld [vmem:[%s6827_s1 + $0xa80] sm:$0xff]  ;;  %v806_v41 = vld [vmem:[%s6827_s1 + $0xab8] sm:$0xff]  ;;  %v353_v42 = vld [vmem:[%s6826_s0 + $0xa90] sm:$0xff]  ;;  %2200 = vmatmul.mubr.bf16.gmra.mrb[16].mxu0 %v4609_v17 }
  0x8c   :  { %2255 = vmatpush1.bf16.msra.mxu0 %v2032_v23  ;;  %v1696_v35 = vmax.f32 %v1248_v25, 0.0  ;;  %v1703_v38 = vmax.f32 %v1255_v26, 0.0  ;;  %2426 = vmatmul.mubr.bf16.gmra.mrb[16].mxu1 %v4609_v17  ;;  %v1247_v44 = vadd.f32 %v799_v40, %v351_v32  ;;  %v1254_v45 = vadd.f32 %v806_v41, %v358_v33  ;;  %v360_v46 = vld [vmem:[%s6826_s0 + $0xac8] sm:$0xff]  ;;  %v801_v47 = vld [vmem:[%s6827_s1 + $0xa90] sm:$0xff]  ;;  %v366_v53 = vld [vmem:[%s6826_s0 + $0xaf8] sm:$0xff] }
  0x8d   :  { %v1698_v43 = vmax.f32 %v1250_v31, 0.0  ;;  %v808_v48 = vld [vmem:[%s6827_s1 + $0xac8] sm:$0xff]  ;;  %2481 = vmatpush1.bf16.msra.mxu1 %v2034_v34  ;;  %v1705_v50 = vmax.f32 %v1257_v39, 0.0  ;;  %v1249_v51 = vadd.f32 %v801_v47, %v353_v42  ;;  %v373_v54 = vld [vmem:[%s6826_s0 + $0xb30] sm:$0xff]  ;;  %v814_v55 = vld [vmem:[%s6827_s1 + $0xaf8] sm:$0xff] }
  0x8e   :  { %v2040_v49 = vpack.c.bf16 %v1703_v38, %v1696_v35  ;;  %v1256_v52 = vadd.f32 %v808_v48, %v360_v46  ;;  %v1695_v58 = vmax.f32 %v1247_v44, 0.0  ;;  %v1702_v59 = vmax.f32 %v1254_v45, 0.0  ;;  %v821_v60 = vld [vmem:[%s6827_s1 + $0xb30] sm:$0xff]  ;;  %v368_v62 = vld [vmem:[%s6826_s0 + $0xb08] sm:$0xff]  ;;  %v375_v63 = vld [vmem:[%s6826_s0 + $0xb40] sm:$0xff] }
  0x8f   :  { %v1262_v61 = vadd.f32 %v814_v55, %v366_v53  ;;  %v2042_v0 = vpack.c.bf16 %v1705_v50, %v1698_v43  ;;  %v1697_v1 = vmax.f32 %v1249_v51, 0.0  ;;  %v1269_v4 = vadd.f32 %v821_v60, %v373_v54  ;;  %v816_v5 = vld [vmem:[%s6827_s1 + $0xb08] sm:$0xff]  ;;  %v823_v6 = vld [vmem:[%s6827_s1 + $0xb40] sm:$0xff]  ;;  %v365_v7 = vld [vmem:[%s6826_s0 + $0xaf0] sm:$0xff] }
  0x90   :  { %2256 = vmatprep.subr.bf16.mxu0 %v2040_v49  ;;  %v1704_v3 = vmax.f32 %v1256_v52, 0.0  ;;  %v2039_v8 = vpack.c.bf16 %v1702_v59, %v1695_v58  ;;  %v1264_v10 = vadd.f32 %v816_v5, %v368_v62  ;;  %v1271_v11 = vadd.f32 %v823_v6, %v375_v63  ;;  %v372_v12 = vld [vmem:[%s6826_s0 + $0xb28] sm:$0xff]  ;;  %v813_v14 = vld [vmem:[%s6827_s1 + $0xaf0] sm:$0xff]  ;;  %v367_v24 = vld [vmem:[%s6826_s0 + $0xb00] sm:$0xff] }
  0x91   :  { %v1710_v9 = vmax.f32 %v1262_v61, 0.0  ;;  %v820_v15 = vld [vmem:[%s6827_s1 + $0xb28] sm:$0xff]  ;;  %2482 = vmatprep.subr.bf16.mxu1 %v2042_v0  ;;  %v1717_v21 = vmax.f32 %v1269_v4, 0.0  ;;  %v1261_v22 = vadd.f32 %v813_v14, %v365_v7  ;;  %v374_v25 = vld [vmem:[%s6826_s0 + $0xb38] sm:$0xff]  ;;  %v815_v26 = vld [vmem:[%s6827_s1 + $0xb00] sm:$0xff] }
  0x92   :  { %v2041_v20 = vpack.c.bf16 %v1704_v3, %v1697_v1  ;;  %v1268_v23 = vadd.f32 %v820_v15, %v372_v12  ;;  %2257 = vmatpush1.bf16.msra.mxu0 %v2039_v8  ;;  %v1712_v27 = vmax.f32 %v1264_v10, 0.0  ;;  %v1719_v28 = vmax.f32 %v1271_v11, 0.0  ;;  %v822_v29 = vld [vmem:[%s6827_s1 + $0xb38] sm:$0xff]  ;;  %v1848_v31 = vld [vmem:[%s6828_s2 + $0x148] sm:$0xff]  ;;  %v1847_v39 = vld [vmem:[%s6828_s2 + $0x140] sm:$0xff] }
  0x93   :  { %v1263_v30 = vadd.f32 %v815_v26, %v367_v24  ;;  %v1852_v32 = vld [vmem:[%s6828_s2 + $0x168] sm:$0xff]  ;;  %v2047_v33 = vpack.c.bf16 %v1717_v21, %v1710_v9  ;;  %v1709_v34 = vmax.f32 %v1261_v22, 0.0  ;;  %v1270_v38 = vadd.f32 %v822_v29, %v374_v25  ;;  %v1851_v40 = vld [vmem:[%s6828_s2 + $0x160] sm:$0xff]  ;;  %v382_v53 = vld [vmem:[%s6826_s0 + $0xb78] sm:$0xff] }
  0x94   :  { %2483 = vmatpush1.bf16.msra.mxu1 %v2041_v20  ;;  %v1716_v35 = vmax.f32 %v1268_v23, 0.0  ;;  %v380_v41 = vld [vmem:[%s6826_s0 + $0xb68] sm:$0xff]  ;;  %v2049_v42 = vpack.c.bf16 %v1719_v28, %v1712_v27  ;;  %v4723_v44 = vpack.c.bf16 %v1852_v32, %v1848_v31  ;;  %v4725_v45 = vpack.c.bf16 %v1851_v40, %v1847_v39  ;;  %v387_v46 = vld [vmem:[%s6826_s0 + $0xba0] sm:$0xff]  ;;  %v389_v54 = vld [vmem:[%s6826_s0 + $0xbb0] sm:$0xff] }
  0x95   :  { %v1711_v43 = vmax.f32 %v1263_v30, 0.0  ;;  %v828_v47 = vld [vmem:[%s6827_s1 + $0xb68] sm:$0xff]  ;;  %v835_v48 = vld [vmem:[%s6827_s1 + $0xba0] sm:$0xff]  ;;  %2258 = vmatprep.subr.bf16.mxu0 %v2047_v33  ;;  %v1718_v50 = vmax.f32 %v1270_v38, 0.0  ;;  %v830_v55 = vld [vmem:[%s6827_s1 + $0xb78] sm:$0xff] }
  0x96   :  { %v2046_v49 = vpack.c.bf16 %v1716_v35, %v1709_v34  ;;  %v1276_v51 = vadd.f32 %v828_v47, %v380_v41  ;;  %v1283_v52 = vadd.f32 %v835_v48, %v387_v46  ;;  %2484 = vmatprep.subr.bf16.mxu1 %v2049_v42  ;;  %2209 = vmatprep.mubr.bf16.mxu0 %v4723_v44  ;;  %v837_v58 = vld [vmem:[%s6827_s1 + $0xbb0] sm:$0xff]  ;;  %v379_v60 = vld [vmem:[%s6826_s0 + $0xb60] sm:$0xff]  ;;  %v386_v61 = vld [vmem:[%s6826_s0 + $0xb98] sm:$0xff] }
  0x97   :  { %v1278_v59 = vadd.f32 %v830_v55, %v382_v53  ;;  %v2048_v62 = vpack.c.bf16 %v1718_v50, %v1711_v43  ;;  %2435 = vmatprep.mubr.bf16.mxu1 %v4723_v44  ;;  %v1285_v1 = vadd.f32 %v837_v58, %v389_v54  ;;  %v827_v3 = vld [vmem:[%s6827_s1 + $0xb60] sm:$0xff]  ;;  %v834_v4 = vld [vmem:[%s6827_s1 + $0xb98] sm:$0xff]  ;;  %v381_v5 = vld [vmem:[%s6826_s0 + $0xb70] sm:$0xff]  ;;  %2210 = vmatmul.mubr.bf16.gmra.mrb[20].mxu0 %v4725_v45 }
  0x98   :  { %2259 = vmatpush1.bf16.msra.mxu0 %v2046_v49  ;;  %v1724_v63 = vmax.f32 %v1276_v51, 0.0  ;;  %v1731_v0 = vmax.f32 %v1283_v52, 0.0  ;;  %2436 = vmatmul.mubr.bf16.gmra.mrb[20].mxu1 %v4725_v45  ;;  %v1275_v7 = vadd.f32 %v827_v3, %v379_v60  ;;  %v1282_v8 = vadd.f32 %v834_v4, %v386_v61  ;;  %v388_v9 = vld [vmem:[%s6826_s0 + $0xba8] sm:$0xff]  ;;  %v829_v10 = vld [vmem:[%s6827_s1 + $0xb70] sm:$0xff]  ;;  %v394_v21 = vld [vmem:[%s6826_s0 + $0xbd8] sm:$0xff] }
  0x99   :  { %v1726_v6 = vmax.f32 %v1278_v59, 0.0  ;;  %v836_v11 = vld [vmem:[%s6827_s1 + $0xba8] sm:$0xff]  ;;  %2485 = vmatpush1.bf16.msra.mxu1 %v2048_v62  ;;  %v1733_v14 = vmax.f32 %v1285_v1, 0.0  ;;  %v1277_v15 = vadd.f32 %v829_v10, %v381_v5  ;;  %v401_v22 = vld [vmem:[%s6826_s0 + $0xc10] sm:$0xff]  ;;  %v842_v23 = vld [vmem:[%s6827_s1 + $0xbd8] sm:$0xff] }
  0x9a   :  { %v2054_v12 = vpack.c.bf16 %v1731_v0, %v1724_v63  ;;  %v1284_v20 = vadd.f32 %v836_v11, %v388_v9  ;;  %v1723_v24 = vmax.f32 %v1275_v7, 0.0  ;;  %v1730_v25 = vmax.f32 %v1282_v8, 0.0  ;;  %v849_v26 = vld [vmem:[%s6827_s1 + $0xc10] sm:$0xff]  ;;  %v396_v28 = vld [vmem:[%s6826_s0 + $0xbe8] sm:$0xff]  ;;  %v403_v29 = vld [vmem:[%s6826_s0 + $0xc20] sm:$0xff] }
  0x9b   :  { %v1290_v27 = vadd.f32 %v842_v23, %v394_v21  ;;  %v2056_v30 = vpack.c.bf16 %v1733_v14, %v1726_v6  ;;  %v1725_v31 = vmax.f32 %v1277_v15, 0.0  ;;  %v1297_v33 = vadd.f32 %v849_v26, %v401_v22  ;;  %v844_v34 = vld [vmem:[%s6827_s1 + $0xbe8] sm:$0xff]  ;;  %v851_v35 = vld [vmem:[%s6827_s1 + $0xc20] sm:$0xff]  ;;  %v393_v38 = vld [vmem:[%s6826_s0 + $0xbd0] sm:$0xff] }
  0x9c   :  { %2260 = vmatprep.subr.bf16.mxu0 %v2054_v12  ;;  %v1732_v32 = vmax.f32 %v1284_v20, 0.0  ;;  %v2053_v39 = vpack.c.bf16 %v1730_v25, %v1723_v24  ;;  %v1292_v41 = vadd.f32 %v844_v34, %v396_v28  ;;  %v1299_v42 = vadd.f32 %v851_v35, %v403_v29  ;;  %v400_v43 = vld [vmem:[%s6826_s0 + $0xc08] sm:$0xff]  ;;  %v841_v46 = vld [vmem:[%s6827_s1 + $0xbd0] sm:$0xff]  ;;  %v395_v52 = vld [vmem:[%s6826_s0 + $0xbe0] sm:$0xff] }
  0x9d   :  { %v1738_v40 = vmax.f32 %v1290_v27, 0.0  ;;  %v848_v47 = vld [vmem:[%s6827_s1 + $0xc08] sm:$0xff]  ;;  %2486 = vmatprep.subr.bf16.mxu1 %v2056_v30  ;;  %v1745_v49 = vmax.f32 %v1297_v33, 0.0  ;;  %v1289_v50 = vadd.f32 %v841_v46, %v393_v38  ;;  %v402_v53 = vld [vmem:[%s6826_s0 + $0xc18] sm:$0xff]  ;;  %v843_v54 = vld [vmem:[%s6827_s1 + $0xbe0] sm:$0xff] }
  0x9e   :  { %v2055_v48 = vpack.c.bf16 %v1732_v32, %v1725_v31  ;;  %v1296_v51 = vadd.f32 %v848_v47, %v400_v43  ;;  %2261 = vmatpush1.bf16.msra.mxu0 %v2053_v39  ;;  %v1740_v55 = vmax.f32 %v1292_v41, 0.0  ;;  %v1747_v58 = vmax.f32 %v1299_v42, 0.0  ;;  %v850_v59 = vld [vmem:[%s6827_s1 + $0xc18] sm:$0xff]  ;;  %v1856_v61 = vld [vmem:[%s6828_s2 + $0x188] sm:$0xff]  ;;  %v1855_v4 = vld [vmem:[%s6828_s2 + $0x180] sm:$0xff] }
  0x9f   :  { %v1291_v60 = vadd.f32 %v843_v54, %v395_v52  ;;  %v1860_v62 = vld [vmem:[%s6828_s2 + $0x1a8] sm:$0xff]  ;;  %v2061_v63 = vpack.c.bf16 %v1745_v49, %v1738_v40  ;;  %v1737_v0 = vmax.f32 %v1289_v50, 0.0  ;;  %v1298_v3 = vadd.f32 %v850_v59, %v402_v53  ;;  %v1859_v5 = vld [vmem:[%s6828_s2 + $0x1a0] sm:$0xff]  ;;  %v410_v23 = vld [vmem:[%s6826_s0 + $0xc58] sm:$0xff] }
  0xa0   :  { %2487 = vmatpush1.bf16.msra.mxu1 %v2055_v48  ;;  %v1744_v1 = vmax.f32 %v1296_v51, 0.0  ;;  %v408_v6 = vld [vmem:[%s6826_s0 + $0xc48] sm:$0xff]  ;;  %v2063_v7 = vpack.c.bf16 %v1747_v58, %v1740_v55  ;;  %v4839_v9 = vpack.c.bf16 %v1860_v62, %v1856_v61  ;;  %v4841_v10 = vpack.c.bf16 %v1859_v5, %v1855_v4  ;;  %v415_v11 = vld [vmem:[%s6826_s0 + $0xc80] sm:$0xff]  ;;  %v417_v24 = vld [vmem:[%s6826_s0 + $0xc90] sm:$0xff] }
  0xa1   :  { %v1739_v8 = vmax.f32 %v1291_v60, 0.0  ;;  %v856_v12 = vld [vmem:[%s6827_s1 + $0xc48] sm:$0xff]  ;;  %v863_v14 = vld [vmem:[%s6827_s1 + $0xc80] sm:$0xff]  ;;  %2262 = vmatprep.subr.bf16.mxu0 %v2061_v63  ;;  %v1746_v20 = vmax.f32 %v1298_v3, 0.0  ;;  %v858_v25 = vld [vmem:[%s6827_s1 + $0xc58] sm:$0xff] }
  0xa2   :  { %v2060_v15 = vpack.c.bf16 %v1744_v1, %v1737_v0  ;;  %v1304_v21 = vadd.f32 %v856_v12, %v408_v6  ;;  %v1311_v22 = vadd.f32 %v863_v14, %v415_v11  ;;  %2488 = vmatprep.subr.bf16.mxu1 %v2063_v7  ;;  %2219 = vmatprep.mubr.bf16.mxu0 %v4839_v9  ;;  %v865_v26 = vld [vmem:[%s6827_s1 + $0xc90] sm:$0xff]  ;;  %v407_v28 = vld [vmem:[%s6826_s0 + $0xc40] sm:$0xff]  ;;  %v414_v29 = vld [vmem:[%s6826_s0 + $0xc78] sm:$0xff] }
  0xa3   :  { %v1306_v27 = vadd.f32 %v858_v25, %v410_v23  ;;  %v2062_v30 = vpack.c.bf16 %v1746_v20, %v1739_v8  ;;  %2445 = vmatprep.mubr.bf16.mxu1 %v4839_v9  ;;  %v1313_v33 = vadd.f32 %v865_v26, %v417_v24  ;;  %v855_v34 = vld [vmem:[%s6827_s1 + $0xc40] sm:$0xff]  ;;  %v862_v35 = vld [vmem:[%s6827_s1 + $0xc78] sm:$0xff]  ;;  %v409_v38 = vld [vmem:[%s6826_s0 + $0xc50] sm:$0xff]  ;;  %2220 = vmatmul.mubr.bf16.gmra.mrb[24].mxu0 %v4841_v10 }
  0xa4   :  { %2263 = vmatpush1.bf16.msra.mxu0 %v2060_v15  ;;  %v1752_v31 = vmax.f32 %v1304_v21, 0.0  ;;  %v1759_v32 = vmax.f32 %v1311_v22, 0.0  ;;  %2446 = vmatmul.mubr.bf16.gmra.mrb[24].mxu1 %v4841_v10  ;;  %v1303_v40 = vadd.f32 %v855_v34, %v407_v28  ;;  %v1310_v41 = vadd.f32 %v862_v35, %v414_v29  ;;  %v416_v42 = vld [vmem:[%s6826_s0 + $0xc88] sm:$0xff]  ;;  %v857_v43 = vld [vmem:[%s6827_s1 + $0xc50] sm:$0xff]  ;;  %v422_v51 = vld [vmem:[%s6826_s0 + $0xcb8] sm:$0xff] }
  0xa5   :  { %v1754_v39 = vmax.f32 %v1306_v27, 0.0  ;;  %v864_v46 = vld [vmem:[%s6827_s1 + $0xc88] sm:$0xff]  ;;  %2489 = vmatpush1.bf16.msra.mxu1 %v2062_v30  ;;  %v1761_v48 = vmax.f32 %v1313_v33, 0.0  ;;  %v1305_v49 = vadd.f32 %v857_v43, %v409_v38  ;;  %v429_v52 = vld [vmem:[%s6826_s0 + $0xcf0] sm:$0xff]  ;;  %v870_v53 = vld [vmem:[%s6827_s1 + $0xcb8] sm:$0xff] }
  0xa6   :  { %v2068_v47 = vpack.c.bf16 %v1759_v32, %v1752_v31  ;;  %v1312_v50 = vadd.f32 %v864_v46, %v416_v42  ;;  %v1751_v54 = vmax.f32 %v1303_v40, 0.0  ;;  %v1758_v55 = vmax.f32 %v1310_v41, 0.0  ;;  %v877_v58 = vld [vmem:[%s6827_s1 + $0xcf0] sm:$0xff]  ;;  %v424_v60 = vld [vmem:[%s6826_s0 + $0xcc8] sm:$0xff]  ;;  %v431_v61 = vld [vmem:[%s6826_s0 + $0xd00] sm:$0xff] }
  0xa7   :  { %v1318_v59 = vadd.f32 %v870_v53, %v422_v51  ;;  %v2070_v62 = vpack.c.bf16 %v1761_v48, %v1754_v39  ;;  %v1753_v63 = vmax.f32 %v1305_v49, 0.0  ;;  %v1325_v1 = vadd.f32 %v877_v58, %v429_v52  ;;  %v872_v3 = vld [vmem:[%s6827_s1 + $0xcc8] sm:$0xff]  ;;  %v879_v4 = vld [vmem:[%s6827_s1 + $0xd00] sm:$0xff]  ;;  %v421_v5 = vld [vmem:[%s6826_s0 + $0xcb0] sm:$0xff] }
  0xa8   :  { %2264 = vmatprep.subr.bf16.mxu0 %v2068_v47  ;;  %v1760_v0 = vmax.f32 %v1312_v50, 0.0  ;;  %v2067_v6 = vpack.c.bf16 %v1758_v55, %v1751_v54  ;;  %v1320_v8 = vadd.f32 %v872_v3, %v424_v60  ;;  %v1327_v11 = vadd.f32 %v879_v4, %v431_v61  ;;  %v428_v12 = vld [vmem:[%s6826_s0 + $0xce8] sm:$0xff]  ;;  %v869_v14 = vld [vmem:[%s6827_s1 + $0xcb0] sm:$0xff]  ;;  %v423_v24 = vld [vmem:[%s6826_s0 + $0xcc0] sm:$0xff] }
  0xa9   :  { %v1766_v7 = vmax.f32 %v1318_v59, 0.0  ;;  %v876_v15 = vld [vmem:[%s6827_s1 + $0xce8] sm:$0xff]  ;;  %2490 = vmatprep.subr.bf16.mxu1 %v2070_v62  ;;  %v1773_v21 = vmax.f32 %v1325_v1, 0.0  ;;  %v1317_v22 = vadd.f32 %v869_v14, %v421_v5  ;;  %v430_v25 = vld [vmem:[%s6826_s0 + $0xcf8] sm:$0xff]  ;;  %v871_v26 = vld [vmem:[%s6827_s1 + $0xcc0] sm:$0xff] }
  0xaa   :  { %v2069_v20 = vpack.c.bf16 %v1760_v0, %v1753_v63  ;;  %v1324_v23 = vadd.f32 %v876_v15, %v428_v12  ;;  %2265 = vmatpush1.bf16.msra.mxu0 %v2067_v6  ;;  %v1768_v27 = vmax.f32 %v1320_v8, 0.0  ;;  %v1775_v28 = vmax.f32 %v1327_v11, 0.0  ;;  %v878_v29 = vld [vmem:[%s6827_s1 + $0xcf8] sm:$0xff]  ;;  %v1864_v31 = vld [vmem:[%s6828_s2 + $0x1c8] sm:$0xff]  ;;  %v1863_v39 = vld [vmem:[%s6828_s2 + $0x1c0] sm:$0xff] }
  0xab   :  { %v1319_v30 = vadd.f32 %v871_v26, %v423_v24  ;;  %v1868_v32 = vld [vmem:[%s6828_s2 + $0x1e8] sm:$0xff]  ;;  %v2075_v33 = vpack.c.bf16 %v1773_v21, %v1766_v7  ;;  %v1765_v34 = vmax.f32 %v1317_v22, 0.0  ;;  %v1326_v38 = vadd.f32 %v878_v29, %v430_v25  ;;  %v1867_v40 = vld [vmem:[%s6828_s2 + $0x1e0] sm:$0xff]  ;;  %v438_v55 = vld [vmem:[%s6826_s0 + $0xd38] sm:$0xff] }
  0xac   :  { %2491 = vmatpush1.bf16.msra.mxu1 %v2069_v20  ;;  %v1772_v35 = vmax.f32 %v1324_v23, 0.0  ;;  %v436_v41 = vld [vmem:[%s6826_s0 + $0xd28] sm:$0xff]  ;;  %v2077_v42 = vpack.c.bf16 %v1775_v28, %v1768_v27  ;;  %v4955_v46 = vpack.c.bf16 %v1868_v32, %v1864_v31  ;;  %v4957_v47 = vpack.c.bf16 %v1867_v40, %v1863_v39  ;;  %v443_v48 = vld [vmem:[%s6826_s0 + $0xd60] sm:$0xff]  ;;  %v445_v58 = vld [vmem:[%s6826_s0 + $0xd70] sm:$0xff] }
  0xad   :  { %v1767_v43 = vmax.f32 %v1319_v30, 0.0  ;;  %v884_v49 = vld [vmem:[%s6827_s1 + $0xd28] sm:$0xff]  ;;  %v891_v50 = vld [vmem:[%s6827_s1 + $0xd60] sm:$0xff]  ;;  %2266 = vmatprep.subr.bf16.mxu0 %v2075_v33  ;;  %v1774_v52 = vmax.f32 %v1326_v38, 0.0  ;;  %v886_v59 = vld [vmem:[%s6827_s1 + $0xd38] sm:$0xff] }
  0xae   :  { %v2074_v51 = vpack.c.bf16 %v1772_v35, %v1765_v34  ;;  %v1332_v53 = vadd.f32 %v884_v49, %v436_v41  ;;  %v1339_v54 = vadd.f32 %v891_v50, %v443_v48  ;;  %2492 = vmatprep.subr.bf16.mxu1 %v2077_v42  ;;  %2229 = vmatprep.mubr.bf16.mxu0 %v4955_v46  ;;  %v893_v60 = vld [vmem:[%s6827_s1 + $0xd70] sm:$0xff]  ;;  %v435_v62 = vld [vmem:[%s6826_s0 + $0xd20] sm:$0xff]  ;;  %v442_v63 = vld [vmem:[%s6826_s0 + $0xd58] sm:$0xff] }
  0xaf   :  { %v1334_v61 = vadd.f32 %v886_v59, %v438_v55  ;;  %v2076_v0 = vpack.c.bf16 %v1774_v52, %v1767_v43  ;;  %2455 = vmatprep.mubr.bf16.mxu1 %v4955_v46  ;;  %v1341_v4 = vadd.f32 %v893_v60, %v445_v58  ;;  %v883_v5 = vld [vmem:[%s6827_s1 + $0xd20] sm:$0xff]  ;;  %v890_v6 = vld [vmem:[%s6827_s1 + $0xd58] sm:$0xff]  ;;  %v437_v7 = vld [vmem:[%s6826_s0 + $0xd30] sm:$0xff]  ;;  %2230 = vmatmul.mubr.bf16.gmra.mrb[28].mxu0 %v4957_v47 }
  0xb0   :  { %2267 = vmatpush1.bf16.msra.mxu0 %v2074_v51  ;;  %v1780_v1 = vmax.f32 %v1332_v53, 0.0  ;;  %v1787_v3 = vmax.f32 %v1339_v54, 0.0  ;;  %2456 = vmatmul.mubr.bf16.gmra.mrb[28].mxu1 %v4957_v47  ;;  %v1331_v11 = vadd.f32 %v883_v5, %v435_v62  ;;  %v1338_v12 = vadd.f32 %v890_v6, %v442_v63  ;;  %v444_v14 = vld [vmem:[%s6826_s0 + $0xd68] sm:$0xff]  ;;  %v885_v15 = vld [vmem:[%s6827_s1 + $0xd30] sm:$0xff]  ;;  %v450_v25 = vld [vmem:[%s6826_s0 + $0xd98] sm:$0xff] }
  0xb1   :  { %v1782_v8 = vmax.f32 %v1334_v61, 0.0  ;;  %v892_v20 = vld [vmem:[%s6827_s1 + $0xd68] sm:$0xff]  ;;  %2493 = vmatpush1.bf16.msra.mxu1 %v2076_v0  ;;  %v1789_v22 = vmax.f32 %v1341_v4, 0.0  ;;  %v1333_v23 = vadd.f32 %v885_v15, %v437_v7  ;;  %v457_v26 = vld [vmem:[%s6826_s0 + $0xdd0] sm:$0xff]  ;;  %v898_v27 = vld [vmem:[%s6827_s1 + $0xd98] sm:$0xff] }
  0xb2   :  { %v2082_v21 = vpack.c.bf16 %v1787_v3, %v1780_v1  ;;  %v1340_v24 = vadd.f32 %v892_v20, %v444_v14  ;;  %v1779_v28 = vmax.f32 %v1331_v11, 0.0  ;;  %v1786_v29 = vmax.f32 %v1338_v12, 0.0  ;;  %v905_v30 = vld [vmem:[%s6827_s1 + $0xdd0] sm:$0xff]  ;;  %v452_v32 = vld [vmem:[%s6826_s0 + $0xda8] sm:$0xff]  ;;  %v459_v33 = vld [vmem:[%s6826_s0 + $0xde0] sm:$0xff] }
  0xb3   :  { %v1346_v31 = vadd.f32 %v898_v27, %v450_v25  ;;  %v2084_v34 = vpack.c.bf16 %v1789_v22, %v1782_v8  ;;  %v1781_v35 = vmax.f32 %v1333_v23, 0.0  ;;  %v1353_v39 = vadd.f32 %v905_v30, %v457_v26  ;;  %v900_v40 = vld [vmem:[%s6827_s1 + $0xda8] sm:$0xff]  ;;  %v907_v41 = vld [vmem:[%s6827_s1 + $0xde0] sm:$0xff]  ;;  %v449_v42 = vld [vmem:[%s6826_s0 + $0xd90] sm:$0xff] }
  0xb4   :  { %2268 = vmatprep.subr.bf16.mxu0 %v2082_v21  ;;  %v1788_v38 = vmax.f32 %v1340_v24, 0.0  ;;  %v2081_v43 = vpack.c.bf16 %v1786_v29, %v1779_v28  ;;  %v1348_v49 = vadd.f32 %v900_v40, %v452_v32  ;;  %v1355_v50 = vadd.f32 %v907_v41, %v459_v33  ;;  %v456_v51 = vld [vmem:[%s6826_s0 + $0xdc8] sm:$0xff]  ;;  %v897_v52 = vld [vmem:[%s6827_s1 + $0xd90] sm:$0xff]  ;;  %v451_v60 = vld [vmem:[%s6826_s0 + $0xda0] sm:$0xff] }
  0xb5   :  { %v1794_v48 = vmax.f32 %v1346_v31, 0.0  ;;  %v904_v53 = vld [vmem:[%s6827_s1 + $0xdc8] sm:$0xff]  ;;  %2494 = vmatprep.subr.bf16.mxu1 %v2084_v34  ;;  %v1801_v55 = vmax.f32 %v1353_v39, 0.0  ;;  %v1345_v58 = vadd.f32 %v897_v52, %v449_v42  ;;  %v458_v61 = vld [vmem:[%s6826_s0 + $0xdd8] sm:$0xff]  ;;  %v899_v62 = vld [vmem:[%s6827_s1 + $0xda0] sm:$0xff] }
  0xb6   :  { %v2083_v54 = vpack.c.bf16 %v1788_v38, %v1781_v35  ;;  %v1352_v59 = vadd.f32 %v904_v53, %v456_v51  ;;  %2269 = vmatpush1.bf16.msra.mxu0 %v2081_v43  ;;  %v1796_v63 = vmax.f32 %v1348_v49, 0.0  ;;  %v1803_v0 = vmax.f32 %v1355_v50, 0.0  ;;  %v906_v1 = vld [vmem:[%s6827_s1 + $0xdd8] sm:$0xff]  ;;  %v1809_v12 = vld [vmem:[%s6828_s2 + $0x10] sm:$0xff]  ;;  %v20_v15 = vld [vmem:[%s6826_s0 + $0x28] sm:$0xff] }
  0xb7   :  { %v1347_v3 = vadd.f32 %v899_v62, %v451_v60  ;;  %v1810_v4 = vld [vmem:[%s6828_s2 + $0x18] sm:$0xff]  ;;  %v2089_v6 = vpack.c.bf16 %v1801_v55, %v1794_v48  ;;  %v1793_v7 = vmax.f32 %v1345_v58, 0.0  ;;  %v1354_v11 = vadd.f32 %v906_v1, %v458_v61  ;;  %v1813_v14 = vld [vmem:[%s6828_s2 + $0x30] sm:$0xff]  ;;  %v27_v23 = vld [vmem:[%s6826_s0 + $0x60] sm:$0xff] }
  0xb8   :  { %v1814_v5 = vld [vmem:[%s6828_s2 + $0x38] sm:$0xff]  ;;  %2495 = vmatpush1.bf16.msra.mxu1 %v2083_v54  ;;  %v1800_v8 = vmax.f32 %v1352_v59, 0.0  ;;  %v2091_v20 = vpack.c.bf16 %v1803_v0, %v1796_v63  ;;  %v468_v24 = vld [vmem:[%s6827_s1 + $0x28] sm:$0xff]  ;;  %v475_v25 = vld [vmem:[%s6827_s1 + $0x60] sm:$0xff]  ;;  %v5092_v33 = vpack.c.bf16 %v1813_v14, %v1809_v12 }
  0xb9   :  { %v1795_v21 = vmax.f32 %v1347_v3, 0.0  ;;  %v5071_v22 = vpack.c.bf16 %v1814_v5, %v1810_v4  ;;  %2270 = vmatprep.subr.bf16.mxu0 %v2089_v6  ;;  %v1802_v27 = vmax.f32 %v1354_v11, 0.0  ;;  %v916_v28 = vadd.f32 %v468_v24, %v20_v15  ;;  %v133_v30 = vld [vmem:[%s6826_s0 + $0x3b0] sm:$0xff]  ;;  %v140_v31 = vld [vmem:[%s6826_s0 + $0x3e8] sm:$0xff]  ;;  %v19_v38 = vld [vmem:[%s6826_s0 + $0x20] sm:$0xff] }
  0xba   :  { %v2088_v26 = vpack.c.bf16 %v1800_v8, %v1793_v7  ;;  %v923_v29 = vadd.f32 %v475_v25, %v27_v23  ;;  %v581_v32 = vld [vmem:[%s6827_s1 + $0x3b0] sm:$0xff]  ;;  %2496 = vmatprep.subr.bf16.mxu1 %v2091_v20  ;;  %v588_v34 = vld [vmem:[%s6827_s1 + $0x3e8] sm:$0xff]  ;;  %v26_v39 = vld [vmem:[%s6826_s0 + $0x58] sm:$0xff] }
  0xbb   :  { %2272 = vmatprep.mubr.bf16.mxu0 %v5071_v22  ;;  %v1029_v35 = vadd.f32 %v581_v32, %v133_v30  ;;  %v2090_v40 = vpack.c.bf16 %v1802_v27, %v1795_v21  ;;  %2498 = vmatprep.mubr.bf16.mxu1 %v5071_v22  ;;  %v1364_v41 = vmax.f32 %v916_v28, 0.0  ;;  %v1036_v43 = vadd.f32 %v588_v34, %v140_v31  ;;  %v467_v48 = vld [vmem:[%s6827_s1 + $0x20] sm:$0xff]  ;;  %v474_v49 = vld [vmem:[%s6827_s1 + $0x58] sm:$0xff]  ;;  %v21_v50 = vld [vmem:[%s6826_s0 + $0x30] sm:$0xff] }
  0xbc   :  { %2271 = vmatpush1.bf16.msra.mxu0 %v2088_v26  ;;  %v1371_v42 = vmax.f32 %v923_v29, 0.0  ;;  %v915_v52 = vadd.f32 %v467_v48, %v19_v38  ;;  %v922_v53 = vadd.f32 %v474_v49, %v26_v39  ;;  %v28_v54 = vld [vmem:[%s6826_s0 + $0x68] sm:$0xff]  ;;  %v469_v55 = vld [vmem:[%s6827_s1 + $0x30] sm:$0xff]  ;;  %v34_v63 = vld [vmem:[%s6826_s0 + $0x98] sm:$0xff] }
  0xbd   :  { %v1477_v51 = vmax.f32 %v1029_v35, 0.0  ;;  %v476_v58 = vld [vmem:[%s6827_s1 + $0x68] sm:$0xff]  ;;  %2497 = vmatpush1.bf16.msra.mxu1 %v2090_v40  ;;  %v1484_v60 = vmax.f32 %v1036_v43, 0.0  ;;  %v917_v61 = vadd.f32 %v469_v55, %v21_v50  ;;  %v41_v0 = vld [vmem:[%s6826_s0 + $0xd0] sm:$0xff]  ;;  %v482_v1 = vld [vmem:[%s6827_s1 + $0x98] sm:$0xff] }
  0xbe   :  { %v1876_v59 = vpack.c.bf16 %v1371_v42, %v1364_v41  ;;  %v924_v62 = vadd.f32 %v476_v58, %v28_v54  ;;  %v1363_v3 = vmax.f32 %v915_v52, 0.0  ;;  %v1370_v4 = vmax.f32 %v922_v53, 0.0  ;;  %v489_v5 = vld [vmem:[%s6827_s1 + $0xd0] sm:$0xff]  ;;  %v40_v8 = vld [vmem:[%s6826_s0 + $0xc8] sm:$0xff]  ;;  %v1818_v23 = vld [vmem:[%s6828_s2 + $0x58] sm:$0xff] }
  0xbf   :  { %2273 = vmatmul.mubr.bf16.vlgmr.msra.gmra.mrb[0].mxu0 %v5092_v33  ;;  %v930_v6 = vadd.f32 %v482_v1, %v34_v63  ;;  %v33_v7 = vld [vmem:[%s6826_s0 + $0x90] sm:$0xff]  ;;  %v1933_v11 = vpack.c.bf16 %v1484_v60, %v1477_v51  ;;  %v1365_v12 = vmax.f32 %v917_v61, 0.0  ;;  %v937_v15 = vadd.f32 %v489_v5, %v41_v0  ;;  %v488_v21 = vld [vmem:[%s6827_s1 + $0xc8] sm:$0xff]  ;;  %v1822_v28 = vld [vmem:[%s6828_s2 + $0x78] sm:$0xff] }
  0xc0   :  { %2579 = vmatprep.subr.bf16.mxu0 %v1876_v59  ;;  %v1372_v14 = vmax.f32 %v924_v62, 0.0  ;;  %v481_v20 = vld [vmem:[%s6827_s1 + $0x90] sm:$0xff]  ;;  %2499 = vmatmul.mubr.bf16.vlgmr.msra.gmra.mrb[0].mxu1 %v5092_v33  ;;  %v1875_v24 = vpack.c.bf16 %v1370_v4, %v1363_v3  ;;  %v936_v27 = vadd.f32 %v488_v21, %v40_v8  ;;  %v5160_v34 = vpack.c.bf16 %v1822_v28, %v1818_v23  ;;  %v48_v35 = vld [vmem:[%s6826_s0 + $0x108] sm:$0xff]  ;;  %v55_v38 = vld [vmem:[%s6826_s0 + $0x140] sm:$0xff] }
  0xc1   :  { %v1378_v25 = vmax.f32 %v930_v6, 0.0  ;;  %v929_v26 = vadd.f32 %v481_v20, %v33_v7  ;;  %v1817_v29 = vld [vmem:[%s6828_s2 + $0x50] sm:$0xff]  ;;  %3116 = vmatprep.subr.bf16.mxu1 %v1933_v11  ;;  %v1385_v32 = vmax.f32 %v937_v15, 0.0  ;;  %v496_v39 = vld [vmem:[%s6827_s1 + $0x108] sm:$0xff]  ;;  %v503_v42 = vld [vmem:[%s6827_s1 + $0x140] sm:$0xff] }
  0xc2   :  { %v1821_v30 = vld [vmem:[%s6828_s2 + $0x70] sm:$0xff]  ;;  %v1877_v31 = vpack.c.bf16 %v1372_v14, %v1365_v12  ;;  %2580 = vmatpush1.bf16.msra.mxu0 %v1875_v24  ;;  %v1384_v41 = vmax.f32 %v936_v27, 0.0  ;;  %v944_v43 = vadd.f32 %v496_v39, %v48_v35  ;;  %v147_v48 = vld [vmem:[%s6826_s0 + $0x420] sm:$0xff]  ;;  %v154_v49 = vld [vmem:[%s6826_s0 + $0x458] sm:$0xff]  ;;  %2282 = vmatprep.mubr.bf16.mxu0 %v5160_v34  ;;  %v951_v52 = vadd.f32 %v503_v42, %v55_v38 }
  0xc3   :  { %v1377_v40 = vmax.f32 %v929_v26, 0.0  ;;  %v1883_v50 = vpack.c.bf16 %v1385_v32, %v1378_v25  ;;  %v5181_v51 = vpack.c.bf16 %v1821_v30, %v1817_v29  ;;  %v595_v53 = vld [vmem:[%s6827_s1 + $0x420] sm:$0xff]  ;;  %v602_v54 = vld [vmem:[%s6827_s1 + $0x458] sm:$0xff]  ;;  %2508 = vmatprep.mubr.bf16.mxu1 %v5160_v34  ;;  %v69_v20 = vld [vmem:[%s6826_s0 + $0x1b0] sm:$0xff] }
  0xc4   :  { %3117 = vmatpush3.bf16.msra.mxu1 %v1877_v31  ;;  %v47_v55 = vld [vmem:[%s6826_s0 + $0x100] sm:$0xff]  ;;  %v1392_v59 = vmax.f32 %v944_v43, 0.0  ;;  %v1043_v60 = vadd.f32 %v595_v53, %v147_v48  ;;  %v1050_v61 = vadd.f32 %v602_v54, %v154_v49  ;;  %v54_v62 = vld [vmem:[%s6826_s0 + $0x138] sm:$0xff]  ;;  %v1399_v1 = vmax.f32 %v951_v52, 0.0  ;;  %v517_v27 = vld [vmem:[%s6827_s1 + $0x1b0] sm:$0xff] }
  0xc5   :  { %v1882_v58 = vpack.c.bf16 %v1384_v41, %v1377_v40  ;;  %v495_v63 = vld [vmem:[%s6827_s1 + $0x100] sm:$0xff]  ;;  %v502_v0 = vld [vmem:[%s6827_s1 + $0x138] sm:$0xff]  ;;  %2581 = vmatprep.subr.bf16.mxu0 %v1883_v50  ;;  %v61_v28 = vld [vmem:[%s6826_s0 + $0x170] sm:$0xff]  ;;  %v965_v32 = vadd.f32 %v517_v27, %v69_v20 }
  0xc6   :  { %v943_v3 = vadd.f32 %v495_v63, %v47_v55  ;;  %v950_v4 = vadd.f32 %v502_v0, %v54_v62  ;;  %v35_v5 = vld [vmem:[%s6826_s0 + $0xa0] sm:$0xff]  ;;  %v42_v6 = vld [vmem:[%s6826_s0 + $0xd8] sm:$0xff]  ;;  %v1491_v8 = vmax.f32 %v1043_v60, 0.0  ;;  %v1498_v11 = vmax.f32 %v1050_v61, 0.0  ;;  %v68_v35 = vld [vmem:[%s6826_s0 + $0x1a8] sm:$0xff] }
  0xc7   :  { %v483_v7 = vld [vmem:[%s6827_s1 + $0xa0] sm:$0xff]  ;;  %2582 = vmatpush1.bf16.msra.mxu0 %v1882_v58  ;;  %v490_v12 = vld [vmem:[%s6827_s1 + $0xd8] sm:$0xff]  ;;  %v1890_v21 = vpack.c.bf16 %v1399_v1, %v1392_v59  ;;  %v509_v38 = vld [vmem:[%s6827_s1 + $0x170] sm:$0xff]  ;;  %v1413_v53 = vmax.f32 %v965_v32, 0.0 }
  0xc8   :  { %v931_v14 = vadd.f32 %v483_v7, %v35_v5  ;;  %v62_v15 = vld [vmem:[%s6826_s0 + $0x178] sm:$0xff]  ;;  %2283 = vmatmul.mubr.bf16.gmra.mrb[4].mxu0 %v5181_v51  ;;  %v1391_v23 = vmax.f32 %v943_v3, 0.0  ;;  %v1398_v24 = vmax.f32 %v950_v4, 0.0  ;;  %v938_v25 = vadd.f32 %v490_v12, %v42_v6  ;;  %2509 = vmatmul.mubr.bf16.gmra.mrb[4].mxu1 %v5181_v51  ;;  %v516_v39 = vld [vmem:[%s6827_s1 + $0x1a8] sm:$0xff]  ;;  %v1825_v50 = vld [vmem:[%s6828_s2 + $0x90] sm:$0xff] }
  0xc9   :  { %v510_v26 = vld [vmem:[%s6827_s1 + $0x178] sm:$0xff]  ;;  %v1940_v29 = vpack.c.bf16 %v1498_v11, %v1491_v8  ;;  %2583 = vmatprep.subr.bf16.mxu0 %v1890_v21  ;;  %v957_v42 = vadd.f32 %v509_v38, %v61_v28  ;;  %v964_v43 = vadd.f32 %v516_v39, %v68_v35  ;;  %v1829_v55 = vld [vmem:[%s6828_s2 + $0xb0] sm:$0xff]  ;;  %v76_v58 = vld [vmem:[%s6826_s0 + $0x1e8] sm:$0xff] }
  0xca   :  { %v1379_v30 = vmax.f32 %v931_v14, 0.0  ;;  %v958_v31 = vadd.f32 %v510_v26, %v62_v15  ;;  %v1889_v40 = vpack.c.bf16 %v1398_v24, %v1391_v23  ;;  %v1386_v41 = vmax.f32 %v938_v25, 0.0  ;;  %v1826_v48 = vld [vmem:[%s6828_s2 + $0x98] sm:$0xff]  ;;  %v83_v59 = vld [vmem:[%s6826_s0 + $0x220] sm:$0xff]  ;;  %v524_v0 = vld [vmem:[%s6827_s1 + $0x1e8] sm:$0xff] }
  0xcb   :  { %v1830_v49 = vld [vmem:[%s6828_s2 + $0xb8] sm:$0xff]  ;;  %3118 = vmatprep.subr.bf16.mxu1 %v1940_v29  ;;  %v1405_v61 = vmax.f32 %v957_v42, 0.0  ;;  %v1412_v62 = vmax.f32 %v964_v43, 0.0  ;;  %v5260_v63 = vpack.c.bf16 %v1829_v55, %v1825_v50  ;;  %v531_v1 = vld [vmem:[%s6827_s1 + $0x220] sm:$0xff]  ;;  %v161_v3 = vld [vmem:[%s6826_s0 + $0x490] sm:$0xff]  ;;  %v972_v5 = vadd.f32 %v524_v0, %v76_v58 }
  0xcc   :  { %v1406_v52 = vmax.f32 %v958_v31, 0.0  ;;  %v5249_v54 = vpack.c.bf16 %v1830_v49, %v1826_v48  ;;  %2584 = vmatpush1.bf16.msra.mxu0 %v1889_v40  ;;  %v1884_v60 = vpack.c.bf16 %v1386_v41, %v1379_v30  ;;  %v979_v6 = vadd.f32 %v531_v1, %v83_v59  ;;  %v168_v7 = vld [vmem:[%s6826_s0 + $0x4c8] sm:$0xff]  ;;  %v609_v8 = vld [vmem:[%s6827_s1 + $0x490] sm:$0xff]  ;;  %v75_v20 = vld [vmem:[%s6826_s0 + $0x1e0] sm:$0xff] }
  0xcd   :  { %v616_v11 = vld [vmem:[%s6827_s1 + $0x4c8] sm:$0xff]  ;;  %v1896_v12 = vpack.c.bf16 %v1412_v62, %v1405_v61  ;;  %v1057_v14 = vadd.f32 %v609_v8, %v161_v3  ;;  %v82_v21 = vld [vmem:[%s6826_s0 + $0x218] sm:$0xff]  ;;  %v523_v23 = vld [vmem:[%s6827_s1 + $0x1e0] sm:$0xff]  ;;  %v1420_v24 = vmax.f32 %v972_v5, 0.0 }
  0xce   :  { %v1897_v4 = vpack.c.bf16 %v1413_v53, %v1406_v52  ;;  %2292 = vmatprep.mubr.bf16.mxu0 %v5249_v54  ;;  %2518 = vmatprep.mubr.bf16.mxu1 %v5249_v54  ;;  %v1064_v15 = vadd.f32 %v616_v11, %v168_v7  ;;  %v1427_v25 = vmax.f32 %v979_v6, 0.0  ;;  %v530_v26 = vld [vmem:[%s6827_s1 + $0x218] sm:$0xff]  ;;  %v971_v27 = vadd.f32 %v523_v23, %v75_v20  ;;  %v49_v28 = vld [vmem:[%s6826_s0 + $0x110] sm:$0xff]  ;;  %v56_v29 = vld [vmem:[%s6826_s0 + $0x148] sm:$0xff] }
  0xcf   :  { %3119 = vmatpush3.bf16.msra.mxu1 %v1884_v60  ;;  %v1505_v30 = vmax.f32 %v1057_v14, 0.0  ;;  %v978_v32 = vadd.f32 %v530_v26, %v82_v21  ;;  %v497_v35 = vld [vmem:[%s6827_s1 + $0x110] sm:$0xff]  ;;  %v504_v38 = vld [vmem:[%s6827_s1 + $0x148] sm:$0xff]  ;;  %v90_v39 = vld [vmem:[%s6826_s0 + $0x258] sm:$0xff] }
  0xd0   :  { %2585 = vmatprep.subr.bf16.mxu0 %v1897_v4  ;;  %v1512_v31 = vmax.f32 %v1064_v15, 0.0  ;;  %2293 = vmatmul.mubr.bf16.gmra.mrb[8].mxu0 %v5260_v63  ;;  %v1904_v40 = vpack.c.bf16 %v1427_v25, %v1420_v24  ;;  %v1419_v41 = vmax.f32 %v971_v27, 0.0  ;;  %v945_v42 = vadd.f32 %v497_v35, %v49_v28  ;;  %v97_v48 = vld [vmem:[%s6826_s0 + $0x290] sm:$0xff]  ;;  %v538_v49 = vld [vmem:[%s6827_s1 + $0x258] sm:$0xff]  ;;  %v96_v60 = vld [vmem:[%s6826_s0 + $0x288] sm:$0xff] }
  0xd1   :  { %2586 = vmatpush1.bf16.msra.mxu0 %v1896_v12  ;;  %2519 = vmatmul.mubr.bf16.gmra.mrb[8].mxu1 %v5260_v63  ;;  %v952_v43 = vadd.f32 %v504_v38, %v56_v29  ;;  %v545_v50 = vld [vmem:[%s6827_s1 + $0x290] sm:$0xff]  ;;  %v1426_v53 = vmax.f32 %v978_v32, 0.0  ;;  %v986_v55 = vadd.f32 %v538_v49, %v90_v39  ;;  %v544_v1 = vld [vmem:[%s6827_s1 + $0x288] sm:$0xff]  ;;  %v1834_v4 = vld [vmem:[%s6828_s2 + $0xd8] sm:$0xff] }
  0xd2   :  { %v1947_v52 = vpack.c.bf16 %v1512_v31, %v1505_v30  ;;  %v993_v58 = vadd.f32 %v545_v50, %v97_v48  ;;  %v89_v59 = vld [vmem:[%s6826_s0 + $0x250] sm:$0xff]  ;;  %2587 = vmatprep.subr.bf16.mxu0 %v1904_v40  ;;  %v1393_v62 = vmax.f32 %v945_v42, 0.0  ;;  %v1838_v5 = vld [vmem:[%s6828_s2 + $0xf8] sm:$0xff]  ;;  %v992_v11 = vadd.f32 %v544_v1, %v96_v60  ;;  %v104_v15 = vld [vmem:[%s6826_s0 + $0x2c8] sm:$0xff] }
  0xd3   :  { %v537_v61 = vld [vmem:[%s6827_s1 + $0x250] sm:$0xff]  ;;  %v1400_v0 = vmax.f32 %v952_v43, 0.0  ;;  %v1903_v6 = vpack.c.bf16 %v1426_v53, %v1419_v41  ;;  %v1434_v7 = vmax.f32 %v986_v55, 0.0  ;;  %v5347_v23 = vpack.c.bf16 %v1838_v5, %v1834_v4  ;;  %v111_v25 = vld [vmem:[%s6826_s0 + $0x300] sm:$0xff]  ;;  %v552_v26 = vld [vmem:[%s6827_s1 + $0x2c8] sm:$0xff] }
  0xd4   :  { %v985_v3 = vadd.f32 %v537_v61, %v89_v59  ;;  %3120 = vmatprep.subr.bf16.mxu1 %v1947_v52  ;;  %v1441_v8 = vmax.f32 %v993_v58, 0.0  ;;  %v1833_v12 = vld [vmem:[%s6828_s2 + $0xd0] sm:$0xff]  ;;  %v559_v27 = vld [vmem:[%s6827_s1 + $0x300] sm:$0xff]  ;;  %v1440_v29 = vmax.f32 %v992_v11, 0.0  ;;  %v1000_v30 = vadd.f32 %v552_v26, %v104_v15  ;;  %v182_v35 = vld [vmem:[%s6826_s0 + $0x538] sm:$0xff] }
  0xd5   :  { %v1837_v14 = vld [vmem:[%s6828_s2 + $0xf0] sm:$0xff]  ;;  %v1891_v20 = vpack.c.bf16 %v1400_v0, %v1393_v62  ;;  %2588 = vmatpush1.bf16.msra.mxu0 %v1903_v6  ;;  %v1007_v31 = vadd.f32 %v559_v27, %v111_v25  ;;  %v175_v32 = vld [vmem:[%s6826_s0 + $0x500] sm:$0xff]  ;;  %2302 = vmatprep.mubr.bf16.mxu0 %v5347_v23  ;;  %v630_v39 = vld [vmem:[%s6827_s1 + $0x538] sm:$0xff] }
  0xd6   :  { %v1433_v21 = vmax.f32 %v985_v3, 0.0  ;;  %v5349_v24 = vpack.c.bf16 %v1837_v14, %v1833_v12  ;;  %v1911_v28 = vpack.c.bf16 %v1441_v8, %v1434_v7  ;;  %v623_v38 = vld [vmem:[%s6827_s1 + $0x500] sm:$0xff]  ;;  %v110_v42 = vld [vmem:[%s6826_s0 + $0x2f8] sm:$0xff]  ;;  %2528 = vmatprep.mubr.bf16.mxu1 %v5347_v23  ;;  %v1448_v48 = vmax.f32 %v1000_v30, 0.0  ;;  %v125_v7 = vld [vmem:[%s6826_s0 + $0x370] sm:$0xff] }
  0xd7   :  { %3121 = vmatpush3.bf16.msra.mxu1 %v1891_v20  ;;  %v1071_v40 = vadd.f32 %v623_v38, %v175_v32  ;;  %v103_v41 = vld [vmem:[%s6826_s0 + $0x2c0] sm:$0xff]  ;;  %v1455_v49 = vmax.f32 %v1007_v31, 0.0  ;;  %v1078_v50 = vadd.f32 %v630_v39, %v182_v35  ;;  %v558_v53 = vld [vmem:[%s6827_s1 + $0x2f8] sm:$0xff]  ;;  %v573_v14 = vld [vmem:[%s6827_s1 + $0x370] sm:$0xff] }
  0xd8   :  { %2589 = vmatprep.subr.bf16.mxu0 %v1911_v28  ;;  %v1910_v43 = vpack.c.bf16 %v1440_v29, %v1433_v21  ;;  %v551_v52 = vld [vmem:[%s6827_s1 + $0x2c0] sm:$0xff]  ;;  %2303 = vmatmul.mubr.bf16.gmra.mrb[12].mxu0 %v5349_v24  ;;  %v1006_v60 = vadd.f32 %v558_v53, %v110_v42  ;;  %v70_v61 = vld [vmem:[%s6826_s0 + $0x1b8] sm:$0xff]  ;;  %v117_v20 = vld [vmem:[%s6826_s0 + $0x330] sm:$0xff]  ;;  %v1021_v28 = vadd.f32 %v573_v14, %v125_v7 }
  0xd9   :  { %v63_v55 = vld [vmem:[%s6826_s0 + $0x180] sm:$0xff]  ;;  %2529 = vmatmul.mubr.bf16.gmra.mrb[12].mxu1 %v5349_v24  ;;  %v1519_v58 = vmax.f32 %v1071_v40, 0.0  ;;  %v999_v59 = vadd.f32 %v551_v52, %v103_v41  ;;  %v518_v0 = vld [vmem:[%s6827_s1 + $0x1b8] sm:$0xff]  ;;  %v1918_v1 = vpack.c.bf16 %v1455_v49, %v1448_v48  ;;  %v1526_v3 = vmax.f32 %v1078_v50, 0.0  ;;  %v124_v21 = vld [vmem:[%s6826_s0 + $0x368] sm:$0xff] }
  0xda   :  { %v511_v62 = vld [vmem:[%s6827_s1 + $0x180] sm:$0xff]  ;;  %2590 = vmatpush1.bf16.msra.mxu0 %v1910_v43  ;;  %v966_v5 = vadd.f32 %v518_v0, %v70_v61  ;;  %v118_v6 = vld [vmem:[%s6826_s0 + $0x338] sm:$0xff]  ;;  %v1454_v12 = vmax.f32 %v1006_v60, 0.0  ;;  %v565_v29 = vld [vmem:[%s6827_s1 + $0x330] sm:$0xff]  ;;  %v1469_v48 = vmax.f32 %v1021_v28, 0.0 }
  0xdb   :  { %v959_v4 = vadd.f32 %v511_v62, %v63_v55  ;;  %v566_v8 = vld [vmem:[%s6827_s1 + $0x338] sm:$0xff]  ;;  %v1447_v11 = vmax.f32 %v999_v59, 0.0  ;;  %2591 = vmatprep.subr.bf16.mxu0 %v1918_v1  ;;  %v1954_v25 = vpack.c.bf16 %v1526_v3, %v1519_v58  ;;  %v572_v30 = vld [vmem:[%s6827_s1 + $0x368] sm:$0xff]  ;;  %v1013_v38 = vadd.f32 %v565_v29, %v117_v20  ;;  %v1841_v41 = vld [vmem:[%s6828_s2 + $0x110] sm:$0xff] }
  0xdc   :  { %v1014_v15 = vadd.f32 %v566_v8, %v118_v6  ;;  %v1414_v27 = vmax.f32 %v966_v5, 0.0  ;;  %v1842_v31 = vld [vmem:[%s6828_s2 + $0x118] sm:$0xff]  ;;  %v1020_v39 = vadd.f32 %v572_v30, %v124_v21  ;;  %v1845_v42 = vld [vmem:[%s6828_s2 + $0x130] sm:$0xff]  ;;  %v132_v52 = vld [vmem:[%s6826_s0 + $0x3a8] sm:$0xff] }
  0xdd   :  { %v1407_v26 = vmax.f32 %v959_v4, 0.0  ;;  %v1917_v32 = vpack.c.bf16 %v1454_v12, %v1447_v11  ;;  %v1846_v40 = vld [vmem:[%s6828_s2 + $0x138] sm:$0xff]  ;;  %3122 = vmatprep.subr.bf16.mxu1 %v1954_v25  ;;  %v5438_v50 = vpack.c.bf16 %v1845_v42, %v1841_v41  ;;  %v139_v53 = vld [vmem:[%s6826_s0 + $0x3e0] sm:$0xff]  ;;  %v580_v55 = vld [vmem:[%s6827_s1 + $0x3a8] sm:$0xff]  ;;  %v1461_v58 = vmax.f32 %v1013_v38, 0.0 }
  0xde   :  { %v1462_v35 = vmax.f32 %v1014_v15, 0.0  ;;  %v5436_v49 = vpack.c.bf16 %v1846_v40, %v1842_v31  ;;  %v1468_v59 = vmax.f32 %v1020_v39, 0.0  ;;  %v587_v60 = vld [vmem:[%s6827_s1 + $0x3e0] sm:$0xff]  ;;  %v1028_v61 = vadd.f32 %v580_v55, %v132_v52  ;;  %v189_v62 = vld [vmem:[%s6826_s0 + $0x570] sm:$0xff]  ;;  %v196_v0 = vld [vmem:[%s6826_s0 + $0x5a8] sm:$0xff] }
  0xdf   :  { %v1898_v43 = vpack.c.bf16 %v1414_v27, %v1407_v26  ;;  %2592 = vmatpush1.bf16.msra.mxu0 %v1917_v32  ;;  %v1035_v3 = vadd.f32 %v587_v60, %v139_v53  ;;  %v637_v4 = vld [vmem:[%s6827_s1 + $0x570] sm:$0xff]  ;;  %v644_v5 = vld [vmem:[%s6827_s1 + $0x5a8] sm:$0xff]  ;;  %v131_v6 = vld [vmem:[%s6826_s0 + $0x3a0] sm:$0xff] }
  0xe0   :  { %v1925_v1 = vpack.c.bf16 %v1469_v48, %v1462_v35  ;;  %2312 = vmatprep.mubr.bf16.mxu0 %v5436_v49  ;;  %v1924_v7 = vpack.c.bf16 %v1468_v59, %v1461_v58  ;;  %2538 = vmatprep.mubr.bf16.mxu1 %v5436_v49  ;;  %v1476_v8 = vmax.f32 %v1028_v61, 0.0  ;;  %v1085_v11 = vadd.f32 %v637_v4, %v189_v62  ;;  %v138_v14 = vld [vmem:[%s6826_s0 + $0x3d8] sm:$0xff]  ;;  %v579_v15 = vld [vmem:[%s6827_s1 + $0x3a0] sm:$0xff]  ;;  %v77_v27 = vld [vmem:[%s6826_s0 + $0x1f0] sm:$0xff] }
  0xe1   :  { %3123 = vmatpush3.bf16.msra.mxu1 %v1898_v43  ;;  %2313 = vmatmul.mubr.bf16.gmra.mrb[16].mxu0 %v5438_v50  ;;  %v1092_v12 = vadd.f32 %v644_v5, %v196_v0  ;;  %v586_v20 = vld [vmem:[%s6827_s1 + $0x3d8] sm:$0xff]  ;;  %v1483_v21 = vmax.f32 %v1035_v3, 0.0  ;;  %v1027_v25 = vadd.f32 %v579_v15, %v131_v6  ;;  %v84_v28 = vld [vmem:[%s6826_s0 + $0x228] sm:$0xff]  ;;  %v525_v29 = vld [vmem:[%s6827_s1 + $0x1f0] sm:$0xff] }
  0xe2   :  { %2593 = vmatprep.subr.bf16.mxu0 %v1925_v1  ;;  %2539 = vmatmul.mubr.bf16.gmra.mrb[16].mxu1 %v5438_v50  ;;  %v1034_v26 = vadd.f32 %v586_v20, %v138_v14  ;;  %v1533_v30 = vmax.f32 %v1085_v11, 0.0  ;;  %v532_v32 = vld [vmem:[%s6827_s1 + $0x228] sm:$0xff]  ;;  %v973_v35 = vadd.f32 %v525_v29, %v77_v27  ;;  %v146_v38 = vld [vmem:[%s6826_s0 + $0x418] sm:$0xff]  ;;  %v153_v39 = vld [vmem:[%s6826_s0 + $0x450] sm:$0xff] }
  0xe3   :  { %2594 = vmatpush1.bf16.msra.mxu0 %v1924_v7  ;;  %v1540_v31 = vmax.f32 %v1092_v12, 0.0  ;;  %v1932_v40 = vpack.c.bf16 %v1483_v21, %v1476_v8  ;;  %v1475_v41 = vmax.f32 %v1027_v25, 0.0  ;;  %v980_v43 = vadd.f32 %v532_v32, %v84_v28  ;;  %v594_v48 = vld [vmem:[%s6827_s1 + $0x418] sm:$0xff]  ;;  %v601_v52 = vld [vmem:[%s6827_s1 + $0x450] sm:$0xff]  ;;  %v152_v61 = vld [vmem:[%s6826_s0 + $0x448] sm:$0xff] }
  0xe4   :  { %v1482_v42 = vmax.f32 %v1034_v26, 0.0  ;;  %v145_v53 = vld [vmem:[%s6826_s0 + $0x410] sm:$0xff]  ;;  %v1421_v58 = vmax.f32 %v973_v35, 0.0  ;;  %v1042_v59 = vadd.f32 %v594_v48, %v146_v38  ;;  %v1049_v60 = vadd.f32 %v601_v52, %v153_v39  ;;  %v600_v0 = vld [vmem:[%s6827_s1 + $0x448] sm:$0xff]  ;;  %v1850_v6 = vld [vmem:[%s6828_s2 + $0x158] sm:$0xff] }
  0xe5   :  { %v1961_v55 = vpack.c.bf16 %v1540_v31, %v1533_v30  ;;  %v593_v62 = vld [vmem:[%s6827_s1 + $0x410] sm:$0xff]  ;;  %2595 = vmatprep.subr.bf16.mxu0 %v1932_v40  ;;  %v1428_v3 = vmax.f32 %v980_v43, 0.0  ;;  %v1048_v5 = vadd.f32 %v600_v0, %v152_v61  ;;  %v1854_v7 = vld [vmem:[%s6828_s2 + $0x178] sm:$0xff]  ;;  %v160_v20 = vld [vmem:[%s6826_s0 + $0x488] sm:$0xff] }
  0xe6   :  { %v1931_v1 = vpack.c.bf16 %v1482_v42, %v1475_v41  ;;  %v1041_v4 = vadd.f32 %v593_v62, %v145_v53  ;;  %v1849_v8 = vld [vmem:[%s6828_s2 + $0x150] sm:$0xff]  ;;  %v1490_v11 = vmax.f32 %v1042_v59, 0.0  ;;  %v1497_v12 = vmax.f32 %v1049_v60, 0.0  ;;  %v167_v21 = vld [vmem:[%s6826_s0 + $0x4c0] sm:$0xff]  ;;  %v608_v29 = vld [vmem:[%s6827_s1 + $0x488] sm:$0xff] }
  0xe7   :  { %3124 = vmatprep.subr.bf16.mxu1 %v1961_v55  ;;  %v5525_v14 = vpack.c.bf16 %v1854_v7, %v1850_v6  ;;  %v1853_v15 = vld [vmem:[%s6828_s2 + $0x170] sm:$0xff]  ;;  %v1905_v25 = vpack.c.bf16 %v1428_v3, %v1421_v58  ;;  %v1496_v27 = vmax.f32 %v1048_v5, 0.0  ;;  %v615_v30 = vld [vmem:[%s6827_s1 + $0x4c0] sm:$0xff]  ;;  %v1056_v35 = vadd.f32 %v608_v29, %v160_v20  ;;  %v210_v39 = vld [vmem:[%s6826_s0 + $0x618] sm:$0xff] }
  0xe8   :  { %2596 = vmatpush1.bf16.msra.mxu0 %v1931_v1  ;;  %v1489_v26 = vmax.f32 %v1041_v4, 0.0  ;;  %v5536_v28 = vpack.c.bf16 %v1853_v15, %v1849_v8  ;;  %v203_v31 = vld [vmem:[%s6826_s0 + $0x5e0] sm:$0xff]  ;;  %v1939_v32 = vpack.c.bf16 %v1497_v12, %v1490_v11  ;;  %v1063_v38 = vadd.f32 %v615_v30, %v167_v21  ;;  %v658_v41 = vld [vmem:[%s6827_s1 + $0x618] sm:$0xff]  ;;  %v181_v20 = vld [vmem:[%s6826_s0 + $0x530] sm:$0xff] }
  0xe9   :  { %2322 = vmatprep.mubr.bf16.mxu0 %v5525_v14  ;;  %2548 = vmatprep.mubr.bf16.mxu1 %v5525_v14  ;;  %v651_v40 = vld [vmem:[%s6827_s1 + $0x5e0] sm:$0xff]  ;;  %v1106_v48 = vadd.f32 %v658_v41, %v210_v39  ;;  %v166_v53 = vld [vmem:[%s6826_s0 + $0x4b8] sm:$0xff]  ;;  %v1504_v58 = vmax.f32 %v1056_v35, 0.0  ;;  %v621_v35 = vld [vmem:[%s6827_s1 + $0x4f0] sm:$0xff] }
  0xea   :  { %3125 = vmatpush3.bf16.msra.mxu1 %v1905_v25  ;;  %v1938_v42 = vpack.c.bf16 %v1496_v27, %v1489_v26  ;;  %2323 = vmatmul.mubr.bf16.gmra.mrb[20].mxu0 %v5536_v28  ;;  %v1099_v43 = vadd.f32 %v651_v40, %v203_v31  ;;  %v159_v52 = vld [vmem:[%s6826_s0 + $0x480] sm:$0xff]  ;;  %v1511_v59 = vmax.f32 %v1063_v38, 0.0  ;;  %v614_v60 = vld [vmem:[%s6827_s1 + $0x4b8] sm:$0xff]  ;;  %v629_v25 = vld [vmem:[%s6827_s1 + $0x530] sm:$0xff] }
  0xeb   :  { %v607_v55 = vld [vmem:[%s6827_s1 + $0x480] sm:$0xff]  ;;  %2597 = vmatprep.subr.bf16.mxu0 %v1939_v32  ;;  %2549 = vmatmul.mubr.bf16.gmra.mrb[20].mxu1 %v5536_v28  ;;  %v98_v0 = vld [vmem:[%s6826_s0 + $0x298] sm:$0xff]  ;;  %v1554_v3 = vmax.f32 %v1106_v48, 0.0  ;;  %v1062_v4 = vadd.f32 %v614_v60, %v166_v53  ;;  %v1077_v30 = vadd.f32 %v629_v25, %v181_v20  ;;  %v173_v31 = vld [vmem:[%s6826_s0 + $0x4f0] sm:$0xff] }
  0xec   :  { %v1055_v61 = vadd.f32 %v607_v55, %v159_v52  ;;  %v91_v62 = vld [vmem:[%s6826_s0 + $0x260] sm:$0xff]  ;;  %2598 = vmatpush1.bf16.msra.mxu0 %v1938_v42  ;;  %v1547_v1 = vmax.f32 %v1099_v43, 0.0  ;;  %v546_v6 = vld [vmem:[%s6827_s1 + $0x298] sm:$0xff]  ;;  %v1946_v8 = vpack.c.bf16 %v1511_v59, %v1504_v58  ;;  %v180_v32 = vld [vmem:[%s6826_s0 + $0x528] sm:$0xff]  ;;  %v1069_v41 = vadd.f32 %v621_v35, %v173_v31 }
  0xed   :  { %v539_v5 = vld [vmem:[%s6827_s1 + $0x260] sm:$0xff]  ;;  %v174_v7 = vld [vmem:[%s6826_s0 + $0x4f8] sm:$0xff]  ;;  %v994_v15 = vadd.f32 %v546_v6, %v98_v0  ;;  %v1510_v27 = vmax.f32 %v1062_v4, 0.0  ;;  %v628_v40 = vld [vmem:[%s6827_s1 + $0x528] sm:$0xff]  ;;  %v1525_v53 = vmax.f32 %v1077_v30, 0.0 }
  0xee   :  { %v1503_v11 = vmax.f32 %v1055_v61, 0.0  ;;  %v987_v12 = vadd.f32 %v539_v5, %v91_v62  ;;  %v622_v21 = vld [vmem:[%s6827_s1 + $0x4f8] sm:$0xff]  ;;  %v1968_v26 = vpack.c.bf16 %v1554_v3, %v1547_v1  ;;  %2599 = vmatprep.subr.bf16.mxu0 %v1946_v8  ;;  %v1076_v55 = vadd.f32 %v628_v40, %v180_v32  ;;  %v1857_v58 = vld [vmem:[%s6828_s2 + $0x190] sm:$0xff]  ;;  %v188_v60 = vld [vmem:[%s6826_s0 + $0x568] sm:$0xff] }
  0xef   :  { %v1070_v29 = vadd.f32 %v622_v21, %v174_v7  ;;  %v1442_v39 = vmax.f32 %v994_v15, 0.0  ;;  %v1858_v42 = vld [vmem:[%s6828_s2 + $0x198] sm:$0xff]  ;;  %v1861_v59 = vld [vmem:[%s6828_s2 + $0x1b0] sm:$0xff]  ;;  %v1517_v62 = vmax.f32 %v1069_v41, 0.0  ;;  %v195_v3 = vld [vmem:[%s6826_s0 + $0x5a0] sm:$0xff] }
  0xf0   :  { %v1435_v38 = vmax.f32 %v987_v12, 0.0  ;;  %v1862_v43 = vld [vmem:[%s6828_s2 + $0x1b8] sm:$0xff]  ;;  %3126 = vmatprep.subr.bf16.mxu1 %v1968_v26  ;;  %v1945_v48 = vpack.c.bf16 %v1510_v27, %v1503_v11  ;;  %v5625_v1 = vpack.c.bf16 %v1861_v59, %v1857_v58  ;;  %v636_v4 = vld [vmem:[%s6827_s1 + $0x568] sm:$0xff]  ;;  %v643_v5 = vld [vmem:[%s6827_s1 + $0x5a0] sm:$0xff]  ;;  %v1524_v7 = vmax.f32 %v1076_v55, 0.0 }
  0xf1   :  { %v1518_v52 = vmax.f32 %v1070_v29, 0.0  ;;  %v5623_v0 = vpack.c.bf16 %v1862_v43, %v1858_v42  ;;  %v1084_v8 = vadd.f32 %v636_v4, %v188_v60  ;;  %v1091_v11 = vadd.f32 %v643_v5, %v195_v3  ;;  %v217_v12 = vld [vmem:[%s6826_s0 + $0x650] sm:$0xff]  ;;  %v224_v15 = vld [vmem:[%s6826_s0 + $0x688] sm:$0xff]  ;;  %v187_v26 = vld [vmem:[%s6826_s0 + $0x560] sm:$0xff] }
  0xf2   :  { %v1912_v61 = vpack.c.bf16 %v1442_v39, %v1435_v38  ;;  %2600 = vmatpush1.bf16.msra.mxu0 %v1945_v48  ;;  %v665_v20 = vld [vmem:[%s6827_s1 + $0x650] sm:$0xff]  ;;  %v672_v21 = vld [vmem:[%s6827_s1 + $0x688] sm:$0xff]  ;;  %v194_v27 = vld [vmem:[%s6826_s0 + $0x598] sm:$0xff]  ;;  %v1952_v29 = vpack.c.bf16 %v1524_v7, %v1517_v62 }
  0xf3   :  { %v1953_v6 = vpack.c.bf16 %v1525_v53, %v1518_v52  ;;  %2332 = vmatprep.mubr.bf16.mxu0 %v5623_v0  ;;  %v1113_v25 = vadd.f32 %v665_v20, %v217_v12  ;;  %2558 = vmatprep.mubr.bf16.mxu1 %v5623_v0  ;;  %v1532_v30 = vmax.f32 %v1084_v8, 0.0  ;;  %v1539_v31 = vmax.f32 %v1091_v11, 0.0  ;;  %v635_v35 = vld [vmem:[%s6827_s1 + $0x560] sm:$0xff]  ;;  %v642_v38 = vld [vmem:[%s6827_s1 + $0x598] sm:$0xff]  ;;  %v105_v39 = vld [vmem:[%s6826_s0 + $0x2d0] sm:$0xff] }
  0xf4   :  { %3127 = vmatpush3.bf16.msra.mxu1 %v1912_v61  ;;  %v1120_v32 = vadd.f32 %v672_v21, %v224_v15  ;;  %2333 = vmatmul.mubr.bf16.gmra.mrb[24].mxu0 %v5625_v1  ;;  %v1083_v41 = vadd.f32 %v635_v35, %v187_v26  ;;  %v1090_v42 = vadd.f32 %v642_v38, %v194_v27  ;;  %v112_v43 = vld [vmem:[%s6826_s0 + $0x308] sm:$0xff]  ;;  %v553_v48 = vld [vmem:[%s6827_s1 + $0x2d0] sm:$0xff]  ;;  %v202_v60 = vld [vmem:[%s6826_s0 + $0x5d8] sm:$0xff] }
  0xf5   :  { %2601 = vmatprep.subr.bf16.mxu0 %v1953_v6  ;;  %2559 = vmatmul.mubr.bf16.gmra.mrb[24].mxu1 %v5625_v1  ;;  %v1561_v40 = vmax.f32 %v1113_v25, 0.0  ;;  %v560_v52 = vld [vmem:[%s6827_s1 + $0x308] sm:$0xff]  ;;  %v1960_v53 = vpack.c.bf16 %v1539_v31, %v1532_v30  ;;  %v1001_v58 = vadd.f32 %v553_v48, %v105_v39  ;;  %v209_v61 = vld [vmem:[%s6826_s0 + $0x610] sm:$0xff]  ;;  %v650_v62 = vld [vmem:[%s6827_s1 + $0x5d8] sm:$0xff] }
  0xf6   :  { %2602 = vmatpush1.bf16.msra.mxu0 %v1952_v29  ;;  %v1568_v55 = vmax.f32 %v1120_v32, 0.0  ;;  %v1008_v59 = vadd.f32 %v560_v52, %v112_v43  ;;  %v1531_v3 = vmax.f32 %v1083_v41, 0.0  ;;  %v1538_v4 = vmax.f32 %v1090_v42, 0.0  ;;  %v657_v5 = vld [vmem:[%s6827_s1 + $0x610] sm:$0xff]  ;;  %v208_v8 = vld [vmem:[%s6826_s0 + $0x608] sm:$0xff]  ;;  %v1866_v26 = vld [vmem:[%s6828_s2 + $0x1d8] sm:$0xff] }
  0xf7   :  { %v1098_v6 = vadd.f32 %v650_v62, %v202_v60  ;;  %v201_v7 = vld [vmem:[%s6826_s0 + $0x5d0] sm:$0xff]  ;;  %2603 = vmatprep.subr.bf16.mxu0 %v1960_v53  ;;  %v1449_v12 = vmax.f32 %v1001_v58, 0.0  ;;  %v1105_v20 = vadd.f32 %v657_v5, %v209_v61  ;;  %v656_v25 = vld [vmem:[%s6827_s1 + $0x608] sm:$0xff]  ;;  %v1870_v32 = vld [vmem:[%s6828_s2 + $0x1f8] sm:$0xff] }
  0xf8   :  { %v1975_v11 = vpack.c.bf16 %v1568_v55, %v1561_v40  ;;  %v1456_v15 = vmax.f32 %v1008_v59, 0.0  ;;  %v649_v21 = vld [vmem:[%s6827_s1 + $0x5d0] sm:$0xff]  ;;  %v1959_v27 = vpack.c.bf16 %v1538_v4, %v1531_v3  ;;  %v1104_v31 = vadd.f32 %v656_v25, %v208_v8  ;;  %v216_v43 = vld [vmem:[%s6826_s0 + $0x648] sm:$0xff]  ;;  %v223_v48 = vld [vmem:[%s6826_s0 + $0x680] sm:$0xff] }
  0xf9   :  { %v1546_v29 = vmax.f32 %v1098_v6, 0.0  ;;  %v1097_v30 = vadd.f32 %v649_v21, %v201_v7  ;;  %v1865_v35 = vld [vmem:[%s6828_s2 + $0x1d0] sm:$0xff]  ;;  %v1553_v40 = vmax.f32 %v1105_v20, 0.0  ;;  %v5712_v41 = vpack.c.bf16 %v1870_v32, %v1866_v26  ;;  %v664_v52 = vld [vmem:[%s6827_s1 + $0x648] sm:$0xff]  ;;  %v671_v58 = vld [vmem:[%s6827_s1 + $0x680] sm:$0xff] }
  0xfa   :  { %v1869_v38 = vld [vmem:[%s6828_s2 + $0x1f0] sm:$0xff]  ;;  %3128 = vmatprep.subr.bf16.mxu1 %v1975_v11  ;;  %v1919_v39 = vpack.c.bf16 %v1456_v15, %v1449_v12  ;;  %2604 = vmatpush1.bf16.msra.mxu0 %v1959_v27  ;;  %v1552_v55 = vmax.f32 %v1104_v31, 0.0  ;;  %v1112_v59 = vadd.f32 %v664_v52, %v216_v43  ;;  %v231_v60 = vld [vmem:[%s6826_s0 + $0x6c0] sm:$0xff]  ;;  %v238_v61 = vld [vmem:[%s6826_s0 + $0x6f8] sm:$0xff]  ;;  %v1119_v3 = vadd.f32 %v671_v58, %v223_v48 }
  0xfb   :  { %v5714_v42 = vpack.c.bf16 %v1869_v38, %v1865_v35  ;;  %v1545_v53 = vmax.f32 %v1097_v30, 0.0  ;;  %v1967_v62 = vpack.c.bf16 %v1553_v40, %v1546_v29  ;;  %2342 = vmatprep.mubr.bf16.mxu0 %v5712_v41  ;;  %v679_v4 = vld [vmem:[%s6827_s1 + $0x6c0] sm:$0xff]  ;;  %v686_v5 = vld [vmem:[%s6827_s1 + $0x6f8] sm:$0xff]  ;;  %2568 = vmatprep.mubr.bf16.mxu1 %v5712_v41  ;;  %v237_v43 = vld [vmem:[%s6826_s0 + $0x6f0] sm:$0xff] }
  0xfc   :  { %3129 = vmatpush3.bf16.msra.mxu1 %v1919_v39  ;;  %v215_v6 = vld [vmem:[%s6826_s0 + $0x640] sm:$0xff]  ;;  %v1560_v8 = vmax.f32 %v1112_v59, 0.0  ;;  %v1127_v11 = vadd.f32 %v679_v4, %v231_v60  ;;  %v1134_v12 = vadd.f32 %v686_v5, %v238_v61  ;;  %v222_v15 = vld [vmem:[%s6826_s0 + $0x678] sm:$0xff]  ;;  %v1567_v25 = vmax.f32 %v1119_v3, 0.0  ;;  %v685_v59 = vld [vmem:[%s6827_s1 + $0x6f0] sm:$0xff] }
  0xfd   :  { %v1966_v7 = vpack.c.bf16 %v1552_v55, %v1545_v53  ;;  %2343 = vmatmul.mubr.bf16.gmra.mrb[28].mxu0 %v5714_v42  ;;  %v663_v20 = vld [vmem:[%s6827_s1 + $0x640] sm:$0xff]  ;;  %v670_v21 = vld [vmem:[%s6827_s1 + $0x678] sm:$0xff]  ;;  %2605 = vmatprep.subr.bf16.mxu0 %v1967_v62  ;;  %v229_v60 = vld [vmem:[%s6826_s0 + $0x6b0] sm:$0xff]  ;;  %v1133_v4 = vadd.f32 %v685_v59, %v237_v43 }
  0xfe   :  { %2569 = vmatmul.mubr.bf16.gmra.mrb[28].mxu1 %v5714_v42  ;;  %v1111_v26 = vadd.f32 %v663_v20, %v215_v6  ;;  %v1118_v27 = vadd.f32 %v670_v21, %v222_v15  ;;  %v119_v29 = vld [vmem:[%s6826_s0 + $0x340] sm:$0xff]  ;;  %v126_v30 = vld [vmem:[%s6826_s0 + $0x378] sm:$0xff]  ;;  %v1575_v32 = vmax.f32 %v1127_v11, 0.0  ;;  %v1582_v35 = vmax.f32 %v1134_v12, 0.0  ;;  %2611 = vmatprep.mubr.bf16.mxu0 %v4143_v2  ;;  %v236_v5 = vld [vmem:[%s6826_s0 + $0x6e8] sm:$0xff] }
  0xff   :  { %v567_v31 = vld [vmem:[%s6827_s1 + $0x340] sm:$0xff]  ;;  %2606 = vmatpush1.bf16.msra.mxu0 %v1966_v7  ;;  %v574_v38 = vld [vmem:[%s6827_s1 + $0x378] sm:$0xff]  ;;  %v1974_v48 = vpack.c.bf16 %v1567_v25, %v1560_v8  ;;  %2837 = vmatprep.mubr.bf16.mxu1 %v4143_v2  ;;  %v677_v6 = vld [vmem:[%s6827_s1 + $0x6b0] sm:$0xff] }
 0x100   :  { %v1015_v39 = vadd.f32 %v567_v31, %v119_v29  ;;  %v230_v40 = vld [vmem:[%s6826_s0 + $0x6b8] sm:$0xff]  ;;  %v1559_v52 = vmax.f32 %v1111_v26, 0.0  ;;  %v1566_v53 = vmax.f32 %v1118_v27, 0.0  ;;  %v1022_v55 = vadd.f32 %v574_v38, %v126_v30  ;;  %v684_v7 = vld [vmem:[%s6827_s1 + $0x6e8] sm:$0xff]  ;;  %v251_v20 = vld [vmem:[%s6826_s0 + $0x760] sm:$0xff] }
 0x101   :  { %v678_v58 = vld [vmem:[%s6827_s1 + $0x6b8] sm:$0xff]  ;;  %v1982_v61 = vpack.c.bf16 %v1582_v35, %v1575_v32  ;;  %2607 = vmatprep.subr.bf16.mxu0 %v1974_v48  ;;  %v1125_v2 = vadd.f32 %v677_v6, %v229_v60  ;;  %v1132_v12 = vadd.f32 %v684_v7, %v236_v5  ;;  %v244_v15 = vld [vmem:[%s6826_s0 + $0x728] sm:$0xff]  ;;  %v1581_v26 = vmax.f32 %v1133_v4, 0.0  ;;  %v699_v27 = vld [vmem:[%s6827_s1 + $0x760] sm:$0xff] }
 0x102   :  { %v1463_v62 = vmax.f32 %v1015_v39, 0.0  ;;  %v1126_v3 = vadd.f32 %v678_v58, %v230_v40  ;;  %v1973_v8 = vpack.c.bf16 %v1566_v53, %v1559_v52  ;;  %v1470_v11 = vmax.f32 %v1022_v55, 0.0  ;;  %v692_v21 = vld [vmem:[%s6827_s1 + $0x728] sm:$0xff]  ;;  %v357_v30 = vld [vmem:[%s6826_s0 + $0xab0] sm:$0xff]  ;;  %v243_v48 = vld [vmem:[%s6826_s0 + $0x720] sm:$0xff] }
 0x103   :  { %3130 = vmatprep.subr.bf16.mxu1 %v1982_v61  ;;  %v1140_v29 = vadd.f32 %v692_v21, %v244_v15  ;;  %v364_v31 = vld [vmem:[%s6826_s0 + $0xae8] sm:$0xff]  ;;  %v1573_v35 = vmax.f32 %v1125_v2, 0.0  ;;  %v1580_v38 = vmax.f32 %v1132_v12, 0.0  ;;  %v1147_v39 = vadd.f32 %v699_v27, %v251_v20  ;;  %v805_v40 = vld [vmem:[%s6827_s1 + $0xab0] sm:$0xff]  ;;  %v250_v59 = vld [vmem:[%s6826_s0 + $0x758] sm:$0xff] }
 0x104   :  { %v1574_v25 = vmax.f32 %v1126_v3, 0.0  ;;  %2608 = vmatpush1.bf16.msra.mxu0 %v1973_v8  ;;  %v1926_v32 = vpack.c.bf16 %v1470_v11, %v1463_v62  ;;  %v812_v43 = vld [vmem:[%s6827_s1 + $0xae8] sm:$0xff]  ;;  %v1253_v55 = vadd.f32 %v805_v40, %v357_v30  ;;  %v691_v60 = vld [vmem:[%s6827_s1 + $0x720] sm:$0xff]  ;;  %v698_v61 = vld [vmem:[%s6827_s1 + $0x758] sm:$0xff] }
 0x105   :  { %v1588_v53 = vmax.f32 %v1140_v29, 0.0  ;;  %v1260_v58 = vadd.f32 %v812_v43, %v364_v31  ;;  %v1980_v62 = vpack.c.bf16 %v1580_v38, %v1573_v35  ;;  %v1595_v3 = vmax.f32 %v1147_v39, 0.0  ;;  %v245_v6 = vld [vmem:[%s6826_s0 + $0x730] sm:$0xff]  ;;  %v252_v7 = vld [vmem:[%s6826_s0 + $0x768] sm:$0xff]  ;;  %v258_v20 = vld [vmem:[%s6826_s0 + $0x798] sm:$0xff] }
 0x106   :  { %v1981_v52 = vpack.c.bf16 %v1581_v26, %v1574_v25  ;;  %3131 = vmatpush3.bf16.msra.mxu1 %v1926_v32  ;;  %v1139_v4 = vadd.f32 %v691_v60, %v243_v48  ;;  %v1146_v5 = vadd.f32 %v698_v61, %v250_v59  ;;  %v693_v8 = vld [vmem:[%s6827_s1 + $0x730] sm:$0xff]  ;;  %v1701_v11 = vmax.f32 %v1253_v55, 0.0  ;;  %v700_v12 = vld [vmem:[%s6827_s1 + $0x768] sm:$0xff]  ;;  %v706_v30 = vld [vmem:[%s6827_s1 + $0x798] sm:$0xff] }
 0x107   :  { %v1708_v2 = vmax.f32 %v1260_v58, 0.0  ;;  %v1141_v15 = vadd.f32 %v693_v8, %v245_v6  ;;  %v265_v21 = vld [vmem:[%s6826_s0 + $0x7d0] sm:$0xff]  ;;  %v1988_v25 = vpack.c.bf16 %v1595_v3, %v1588_v53  ;;  %v1148_v29 = vadd.f32 %v700_v12, %v252_v7  ;;  %v264_v43 = vld [vmem:[%s6826_s0 + $0x7c8] sm:$0xff]  ;;  %v279_v61 = vld [vmem:[%s6826_s0 + $0x840] sm:$0xff] }
 0x108   :  { %2609 = vmatprep.subr.bf16.mxu0 %v1981_v52  ;;  %v1587_v26 = vmax.f32 %v1139_v4, 0.0  ;;  %v1594_v27 = vmax.f32 %v1146_v5, 0.0  ;;  %v713_v31 = vld [vmem:[%s6827_s1 + $0x7d0] sm:$0xff]  ;;  %v1154_v39 = vadd.f32 %v706_v30, %v258_v20  ;;  %v712_v52 = vld [vmem:[%s6827_s1 + $0x7c8] sm:$0xff]  ;;  %v727_v5 = vld [vmem:[%s6827_s1 + $0x840] sm:$0xff] }
 0x109   :  { %2610 = vmatpush1.bf16.msra.mxu0 %v1980_v62  ;;  %v257_v32 = vld [vmem:[%s6826_s0 + $0x790] sm:$0xff]  ;;  %2838 = vmatmul.mubr.bf16.vlgmr.msra.gmra.mrb[32].mxu1 %v4164_v13  ;;  %v2045_v35 = vpack.c.bf16 %v1708_v2, %v1701_v11  ;;  %v1589_v38 = vmax.f32 %v1141_v15, 0.0  ;;  %v1161_v40 = vadd.f32 %v713_v31, %v265_v21  ;;  %v1596_v55 = vmax.f32 %v1148_v29, 0.0  ;;  %v272_v60 = vld [vmem:[%s6826_s0 + $0x808] sm:$0xff]  ;;  %v371_v7 = vld [vmem:[%s6826_s0 + $0xb20] sm:$0xff] }
 0x10a   :  { %v705_v48 = vld [vmem:[%s6827_s1 + $0x790] sm:$0xff]  ;;  %2692 = vmatprep.subr.bf16.mxu0 %v1988_v25  ;;  %v1987_v53 = vpack.c.bf16 %v1594_v27, %v1587_v26  ;;  %v1160_v59 = vadd.f32 %v712_v52, %v264_v43  ;;  %2845 = vmatprep.mubr.bf16.mxu1 %v4259_v18  ;;  %v720_v62 = vld [vmem:[%s6827_s1 + $0x808] sm:$0xff]  ;;  %v1602_v3 = vmax.f32 %v1154_v39, 0.0  ;;  %v378_v8 = vld [vmem:[%s6826_s0 + $0xb58] sm:$0xff]  ;;  %v1175_v12 = vadd.f32 %v727_v5, %v279_v61 }
 0x10b   :  { %v1153_v58 = vadd.f32 %v705_v48, %v257_v32  ;;  %3180 = vmatprep.subr.bf16.mxu1 %v2045_v35  ;;  %v1609_v4 = vmax.f32 %v1161_v40, 0.0  ;;  %v1168_v6 = vadd.f32 %v720_v62, %v272_v60  ;;  %v1989_v11 = vpack.c.bf16 %v1596_v55, %v1589_v38  ;;  %v819_v15 = vld [vmem:[%s6827_s1 + $0xb20] sm:$0xff]  ;;  %v826_v20 = vld [vmem:[%s6827_s1 + $0xb58] sm:$0xff]  ;;  %v293_v60 = vld [vmem:[%s6826_s0 + $0x8b0] sm:$0xff] }
 0x10c   :  { %2612 = vmatmul.mubr.bf16.vlgmr.msra.gmra.mrb[32].mxu0 %v4164_v13  ;;  %v1608_v13 = vmax.f32 %v1160_v59, 0.0  ;;  %v271_v21 = vld [vmem:[%s6826_s0 + $0x800] sm:$0xff]  ;;  %v1267_v27 = vadd.f32 %v819_v15, %v371_v7  ;;  %v1274_v29 = vadd.f32 %v826_v20, %v378_v8  ;;  %v726_v31 = vld [vmem:[%s6827_s1 + $0x838] sm:$0xff]  ;;  %v1623_v35 = vmax.f32 %v1175_v12, 0.0  ;;  %v285_v7 = vld [vmem:[%s6826_s0 + $0x870] sm:$0xff] }
 0x10d   :  { %2693 = vmatpush1.bf16.msra.mxu0 %v1987_v53  ;;  %v1601_v2 = vmax.f32 %v1153_v58, 0.0  ;;  %2621 = vmatprep.mubr.bf16.mxu0 %v4259_v18  ;;  %v1995_v25 = vpack.c.bf16 %v1609_v4, %v1602_v3  ;;  %v1616_v26 = vmax.f32 %v1168_v6, 0.0  ;;  %v278_v18 = vld [vmem:[%s6826_s0 + $0x838] sm:$0xff]  ;;  %v719_v30 = vld [vmem:[%s6827_s1 + $0x800] sm:$0xff]  ;;  %v741_v6 = vld [vmem:[%s6827_s1 + $0x8b0] sm:$0xff] }
 0x10e   :  { %3181 = vmatpush3.bf16.msra.mxu1 %v1989_v11  ;;  %v1167_v38 = vadd.f32 %v719_v30, %v271_v21  ;;  %v1174_v39 = vadd.f32 %v726_v31, %v278_v18  ;;  %v259_v40 = vld [vmem:[%s6826_s0 + $0x7a0] sm:$0xff]  ;;  %v266_v43 = vld [vmem:[%s6826_s0 + $0x7d8] sm:$0xff]  ;;  %v1715_v52 = vmax.f32 %v1267_v27, 0.0  ;;  %v1722_v53 = vmax.f32 %v1274_v29, 0.0  ;;  %v292_v12 = vld [vmem:[%s6826_s0 + $0x8a8] sm:$0xff] }
 0x10f   :  { %v1994_v32 = vpack.c.bf16 %v1608_v13, %v1601_v2  ;;  %v707_v48 = vld [vmem:[%s6827_s1 + $0x7a0] sm:$0xff]  ;;  %2694 = vmatprep.subr.bf16.mxu0 %v1995_v25  ;;  %v714_v55 = vld [vmem:[%s6827_s1 + $0x7d8] sm:$0xff]  ;;  %v2002_v61 = vpack.c.bf16 %v1623_v35, %v1616_v26  ;;  %v1189_v13 = vadd.f32 %v741_v6, %v293_v60  ;;  %v733_v15 = vld [vmem:[%s6827_s1 + $0x870] sm:$0xff] }
 0x110   :  { %v1155_v58 = vadd.f32 %v707_v48, %v259_v40  ;;  %v286_v59 = vld [vmem:[%s6826_s0 + $0x878] sm:$0xff]  ;;  %v1615_v62 = vmax.f32 %v1167_v38, 0.0  ;;  %v1622_v3 = vmax.f32 %v1174_v39, 0.0  ;;  %v1162_v4 = vadd.f32 %v714_v55, %v266_v43  ;;  %v740_v20 = vld [vmem:[%s6827_s1 + $0x8a8] sm:$0xff]  ;;  %v307_v18 = vld [vmem:[%s6826_s0 + $0x920] sm:$0xff] }
 0x111   :  { %2695 = vmatpush1.bf16.msra.mxu0 %v1994_v32  ;;  %v734_v5 = vld [vmem:[%s6827_s1 + $0x878] sm:$0xff]  ;;  %2846 = vmatmul.mubr.bf16.gmra.mrb[36].mxu1 %v4261_v19  ;;  %v2052_v8 = vpack.c.bf16 %v1722_v53, %v1715_v52  ;;  %v1181_v26 = vadd.f32 %v733_v15, %v285_v7  ;;  %v1188_v27 = vadd.f32 %v740_v20, %v292_v12  ;;  %v300_v29 = vld [vmem:[%s6826_s0 + $0x8e8] sm:$0xff]  ;;  %v1637_v32 = vmax.f32 %v1189_v13, 0.0  ;;  %v755_v35 = vld [vmem:[%s6827_s1 + $0x920] sm:$0xff] }
 0x112   :  { %v1603_v11 = vmax.f32 %v1155_v58, 0.0  ;;  %v1182_v2 = vadd.f32 %v734_v5, %v286_v59  ;;  %2696 = vmatprep.subr.bf16.mxu0 %v2002_v61  ;;  %v2001_v21 = vpack.c.bf16 %v1622_v3, %v1615_v62  ;;  %v1610_v25 = vmax.f32 %v1162_v4, 0.0  ;;  %2853 = vmatprep.mubr.bf16.mxu1 %v4375_v36  ;;  %v748_v30 = vld [vmem:[%s6827_s1 + $0x8e8] sm:$0xff]  ;;  %v385_v39 = vld [vmem:[%s6826_s0 + $0xb90] sm:$0xff]  ;;  %v299_v58 = vld [vmem:[%s6826_s0 + $0x8e0] sm:$0xff] }
 0x113   :  { %3182 = vmatprep.subr.bf16.mxu1 %v2052_v8  ;;  %v1196_v38 = vadd.f32 %v748_v30, %v300_v29  ;;  %v392_v40 = vld [vmem:[%s6826_s0 + $0xbc8] sm:$0xff]  ;;  %v1629_v48 = vmax.f32 %v1181_v26, 0.0  ;;  %v1203_v52 = vadd.f32 %v755_v35, %v307_v18  ;;  %v833_v53 = vld [vmem:[%s6827_s1 + $0xb90] sm:$0xff]  ;;  %v747_v3 = vld [vmem:[%s6827_s1 + $0x8e0] sm:$0xff] }
 0x114   :  { %2622 = vmatmul.mubr.bf16.gmra.mrb[36].mxu0 %v4261_v19  ;;  %v1630_v31 = vmax.f32 %v1182_v2, 0.0  ;;  %v1996_v43 = vpack.c.bf16 %v1610_v25, %v1603_v11  ;;  %v1636_v19 = vmax.f32 %v1188_v27, 0.0  ;;  %v840_v55 = vld [vmem:[%s6827_s1 + $0xbc8] sm:$0xff]  ;;  %v1281_v61 = vadd.f32 %v833_v53, %v385_v39  ;;  %v754_v4 = vld [vmem:[%s6827_s1 + $0x918] sm:$0xff]  ;;  %v273_v11 = vld [vmem:[%s6826_s0 + $0x810] sm:$0xff] }
 0x115   :  { %2697 = vmatpush1.bf16.msra.mxu0 %v2001_v21  ;;  %2631 = vmatprep.mubr.bf16.mxu0 %v4375_v36  ;;  %v1644_v60 = vmax.f32 %v1196_v38, 0.0  ;;  %v1288_v62 = vadd.f32 %v840_v55, %v392_v40  ;;  %v306_v36 = vld [vmem:[%s6826_s0 + $0x918] sm:$0xff]  ;;  %v1651_v6 = vmax.f32 %v1203_v52, 0.0  ;;  %v1195_v7 = vadd.f32 %v747_v3, %v299_v58  ;;  %v280_v2 = vld [vmem:[%s6826_s0 + $0x848] sm:$0xff]  ;;  %v721_v13 = vld [vmem:[%s6827_s1 + $0x810] sm:$0xff] }
 0x116   :  { %v2009_v59 = vpack.c.bf16 %v1637_v32, %v1630_v31  ;;  %3183 = vmatpush3.bf16.msra.mxu1 %v1996_v43  ;;  %v2008_v5 = vpack.c.bf16 %v1636_v19, %v1629_v48  ;;  %v1202_v8 = vadd.f32 %v754_v4, %v306_v36  ;;  %v1729_v12 = vmax.f32 %v1281_v61, 0.0  ;;  %v728_v20 = vld [vmem:[%s6827_s1 + $0x848] sm:$0xff]  ;;  %v314_v25 = vld [vmem:[%s6826_s0 + $0x958] sm:$0xff]  ;;  %v321_v26 = vld [vmem:[%s6826_s0 + $0x990] sm:$0xff] }
 0x117   :  { %v1736_v15 = vmax.f32 %v1288_v62, 0.0  ;;  %v1169_v21 = vadd.f32 %v721_v13, %v273_v11  ;;  %v2016_v27 = vpack.c.bf16 %v1651_v6, %v1644_v60  ;;  %v1643_v29 = vmax.f32 %v1195_v7, 0.0  ;;  %v762_v31 = vld [vmem:[%s6827_s1 + $0x958] sm:$0xff]  ;;  %v769_v32 = vld [vmem:[%s6827_s1 + $0x990] sm:$0xff]  ;;  %v320_v48 = vld [vmem:[%s6826_s0 + $0x988] sm:$0xff] }
 0x118   :  { %2698 = vmatprep.subr.bf16.mxu0 %v2009_v59  ;;  %v1650_v18 = vmax.f32 %v1202_v8, 0.0  ;;  %v1176_v30 = vadd.f32 %v728_v20, %v280_v2  ;;  %v313_v35 = vld [vmem:[%s6826_s0 + $0x950] sm:$0xff]  ;;  %v1210_v40 = vadd.f32 %v762_v31, %v314_v25  ;;  %v1217_v43 = vadd.f32 %v769_v32, %v321_v26  ;;  %v768_v52 = vld [vmem:[%s6827_s1 + $0x988] sm:$0xff]  ;;  %v335_v61 = vld [vmem:[%s6826_s0 + $0xa00] sm:$0xff] }
 0x119   :  { %2699 = vmatpush1.bf16.msra.mxu0 %v2008_v5  ;;  %2854 = vmatmul.mubr.bf16.gmra.mrb[40].mxu1 %v4377_v37  ;;  %v2059_v38 = vpack.c.bf16 %v1736_v15, %v1729_v12  ;;  %v1617_v39 = vmax.f32 %v1169_v21, 0.0  ;;  %v761_v19 = vld [vmem:[%s6827_s1 + $0x950] sm:$0xff]  ;;  %v1216_v59 = vadd.f32 %v768_v52, %v320_v48  ;;  %v328_v60 = vld [vmem:[%s6826_s0 + $0x9c8] sm:$0xff]  ;;  %v783_v4 = vld [vmem:[%s6827_s1 + $0xa00] sm:$0xff] }
 0x11a   :  { %2700 = vmatprep.subr.bf16.mxu0 %v2016_v27  ;;  %v2015_v53 = vpack.c.bf16 %v1650_v18, %v1643_v29  ;;  %v1624_v55 = vmax.f32 %v1176_v30, 0.0  ;;  %v1209_v58 = vadd.f32 %v761_v19, %v313_v35  ;;  %2861 = vmatprep.mubr.bf16.mxu1 %v4491_v56  ;;  %v776_v62 = vld [vmem:[%s6827_s1 + $0x9c8] sm:$0xff]  ;;  %v1658_v36 = vmax.f32 %v1210_v40, 0.0  ;;  %v399_v6 = vld [vmem:[%s6826_s0 + $0xc00] sm:$0xff]  ;;  %v406_v7 = vld [vmem:[%s6826_s0 + $0xc38] sm:$0xff] }
 0x11b   :  { %3184 = vmatprep.subr.bf16.mxu1 %v2059_v38  ;;  %v1665_v3 = vmax.f32 %v1217_v43, 0.0  ;;  %v1224_v5 = vadd.f32 %v776_v62, %v328_v60  ;;  %v1231_v2 = vadd.f32 %v783_v4, %v335_v61  ;;  %v847_v13 = vld [vmem:[%s6827_s1 + $0xc00] sm:$0xff]  ;;  %v854_v12 = vld [vmem:[%s6827_s1 + $0xc38] sm:$0xff]  ;;  %v797_v62 = vld [vmem:[%s6827_s1 + $0xa70] sm:$0xff] }
 0x11c   :  { %2632 = vmatmul.mubr.bf16.gmra.mrb[40].mxu0 %v4377_v37  ;;  %v2003_v8 = vpack.c.bf16 %v1624_v55, %v1617_v39  ;;  %v1657_v11 = vmax.f32 %v1209_v58, 0.0  ;;  %v1664_v37 = vmax.f32 %v1216_v59, 0.0  ;;  %v327_v15 = vld [vmem:[%s6826_s0 + $0x9c0] sm:$0xff]  ;;  %v1295_v25 = vadd.f32 %v847_v13, %v399_v6  ;;  %v782_v29 = vld [vmem:[%s6827_s1 + $0x9f8] sm:$0xff] }
 0x11d   :  { %2701 = vmatpush1.bf16.msra.mxu0 %v2015_v53  ;;  %2641 = vmatprep.mubr.bf16.mxu0 %v4491_v56  ;;  %v2023_v20 = vpack.c.bf16 %v1665_v3, %v1658_v36  ;;  %v1672_v21 = vmax.f32 %v1224_v5, 0.0  ;;  %v1302_v26 = vadd.f32 %v854_v12, %v406_v7  ;;  %v334_v56 = vld [vmem:[%s6826_s0 + $0x9f8] sm:$0xff]  ;;  %v775_v27 = vld [vmem:[%s6827_s1 + $0x9c0] sm:$0xff]  ;;  %v1679_v30 = vmax.f32 %v1231_v2, 0.0  ;;  %v349_v53 = vld [vmem:[%s6826_s0 + $0xa70] sm:$0xff] }
 0x11e   :  { %3185 = vmatpush3.bf16.msra.mxu1 %v2003_v8  ;;  %v2022_v18 = vpack.c.bf16 %v1664_v37, %v1657_v11  ;;  %v1223_v31 = vadd.f32 %v775_v27, %v327_v15  ;;  %v1230_v32 = vadd.f32 %v782_v29, %v334_v56  ;;  %v287_v35 = vld [vmem:[%s6826_s0 + $0x880] sm:$0xff]  ;;  %v294_v38 = vld [vmem:[%s6826_s0 + $0x8b8] sm:$0xff]  ;;  %v1743_v40 = vmax.f32 %v1295_v25, 0.0  ;;  %v341_v36 = vld [vmem:[%s6826_s0 + $0xa30] sm:$0xff] }
 0x11f   :  { %v735_v39 = vld [vmem:[%s6827_s1 + $0x880] sm:$0xff]  ;;  %2702 = vmatprep.subr.bf16.mxu0 %v2023_v20  ;;  %v1750_v43 = vmax.f32 %v1302_v26, 0.0  ;;  %v742_v48 = vld [vmem:[%s6827_s1 + $0x8b8] sm:$0xff]  ;;  %v2030_v55 = vpack.c.bf16 %v1679_v30, %v1672_v21  ;;  %v1245_v6 = vadd.f32 %v797_v62, %v349_v53  ;;  %v348_v7 = vld [vmem:[%s6826_s0 + $0xa68] sm:$0xff] }
 0x120   :  { %v1183_v19 = vadd.f32 %v735_v39, %v287_v35  ;;  %v342_v52 = vld [vmem:[%s6826_s0 + $0xa38] sm:$0xff]  ;;  %v1671_v58 = vmax.f32 %v1223_v31, 0.0  ;;  %v1678_v59 = vmax.f32 %v1230_v32, 0.0  ;;  %v1190_v60 = vadd.f32 %v742_v48, %v294_v38  ;;  %v789_v8 = vld [vmem:[%s6827_s1 + $0xa30] sm:$0xff]  ;;  %v796_v11 = vld [vmem:[%s6827_s1 + $0xa68] sm:$0xff] }
 0x121   :  { %2703 = vmatpush1.bf16.msra.mxu0 %v2022_v18  ;;  %v790_v61 = vld [vmem:[%s6827_s1 + $0xa38] sm:$0xff]  ;;  %2862 = vmatmul.mubr.bf16.gmra.mrb[44].mxu1 %v4493_v57  ;;  %v2066_v3 = vpack.c.bf16 %v1750_v43, %v1743_v40  ;;  %v1237_v13 = vadd.f32 %v789_v8, %v341_v36  ;;  %v1244_v12 = vadd.f32 %v796_v11, %v348_v7  ;;  %v356_v15 = vld [vmem:[%s6826_s0 + $0xaa8] sm:$0xff]  ;;  %v363_v20 = vld [vmem:[%s6826_s0 + $0xae0] sm:$0xff]  ;;  %v1693_v26 = vmax.f32 %v1245_v6, 0.0 }
 0x122   :  { %v1631_v4 = vmax.f32 %v1183_v19, 0.0  ;;  %v1238_v5 = vadd.f32 %v790_v61, %v342_v52  ;;  %2704 = vmatprep.subr.bf16.mxu0 %v2030_v55  ;;  %v2029_v37 = vpack.c.bf16 %v1678_v59, %v1671_v58  ;;  %v1638_v2 = vmax.f32 %v1190_v60, 0.0  ;;  %2869 = vmatprep.mubr.bf16.mxu1 %v4607_v16  ;;  %v804_v21 = vld [vmem:[%s6827_s1 + $0xaa8] sm:$0xff]  ;;  %v811_v56 = vld [vmem:[%s6827_s1 + $0xae0] sm:$0xff]  ;;  %v413_v29 = vld [vmem:[%s6826_s0 + $0xc70] sm:$0xff] }
 0x123   :  { %3186 = vmatprep.subr.bf16.mxu1 %v2066_v3  ;;  %v1252_v27 = vadd.f32 %v804_v21, %v356_v15  ;;  %v420_v18 = vld [vmem:[%s6826_s0 + $0xca8] sm:$0xff]  ;;  %v1685_v31 = vmax.f32 %v1237_v13, 0.0  ;;  %v1259_v32 = vadd.f32 %v811_v56, %v363_v20  ;;  %v861_v35 = vld [vmem:[%s6827_s1 + $0xc70] sm:$0xff]  ;;  %v355_v39 = vld [vmem:[%s6826_s0 + $0xaa0] sm:$0xff] }
 0x124   :  { %2642 = vmatmul.mubr.bf16.gmra.mrb[44].mxu0 %v4493_v57  ;;  %v1686_v25 = vmax.f32 %v1238_v5, 0.0  ;;  %v2010_v30 = vpack.c.bf16 %v1638_v2, %v1631_v4  ;;  %v1692_v57 = vmax.f32 %v1244_v12, 0.0  ;;  %v868_v38 = vld [vmem:[%s6827_s1 + $0xca8] sm:$0xff]  ;;  %v1309_v48 = vadd.f32 %v861_v35, %v413_v29  ;;  %v803_v52 = vld [vmem:[%s6827_s1 + $0xaa0] sm:$0xff]  ;;  %v810_v53 = vld [vmem:[%s6827_s1 + $0xad8] sm:$0xff] }
 0x125   :  { %2705 = vmatpush1.bf16.msra.mxu0 %v2029_v37  ;;  %2651 = vmatprep.mubr.bf16.mxu0 %v4607_v16  ;;  %v1700_v43 = vmax.f32 %v1252_v27, 0.0  ;;  %v1316_v19 = vadd.f32 %v868_v38, %v420_v18  ;;  %v362_v16 = vld [vmem:[%s6826_s0 + $0xad8] sm:$0xff]  ;;  %v1707_v58 = vmax.f32 %v1259_v32, 0.0  ;;  %v1251_v59 = vadd.f32 %v803_v52, %v355_v39  ;;  %v301_v61 = vld [vmem:[%s6826_s0 + $0x8f0] sm:$0xff]  ;;  %v308_v62 = vld [vmem:[%s6826_s0 + $0x928] sm:$0xff] }
 0x126   :  { %v2037_v40 = vpack.c.bf16 %v1693_v26, %v1686_v25  ;;  %3187 = vmatpush3.bf16.msra.mxu1 %v2010_v30  ;;  %v2036_v55 = vpack.c.bf16 %v1692_v57, %v1685_v31  ;;  %v1258_v60 = vadd.f32 %v810_v53, %v362_v16  ;;  %v749_v36 = vld [vmem:[%s6827_s1 + $0x8f0] sm:$0xff]  ;;  %v1757_v3 = vmax.f32 %v1309_v48, 0.0  ;;  %v756_v5 = vld [vmem:[%s6827_s1 + $0x928] sm:$0xff]  ;;  %v370_v7 = vld [vmem:[%s6826_s0 + $0xb18] sm:$0xff] }
 0x127   :  { %v1764_v4 = vmax.f32 %v1316_v19, 0.0  ;;  %v1197_v6 = vadd.f32 %v749_v36, %v301_v61  ;;  %v377_v8 = vld [vmem:[%s6826_s0 + $0xb50] sm:$0xff]  ;;  %v2044_v11 = vpack.c.bf16 %v1707_v58, %v1700_v43  ;;  %v1699_v37 = vmax.f32 %v1251_v59, 0.0  ;;  %v818_v12 = vld [vmem:[%s6827_s1 + $0xb18] sm:$0xff]  ;;  %v376_v27 = vld [vmem:[%s6826_s0 + $0xb48] sm:$0xff] }
 0x128   :  { %2706 = vmatprep.subr.bf16.mxu0 %v2037_v40  ;;  %v1706_v2 = vmax.f32 %v1258_v60, 0.0  ;;  %v1204_v13 = vadd.f32 %v756_v5, %v308_v62  ;;  %v825_v15 = vld [vmem:[%s6827_s1 + $0xb50] sm:$0xff]  ;;  %v1266_v26 = vadd.f32 %v818_v12, %v370_v7  ;;  %v824_v18 = vld [vmem:[%s6827_s1 + $0xb48] sm:$0xff]  ;;  %v391_v38 = vld [vmem:[%s6826_s0 + $0xbc0] sm:$0xff] }
 0x129   :  { %2707 = vmatpush1.bf16.msra.mxu0 %v2036_v55  ;;  %v369_v20 = vld [vmem:[%s6826_s0 + $0xb10] sm:$0xff]  ;;  %2870 = vmatmul.mubr.bf16.gmra.mrb[48].mxu1 %v4609_v17  ;;  %v2073_v21 = vpack.c.bf16 %v1764_v4, %v1757_v3  ;;  %v1645_v25 = vmax.f32 %v1197_v6, 0.0  ;;  %v1273_v56 = vadd.f32 %v825_v15, %v377_v8  ;;  %v1272_v32 = vadd.f32 %v824_v18, %v376_v27  ;;  %v384_v35 = vld [vmem:[%s6826_s0 + $0xb88] sm:$0xff]  ;;  %v839_v48 = vld [vmem:[%s6827_s1 + $0xbc0] sm:$0xff] }
 0x12a   :  { %v817_v29 = vld [vmem:[%s6827_s1 + $0xb10] sm:$0xff]  ;;  %2708 = vmatprep.subr.bf16.mxu0 %v2044_v11  ;;  %v2043_v30 = vpack.c.bf16 %v1706_v2, %v1699_v37  ;;  %v1652_v31 = vmax.f32 %v1204_v13, 0.0  ;;  %2877 = vmatprep.mubr.bf16.mxu1 %v4723_v44  ;;  %v832_v39 = vld [vmem:[%s6827_s1 + $0xb88] sm:$0xff]  ;;  %v1714_v40 = vmax.f32 %v1266_v26, 0.0  ;;  %v427_v16 = vld [vmem:[%s6826_s0 + $0xce0] sm:$0xff]  ;;  %v1287_v58 = vadd.f32 %v839_v48, %v391_v38 }
 0x12b   :  { %v1265_v57 = vadd.f32 %v817_v29, %v369_v20  ;;  %3188 = vmatprep.subr.bf16.mxu1 %v2073_v21  ;;  %v1721_v43 = vmax.f32 %v1273_v56, 0.0  ;;  %v1280_v19 = vadd.f32 %v832_v39, %v384_v35  ;;  %v434_v52 = vld [vmem:[%s6826_s0 + $0xd18] sm:$0xff]  ;;  %v875_v59 = vld [vmem:[%s6827_s1 + $0xce0] sm:$0xff]  ;;  %v405_v56 = vld [vmem:[%s6826_s0 + $0xc30] sm:$0xff] }
 0x12c   :  { %2652 = vmatmul.mubr.bf16.gmra.mrb[48].mxu0 %v4609_v17  ;;  %v2017_v53 = vpack.c.bf16 %v1652_v31, %v1645_v25  ;;  %v1720_v17 = vmax.f32 %v1272_v32, 0.0  ;;  %v882_v60 = vld [vmem:[%s6827_s1 + $0xd18] sm:$0xff]  ;;  %v383_v61 = vld [vmem:[%s6826_s0 + $0xb80] sm:$0xff]  ;;  %v1323_v3 = vadd.f32 %v875_v59, %v427_v16  ;;  %v1735_v8 = vmax.f32 %v1287_v58, 0.0  ;;  %v397_v32 = vld [vmem:[%s6826_s0 + $0xbf0] sm:$0xff] }
 0x12d   :  { %2709 = vmatpush1.bf16.msra.mxu0 %v2043_v30  ;;  %v1713_v55 = vmax.f32 %v1265_v57, 0.0  ;;  %2661 = vmatprep.mubr.bf16.mxu0 %v4723_v44  ;;  %v2051_v62 = vpack.c.bf16 %v1721_v43, %v1714_v40  ;;  %v1728_v36 = vmax.f32 %v1280_v19, 0.0  ;;  %v1330_v4 = vadd.f32 %v882_v60, %v434_v52  ;;  %v390_v44 = vld [vmem:[%s6826_s0 + $0xbb8] sm:$0xff]  ;;  %v831_v5 = vld [vmem:[%s6827_s1 + $0xb80] sm:$0xff]  ;;  %v853_v57 = vld [vmem:[%s6827_s1 + $0xc30] sm:$0xff] }
 0x12e   :  { %v838_v6 = vld [vmem:[%s6827_s1 + $0xbb8] sm:$0xff]  ;;  %3189 = vmatpush3.bf16.msra.mxu1 %v2017_v53  ;;  %v1279_v11 = vadd.f32 %v831_v5, %v383_v61  ;;  %v315_v2 = vld [vmem:[%s6826_s0 + $0x960] sm:$0xff]  ;;  %v1771_v15 = vmax.f32 %v1323_v3, 0.0  ;;  %v1301_v40 = vadd.f32 %v853_v57, %v405_v56  ;;  %v404_v43 = vld [vmem:[%s6826_s0 + $0xc28] sm:$0xff] }
 0x12f   :  { %v2050_v7 = vpack.c.bf16 %v1720_v17, %v1713_v55  ;;  %v1286_v37 = vadd.f32 %v838_v6, %v390_v44  ;;  %v322_v13 = vld [vmem:[%s6826_s0 + $0x998] sm:$0xff]  ;;  %v763_v12 = vld [vmem:[%s6827_s1 + $0x960] sm:$0xff]  ;;  %2710 = vmatprep.subr.bf16.mxu0 %v2051_v62  ;;  %v1778_v20 = vmax.f32 %v1330_v4, 0.0  ;;  %v2058_v27 = vpack.c.bf16 %v1735_v8, %v1728_v36  ;;  %v845_v48 = vld [vmem:[%s6827_s1 + $0xbf0] sm:$0xff] }
 0x130   :  { %v770_v21 = vld [vmem:[%s6827_s1 + $0x998] sm:$0xff]  ;;  %v1211_v25 = vadd.f32 %v763_v12, %v315_v2  ;;  %v1727_v29 = vmax.f32 %v1279_v11, 0.0  ;;  %v852_v19 = vld [vmem:[%s6827_s1 + $0xc28] sm:$0xff]  ;;  %v1293_v53 = vadd.f32 %v845_v48, %v397_v32  ;;  %v419_v58 = vld [vmem:[%s6826_s0 + $0xca0] sm:$0xff]  ;;  %v1749_v61 = vmax.f32 %v1301_v40, 0.0 }
 0x131   :  { %v398_v26 = vld [vmem:[%s6826_s0 + $0xbf8] sm:$0xff]  ;;  %2711 = vmatpush1.bf16.msra.mxu0 %v2050_v7  ;;  %v1734_v18 = vmax.f32 %v1286_v37, 0.0  ;;  %v1218_v30 = vadd.f32 %v770_v21, %v322_v13  ;;  %2878 = vmatmul.mubr.bf16.gmra.mrb[52].mxu1 %v4725_v45  ;;  %v2080_v35 = vpack.c.bf16 %v1778_v20, %v1771_v15  ;;  %v1300_v55 = vadd.f32 %v852_v19, %v404_v43  ;;  %v412_v17 = vld [vmem:[%s6826_s0 + $0xc68] sm:$0xff]  ;;  %v867_v62 = vld [vmem:[%s6827_s1 + $0xca0] sm:$0xff] }
 0x132   :  { %v846_v31 = vld [vmem:[%s6827_s1 + $0xbf8] sm:$0xff]  ;;  %v1659_v38 = vmax.f32 %v1211_v25, 0.0  ;;  %2712 = vmatprep.subr.bf16.mxu0 %v2058_v27  ;;  %2885 = vmatprep.mubr.bf16.mxu1 %v4839_v9  ;;  %v860_v59 = vld [vmem:[%s6827_s1 + $0xc68] sm:$0xff]  ;;  %v441_v3 = vld [vmem:[%s6826_s0 + $0xd50] sm:$0xff]  ;;  %v1741_v5 = vmax.f32 %v1293_v53, 0.0  ;;  %v1315_v6 = vadd.f32 %v867_v62, %v419_v58 }
 0x133   :  { %v1294_v39 = vadd.f32 %v846_v31, %v398_v26  ;;  %v2057_v16 = vpack.c.bf16 %v1734_v18, %v1727_v29  ;;  %v1666_v52 = vmax.f32 %v1218_v30, 0.0  ;;  %3190 = vmatprep.subr.bf16.mxu1 %v2080_v35  ;;  %v1308_v36 = vadd.f32 %v860_v59, %v412_v17  ;;  %v448_v4 = vld [vmem:[%s6826_s0 + $0xd88] sm:$0xff]  ;;  %v889_v7 = vld [vmem:[%s6827_s1 + $0xd50] sm:$0xff]  ;;  %v411_v11 = vld [vmem:[%s6826_s0 + $0xc60] sm:$0xff] }
 0x134   :  { %2662 = vmatmul.mubr.bf16.gmra.mrb[52].mxu0 %v4725_v45  ;;  %v1748_v45 = vmax.f32 %v1300_v55, 0.0  ;;  %v896_v8 = vld [vmem:[%s6827_s1 + $0xd88] sm:$0xff]  ;;  %v1337_v13 = vadd.f32 %v889_v7, %v441_v3  ;;  %v859_v15 = vld [vmem:[%s6827_s1 + $0xc60] sm:$0xff]  ;;  %v866_v20 = vld [vmem:[%s6827_s1 + $0xc98] sm:$0xff]  ;;  %v1763_v25 = vmax.f32 %v1315_v6, 0.0 }
 0x135   :  { %v1742_v60 = vmax.f32 %v1294_v39, 0.0  ;;  %2713 = vmatpush1.bf16.msra.mxu0 %v2057_v16  ;;  %v2024_v44 = vpack.c.bf16 %v1666_v52, %v1659_v38  ;;  %2671 = vmatprep.mubr.bf16.mxu0 %v4839_v9  ;;  %v1756_v2 = vmax.f32 %v1308_v36, 0.0  ;;  %v1344_v12 = vadd.f32 %v896_v8, %v448_v4  ;;  %v418_v9 = vld [vmem:[%s6826_s0 + $0xc98] sm:$0xff]  ;;  %v329_v27 = vld [vmem:[%s6826_s0 + $0x9d0] sm:$0xff]  ;;  %v336_v29 = vld [vmem:[%s6826_s0 + $0xa08] sm:$0xff] }
 0x136   :  { %v2064_v21 = vpack.c.bf16 %v1748_v45, %v1741_v5  ;;  %v1307_v26 = vadd.f32 %v859_v15, %v411_v11  ;;  %v1314_v56 = vadd.f32 %v866_v20, %v418_v9  ;;  %v777_v18 = vld [vmem:[%s6827_s1 + $0x9d0] sm:$0xff]  ;;  %v1785_v30 = vmax.f32 %v1337_v13, 0.0  ;;  %v784_v57 = vld [vmem:[%s6827_s1 + $0xa08] sm:$0xff]  ;;  %v426_v35 = vld [vmem:[%s6826_s0 + $0xcd8] sm:$0xff] }
 0x137   :  { %v2065_v37 = vpack.c.bf16 %v1749_v61, %v1742_v60  ;;  %3191 = vmatpush3.bf16.msra.mxu1 %v2024_v44  ;;  %v1792_v31 = vmax.f32 %v1344_v12, 0.0  ;;  %v1225_v32 = vadd.f32 %v777_v18, %v329_v27  ;;  %v433_v38 = vld [vmem:[%s6826_s0 + $0xd10] sm:$0xff]  ;;  %v2072_v39 = vpack.c.bf16 %v1763_v25, %v1756_v2  ;;  %v874_v19 = vld [vmem:[%s6827_s1 + $0xcd8] sm:$0xff]  ;;  %v432_v59 = vld [vmem:[%s6826_s0 + $0xd08] sm:$0xff] }
 0x138   :  { %v1755_v40 = vmax.f32 %v1307_v26, 0.0  ;;  %v1762_v43 = vmax.f32 %v1314_v56, 0.0  ;;  %v1232_v48 = vadd.f32 %v784_v57, %v336_v29  ;;  %v881_v16 = vld [vmem:[%s6827_s1 + $0xd10] sm:$0xff]  ;;  %v1322_v17 = vadd.f32 %v874_v19, %v426_v35  ;;  %v880_v61 = vld [vmem:[%s6827_s1 + $0xd08] sm:$0xff]  ;;  %v447_v5 = vld [vmem:[%s6826_s0 + $0xd80] sm:$0xff] }
 0x139   :  { %2714 = vmatprep.subr.bf16.mxu0 %v2065_v37  ;;  %v425_v52 = vld [vmem:[%s6826_s0 + $0xcd0] sm:$0xff]  ;;  %2886 = vmatmul.mubr.bf16.gmra.mrb[56].mxu1 %v4841_v10  ;;  %v2087_v53 = vpack.c.bf16 %v1792_v31, %v1785_v30  ;;  %v1673_v55 = vmax.f32 %v1225_v32, 0.0  ;;  %v1329_v58 = vadd.f32 %v881_v16, %v433_v38  ;;  %v1328_v4 = vadd.f32 %v880_v61, %v432_v59  ;;  %v440_v44 = vld [vmem:[%s6826_s0 + $0xd48] sm:$0xff]  ;;  %v895_v8 = vld [vmem:[%s6827_s1 + $0xd80] sm:$0xff] }
 0x13a   :  { %2715 = vmatpush1.bf16.msra.mxu0 %v2064_v21  ;;  %v873_v60 = vld [vmem:[%s6827_s1 + $0xcd0] sm:$0xff]  ;;  %v2071_v62 = vpack.c.bf16 %v1762_v43, %v1755_v40  ;;  %v1680_v36 = vmax.f32 %v1232_v48, 0.0  ;;  %2893 = vmatprep.mubr.bf16.mxu1 %v4955_v46  ;;  %v888_v45 = vld [vmem:[%s6827_s1 + $0xd48] sm:$0xff]  ;;  %v1770_v6 = vmax.f32 %v1322_v17, 0.0  ;;  %v455_v37 = vld [vmem:[%s6826_s0 + $0xdc0] sm:$0xff]  ;;  %v1343_v9 = vadd.f32 %v895_v8, %v447_v5 }
 0x13b   :  { %2716 = vmatprep.subr.bf16.mxu0 %v2072_v39  ;;  %v1321_v3 = vadd.f32 %v873_v60, %v425_v52  ;;  %3192 = vmatprep.subr.bf16.mxu1 %v2087_v53  ;;  %v1777_v7 = vmax.f32 %v1329_v58, 0.0  ;;  %v1336_v11 = vadd.f32 %v888_v45, %v440_v44  ;;  %v462_v2 = vld [vmem:[%s6826_s0 + $0xdf8] sm:$0xff]  ;;  %v903_v15 = vld [vmem:[%s6827_s1 + $0xdc0] sm:$0xff]  ;;  %v461_v52 = vld [vmem:[%s6826_s0 + $0xdf0] sm:$0xff] }
 0x13c   :  { %2672 = vmatmul.mubr.bf16.gmra.mrb[56].mxu0 %v4841_v10  ;;  %v2031_v13 = vpack.c.bf16 %v1680_v36, %v1673_v55  ;;  %v1776_v10 = vmax.f32 %v1328_v4, 0.0  ;;  %v910_v20 = vld [vmem:[%s6827_s1 + $0xdf8] sm:$0xff]  ;;  %v439_v21 = vld [vmem:[%s6826_s0 + $0xd40] sm:$0xff]  ;;  %v1351_v56 = vadd.f32 %v903_v15, %v455_v37  ;;  %v1791_v31 = vmax.f32 %v1343_v9, 0.0  ;;  %v909_v60 = vld [vmem:[%s6827_s1 + $0xdf0] sm:$0xff] }
 0x13d   :  { %v1769_v12 = vmax.f32 %v1321_v3, 0.0  ;;  %2681 = vmatprep.mubr.bf16.mxu0 %v4955_v46  ;;  %v2079_v25 = vpack.c.bf16 %v1777_v7, %v1770_v6  ;;  %v1784_v26 = vmax.f32 %v1336_v11, 0.0  ;;  %v1358_v27 = vadd.f32 %v910_v20, %v462_v2  ;;  %v446_v46 = vld [vmem:[%s6826_s0 + $0xd78] sm:$0xff]  ;;  %v887_v29 = vld [vmem:[%s6827_s1 + $0xd40] sm:$0xff]  ;;  %v453_v61 = vld [vmem:[%s6826_s0 + $0xdb0] sm:$0xff] }
 0x13e   :  { %2717 = vmatpush1.bf16.msra.mxu0 %v2071_v62  ;;  %v894_v18 = vld [vmem:[%s6827_s1 + $0xd78] sm:$0xff]  ;;  %3193 = vmatpush3.bf16.msra.mxu1 %v2031_v13  ;;  %v1335_v57 = vadd.f32 %v887_v29, %v439_v21  ;;  %v343_v35 = vld [vmem:[%s6826_s0 + $0xa40] sm:$0xff]  ;;  %v1799_v40 = vmax.f32 %v1351_v56, 0.0  ;;  %v1357_v4 = vadd.f32 %v909_v60, %v461_v52  ;;  %v460_v44 = vld [vmem:[%s6826_s0 + $0xde8] sm:$0xff] }
 0x13f   :  { %v2078_v30 = vpack.c.bf16 %v1776_v10, %v1769_v12  ;;  %v1342_v32 = vadd.f32 %v894_v18, %v446_v46  ;;  %v350_v38 = vld [vmem:[%s6826_s0 + $0xa78] sm:$0xff]  ;;  %v791_v39 = vld [vmem:[%s6827_s1 + $0xa40] sm:$0xff]  ;;  %2718 = vmatprep.subr.bf16.mxu0 %v2079_v25  ;;  %v1806_v43 = vmax.f32 %v1358_v27, 0.0  ;;  %v2086_v53 = vpack.c.bf16 %v1791_v31, %v1784_v26  ;;  %v901_v5 = vld [vmem:[%s6827_s1 + $0xdb0] sm:$0xff] }
 0x140   :  { %v798_v48 = vld [vmem:[%s6827_s1 + $0xa78] sm:$0xff]  ;;  %v1239_v19 = vadd.f32 %v791_v39, %v343_v35  ;;  %v1783_v55 = vmax.f32 %v1335_v57, 0.0  ;;  %v908_v45 = vld [vmem:[%s6827_s1 + $0xde8] sm:$0xff]  ;;  %v1349_v8 = vadd.f32 %v901_v5, %v453_v61  ;;  %v1805_v2 = vmax.f32 %v1357_v4, 0.0 }
 0x141   :  { %v454_v16 = vld [vmem:[%s6826_s0 + $0xdb8] sm:$0xff]  ;;  %v1790_v17 = vmax.f32 %v1342_v32, 0.0  ;;  %v1246_v58 = vadd.f32 %v798_v48, %v350_v38  ;;  %2894 = vmatmul.mubr.bf16.gmra.mrb[60].mxu1 %v4957_v47  ;;  %v2094_v62 = vpack.c.bf16 %v1806_v43, %v1799_v40  ;;  %v1356_v11 = vadd.f32 %v908_v45, %v460_v44 }
 0x142   :  { %2719 = vmatpush1.bf16.msra.mxu0 %v2078_v30  ;;  %v902_v59 = vld [vmem:[%s6827_s1 + $0xdb8] sm:$0xff]  ;;  %v1687_v36 = vmax.f32 %v1239_v19, 0.0  ;;  %2934 = vmatprep.mubr.bf16.mxu1 %v5071_v22  ;;  %v1797_v12 = vmax.f32 %v1349_v8, 0.0 }
 0x143   :  { %v1350_v3 = vadd.f32 %v902_v59, %v454_v16  ;;  %2720 = vmatprep.subr.bf16.mxu0 %v2086_v53  ;;  %v2085_v6 = vpack.c.bf16 %v1790_v17, %v1783_v55  ;;  %v1694_v7 = vmax.f32 %v1246_v58, 0.0  ;;  %3194 = vmatprep.subr.bf16.mxu1 %v2094_v62  ;;  %v1804_v10 = vmax.f32 %v1356_v11, 0.0 }
 0x144   :  { %2682 = vmatmul.mubr.bf16.gmra.mrb[60].mxu0 %v4957_v47 }
 0x145   :  { %v1798_v37 = vmax.f32 %v1350_v3, 0.0  ;;  %v2038_v13 = vpack.c.bf16 %v1694_v7, %v1687_v36  ;;  %2724 = vmatprep.mubr.bf16.mxu0 %v5071_v22  ;;  %v2092_v15 = vpack.c.bf16 %v1804_v10, %v1797_v12 }
 0x146   :  { %2721 = vmatpush1.bf16.msra.mxu0 %v2085_v6 }
 0x147   :  { %v2093_v9 = vpack.c.bf16 %v1805_v2, %v1798_v37  ;;  %3195 = vmatpush3.bf16.msra.mxu1 %v2038_v13 }
 0x149   :  { %2722 = vmatprep.subr.bf16.mxu0 %v2093_v9 }
 0x14a   :  { %2723 = vmatpush1.bf16.msra.mxu0 %v2092_v15  ;;  %2935 = vmatmul.mubr.bf16.vlgmr.msra.gmra.mrb[64].mxu1 %v5092_v33 }
 0x14b   :  { %2942 = vmatprep.mubr.bf16.mxu1 %v5160_v34 }
 0x14d   :  { %2725 = vmatmul.mubr.bf16.vlgmr.msra.gmra.mrb[32].mxu0 %v5092_v33 }
 0x14e   :  { %2734 = vmatprep.mubr.bf16.mxu0 %v5160_v34 }
 0x152   :  { %2943 = vmatmul.mubr.bf16.gmra.mrb[68].mxu1 %v5181_v51 }
 0x153   :  { %2950 = vmatprep.mubr.bf16.mxu1 %v5249_v54 }
 0x155   :  { %2735 = vmatmul.mubr.bf16.gmra.mrb[36].mxu0 %v5181_v51 }
 0x156   :  { %2744 = vmatprep.mubr.bf16.mxu0 %v5249_v54 }
 0x15a   :  { %2951 = vmatmul.mubr.bf16.gmra.mrb[72].mxu1 %v5260_v63 }
 0x15b   :  { %2958 = vmatprep.mubr.bf16.mxu1 %v5347_v23 }
 0x15d   :  { %2745 = vmatmul.mubr.bf16.gmra.mrb[40].mxu0 %v5260_v63 }
 0x15e   :  { %2754 = vmatprep.mubr.bf16.mxu0 %v5347_v23 }
 0x162   :  { %2959 = vmatmul.mubr.bf16.gmra.mrb[76].mxu1 %v5349_v24 }
 0x163   :  { %2966 = vmatprep.mubr.bf16.mxu1 %v5436_v49 }
 0x165   :  { %2755 = vmatmul.mubr.bf16.gmra.mrb[44].mxu0 %v5349_v24 }
 0x166   :  { %2764 = vmatprep.mubr.bf16.mxu0 %v5436_v49 }
 0x16a   :  { %2967 = vmatmul.mubr.bf16.gmra.mrb[80].mxu1 %v5438_v50 }
 0x16b   :  { %2974 = vmatprep.mubr.bf16.mxu1 %v5525_v14 }
 0x16d   :  { %2765 = vmatmul.mubr.bf16.gmra.mrb[48].mxu0 %v5438_v50 }
 0x16e   :  { %2774 = vmatprep.mubr.bf16.mxu0 %v5525_v14 }
 0x172   :  { %2975 = vmatmul.mubr.bf16.gmra.mrb[84].mxu1 %v5536_v28 }
 0x173   :  { %2982 = vmatprep.mubr.bf16.mxu1 %v5623_v0 }
 0x175   :  { %2775 = vmatmul.mubr.bf16.gmra.mrb[52].mxu0 %v5536_v28 }
 0x176   :  { %2784 = vmatprep.mubr.bf16.mxu0 %v5623_v0 }
 0x17a   :  { %2983 = vmatmul.mubr.bf16.gmra.mrb[88].mxu1 %v5625_v1 }
 0x17b   :  { %2990 = vmatprep.mubr.bf16.mxu1 %v5712_v41 }
 0x17d   :  { %2785 = vmatmul.mubr.bf16.gmra.mrb[56].mxu0 %v5625_v1 }
 0x17e   :  { %2794 = vmatprep.mubr.bf16.mxu0 %v5712_v41 }
 0x182   :  { %2991 = vmatmul.mubr.bf16.gmra.mrb[92].mxu1 %v5714_v42 }
 0x185   :  { %2795 = vmatmul.mubr.bf16.gmra.mrb[60].mxu0 %v5714_v42 }
 0x192   :  { %v2274_v47 = vpop.f32.mrb[0].mxu0 }
 0x193   :  { %2999 = vst [vmem:[%s6829_s3] sm:$0xff] %v2274_v47  ;;  %v2276_v22 = vpop.f32.mrb[1].mxu0  ;;  %v2500_v33 = vpop.f32.mrb[0].mxu1 }
 0x194   :  { %3000 = vst [vmem:[%s6829_s3 + $0x8] sm:$0xff] %v2276_v22  ;;  %v2278_v34 = vpop.f32.mrb[2].mxu0  ;;  %3001 = vst [vmem:[%s6829_s3 + $0x10] sm:$0xff] %v2500_v33  ;;  %v2502_v51 = vpop.f32.mrb[1].mxu1 }
 0x195   :  { %3007 = vst [vmem:[%s6829_s3 + $0x38] sm:$0xff] %v2278_v34  ;;  %v2280_v54 = vpop.f32.mrb[3].mxu0  ;;  %3002 = vst [vmem:[%s6829_s3 + $0x18] sm:$0xff] %v2502_v51  ;;  %v2504_v63 = vpop.f32.mrb[2].mxu1 }
 0x196   :  { %3008 = vst [vmem:[%s6829_s3 + $0x40] sm:$0xff] %v2280_v54  ;;  %3009 = vst [vmem:[%s6829_s3 + $0x48] sm:$0xff] %v2504_v63  ;;  %v2506_v23 = vpop.f32.mrb[3].mxu1 }
 0x197   :  { %3010 = vst [vmem:[%s6829_s3 + $0x50] sm:$0xff] %v2506_v23 }
 0x19b   :  { %v2284_v24 = vpop.f32.mrb[4].mxu0  ;;  %v2510_v49 = vpop.f32.mrb[4].mxu1 }
 0x19c   :  { %3014 = vst [vmem:[%s6829_s3 + $0x70] sm:$0xff] %v2284_v24  ;;  %v2286_v50 = vpop.f32.mrb[5].mxu0  ;;  %3016 = vst [vmem:[%s6829_s3 + $0x80] sm:$0xff] %v2510_v49  ;;  %v2512_v14 = vpop.f32.mrb[5].mxu1 }
 0x19d   :  { %3015 = vst [vmem:[%s6829_s3 + $0x78] sm:$0xff] %v2286_v50  ;;  %v2288_v28 = vpop.f32.mrb[6].mxu0  ;;  %3017 = vst [vmem:[%s6829_s3 + $0x88] sm:$0xff] %v2512_v14  ;;  %v2514_v0 = vpop.f32.mrb[6].mxu1 }
 0x19e   :  { %3021 = vst [vmem:[%s6829_s3 + $0xa8] sm:$0xff] %v2288_v28  ;;  %v2290_v1 = vpop.f32.mrb[7].mxu0  ;;  %3023 = vst [vmem:[%s6829_s3 + $0xb8] sm:$0xff] %v2514_v0  ;;  %v2516_v41 = vpop.f32.mrb[7].mxu1 }
 0x19f   :  { %3022 = vst [vmem:[%s6829_s3 + $0xb0] sm:$0xff] %v2290_v1  ;;  %3024 = vst [vmem:[%s6829_s3 + $0xc0] sm:$0xff] %v2516_v41 }
 0x1a3   :  { %v2294_v42 = vpop.f32.mrb[8].mxu0 }
 0x1a4   :  { %v2520_v20 = vpop.f32.mrb[8].mxu1  ;;  %3028 = vst [vmem:[%s6829_s3 + $0xe0] sm:$0xff] %v2294_v42  ;;  %v2296_v21 = vpop.f32.mrb[9].mxu0 }
 0x1a5   :  { %3030 = vst [vmem:[%s6829_s3 + $0xf0] sm:$0xff] %v2520_v20  ;;  %v2522_v25 = vpop.f32.mrb[9].mxu1  ;;  %3029 = vst [vmem:[%s6829_s3 + $0xe8] sm:$0xff] %v2296_v21  ;;  %v2298_v26 = vpop.f32.mrb[10].mxu0 }
 0x1a6   :  { %3031 = vst [vmem:[%s6829_s3 + $0xf8] sm:$0xff] %v2522_v25  ;;  %v2524_v56 = vpop.f32.mrb[10].mxu1  ;;  %3035 = vst [vmem:[%s6829_s3 + $0x118] sm:$0xff] %v2298_v26  ;;  %v2300_v27 = vpop.f32.mrb[11].mxu0 }
 0x1a7   :  { %3037 = vst [vmem:[%s6829_s3 + $0x128] sm:$0xff] %v2524_v56  ;;  %v2526_v46 = vpop.f32.mrb[11].mxu1  ;;  %3036 = vst [vmem:[%s6829_s3 + $0x120] sm:$0xff] %v2300_v27 }
 0x1a8   :  { %3038 = vst [vmem:[%s6829_s3 + $0x130] sm:$0xff] %v2526_v46 }
 0x1ab   :  { %v2304_v29 = vpop.f32.mrb[12].mxu0 }
 0x1ac   :  { %v2530_v18 = vpop.f32.mrb[12].mxu1  ;;  %3042 = vst [vmem:[%s6829_s3 + $0x150] sm:$0xff] %v2304_v29  ;;  %v2306_v30 = vpop.f32.mrb[13].mxu0 }
 0x1ad   :  { %3044 = vst [vmem:[%s6829_s3 + $0x160] sm:$0xff] %v2530_v18  ;;  %v2532_v31 = vpop.f32.mrb[13].mxu1  ;;  %3043 = vst [vmem:[%s6829_s3 + $0x158] sm:$0xff] %v2306_v30  ;;  %v2308_v57 = vpop.f32.mrb[14].mxu0 }
 0x1ae   :  { %3045 = vst [vmem:[%s6829_s3 + $0x168] sm:$0xff] %v2532_v31  ;;  %v2534_v32 = vpop.f32.mrb[14].mxu1  ;;  %3049 = vst [vmem:[%s6829_s3 + $0x188] sm:$0xff] %v2308_v57  ;;  %v2310_v35 = vpop.f32.mrb[15].mxu0 }
 0x1af   :  { %3051 = vst [vmem:[%s6829_s3 + $0x198] sm:$0xff] %v2534_v32  ;;  %v2536_v38 = vpop.f32.mrb[15].mxu1  ;;  %3050 = vst [vmem:[%s6829_s3 + $0x190] sm:$0xff] %v2310_v35 }
 0x1b0   :  { %3052 = vst [vmem:[%s6829_s3 + $0x1a0] sm:$0xff] %v2536_v38 }
 0x1b4   :  { %v2314_v39 = vpop.f32.mrb[16].mxu0 }
 0x1b5   :  { %3056 = vst [vmem:[%s6829_s3 + $0x1c0] sm:$0xff] %v2314_v39  ;;  %v2540_v40 = vpop.f32.mrb[16].mxu1  ;;  %v2316_v43 = vpop.f32.mrb[17].mxu0 }
 0x1b6   :  { %3058 = vst [vmem:[%s6829_s3 + $0x1d0] sm:$0xff] %v2540_v40  ;;  %3057 = vst [vmem:[%s6829_s3 + $0x1c8] sm:$0xff] %v2316_v43  ;;  %v2542_v48 = vpop.f32.mrb[17].mxu1  ;;  %v2318_v19 = vpop.f32.mrb[18].mxu0 }
 0x1b7   :  { %3059 = vst [vmem:[%s6829_s3 + $0x1d8] sm:$0xff] %v2542_v48  ;;  %3063 = vst [vmem:[%s6829_s3 + $0x1f8] sm:$0xff] %v2318_v19  ;;  %v2544_v16 = vpop.f32.mrb[18].mxu1  ;;  %v2320_v52 = vpop.f32.mrb[19].mxu0 }
 0x1b8   :  { %3065 = vst [vmem:[%s6829_s3 + $0x208] sm:$0xff] %v2544_v16  ;;  %3064 = vst [vmem:[%s6829_s3 + $0x200] sm:$0xff] %v2320_v52  ;;  %v2546_v53 = vpop.f32.mrb[19].mxu1 }
 0x1b9   :  { %3066 = vst [vmem:[%s6829_s3 + $0x210] sm:$0xff] %v2546_v53 }
 0x1bd   :  { %v2324_v55 = vpop.f32.mrb[20].mxu0 }
 0x1be   :  { %3070 = vst [vmem:[%s6829_s3 + $0x230] sm:$0xff] %v2324_v55  ;;  %v2550_v17 = vpop.f32.mrb[20].mxu1  ;;  %v2326_v58 = vpop.f32.mrb[21].mxu0 }
 0x1bf   :  { %3072 = vst [vmem:[%s6829_s3 + $0x240] sm:$0xff] %v2550_v17  ;;  %3071 = vst [vmem:[%s6829_s3 + $0x238] sm:$0xff] %v2326_v58  ;;  %v2552_v59 = vpop.f32.mrb[21].mxu1  ;;  %v2328_v60 = vpop.f32.mrb[22].mxu0 }
 0x1c0   :  { %3073 = vst [vmem:[%s6829_s3 + $0x248] sm:$0xff] %v2552_v59  ;;  %3077 = vst [vmem:[%s6829_s3 + $0x268] sm:$0xff] %v2328_v60  ;;  %v2554_v61 = vpop.f32.mrb[22].mxu1  ;;  %v2330_v62 = vpop.f32.mrb[23].mxu0 }
 0x1c1   :  { %3079 = vst [vmem:[%s6829_s3 + $0x278] sm:$0xff] %v2554_v61  ;;  %3078 = vst [vmem:[%s6829_s3 + $0x270] sm:$0xff] %v2330_v62  ;;  %v2556_v36 = vpop.f32.mrb[23].mxu1 }
 0x1c2   :  { %3080 = vst [vmem:[%s6829_s3 + $0x280] sm:$0xff] %v2556_v36 }
 0x1c7   :  { %v2334_v3 = vpop.f32.mrb[24].mxu0 }
 0x1c8   :  { %v2560_v4 = vpop.f32.mrb[24].mxu1  ;;  %3084 = vst [vmem:[%s6829_s3 + $0x2a0] sm:$0xff] %v2334_v3  ;;  %v2336_v44 = vpop.f32.mrb[25].mxu0 }
 0x1c9   :  { %3086 = vst [vmem:[%s6829_s3 + $0x2b0] sm:$0xff] %v2560_v4  ;;  %v2562_v5 = vpop.f32.mrb[25].mxu1  ;;  %3085 = vst [vmem:[%s6829_s3 + $0x2a8] sm:$0xff] %v2336_v44  ;;  %v2338_v45 = vpop.f32.mrb[26].mxu0 }
 0x1ca   :  { %3087 = vst [vmem:[%s6829_s3 + $0x2b8] sm:$0xff] %v2562_v5  ;;  %v2564_v6 = vpop.f32.mrb[26].mxu1  ;;  %3091 = vst [vmem:[%s6829_s3 + $0x2d8] sm:$0xff] %v2338_v45  ;;  %v2340_v7 = vpop.f32.mrb[27].mxu0 }
 0x1cb   :  { %3093 = vst [vmem:[%s6829_s3 + $0x2e8] sm:$0xff] %v2564_v6  ;;  %v2566_v8 = vpop.f32.mrb[27].mxu1  ;;  %3092 = vst [vmem:[%s6829_s3 + $0x2e0] sm:$0xff] %v2340_v7 }
 0x1cc   :  { %3094 = vst [vmem:[%s6829_s3 + $0x2f0] sm:$0xff] %v2566_v8 }
 0x1d0   :  { %v2344_v11 = vpop.f32.mrb[28].mxu0 }
 0x1d1   :  { %3098 = vst [vmem:[%s6829_s3 + $0x310] sm:$0xff] %v2344_v11  ;;  %v2570_v37 = vpop.f32.mrb[28].mxu1  ;;  %v2346_v2 = vpop.f32.mrb[29].mxu0 }
 0x1d2   :  { %3100 = vst [vmem:[%s6829_s3 + $0x320] sm:$0xff] %v2570_v37  ;;  %3099 = vst [vmem:[%s6829_s3 + $0x318] sm:$0xff] %v2346_v2  ;;  %v2572_v13 = vpop.f32.mrb[29].mxu1  ;;  %v2348_v12 = vpop.f32.mrb[30].mxu0 }
 0x1d3   :  { %3101 = vst [vmem:[%s6829_s3 + $0x328] sm:$0xff] %v2572_v13  ;;  %3105 = vst [vmem:[%s6829_s3 + $0x348] sm:$0xff] %v2348_v12  ;;  %v2574_v10 = vpop.f32.mrb[30].mxu1  ;;  %v2350_v9 = vpop.f32.mrb[31].mxu0 }
 0x1d4   :  { %3107 = vst [vmem:[%s6829_s3 + $0x358] sm:$0xff] %v2574_v10  ;;  %3106 = vst [vmem:[%s6829_s3 + $0x350] sm:$0xff] %v2350_v9  ;;  %v2576_v15 = vpop.f32.mrb[31].mxu1 }
 0x1d5   :  { %3108 = vst [vmem:[%s6829_s3 + $0x360] sm:$0xff] %v2576_v15 }
 0x1dc   :  { %v3132_v47 = vpop.f32.mrb[32].mxu1 }
 0x1dd   :  { %v3133_v22 = vpop.f32.mrb[33].mxu1 }
 0x1de   :  { %v3134_v33 = vadd.f32 %v3133_v22, %v3132_v47  ;;  %v3135_v34 = vpop.f32.mrb[34].mxu1 }
 0x1df   :  { %v3136_v51 = vpop.f32.mrb[35].mxu1 }
 0x1e0   :  { %v3137_v54 = vadd.f32 %v3136_v51, %v3135_v34 }
 0x1e4   :  { %v3138_v63 = vpop.f32.mrb[36].mxu1 }
 0x1e5   :  { %v3139_v23 = vpop.f32.mrb[37].mxu1 }
 0x1e6   :  { %v6624_v24 = vadd.f32 %v3139_v23, %v3138_v63  ;;  %v3141_v49 = vpop.f32.mrb[38].mxu1 }
 0x1e7   :  { %v3142_v50 = vpop.f32.mrb[39].mxu1 }
 0x1e8   :  { %v6626_v14 = vadd.f32 %v3142_v50, %v3141_v49 }
 0x1ec   :  { %v3144_v28 = vpop.f32.mrb[40].mxu1 }
 0x1ed   :  { %v3145_v0 = vpop.f32.mrb[41].mxu1 }
 0x1ee   :  { %v6628_v1 = vadd.f32 %v3145_v0, %v3144_v28  ;;  %v3147_v41 = vpop.f32.mrb[42].mxu1 }
 0x1ef   :  { %v3148_v42 = vpop.f32.mrb[43].mxu1 }
 0x1f0   :  { %v6630_v20 = vadd.f32 %v3148_v42, %v3147_v41 }
 0x1f4   :  { %v3150_v21 = vpop.f32.mrb[44].mxu1 }
 0x1f5   :  { %v3151_v25 = vpop.f32.mrb[45].mxu1 }
 0x1f6   :  { %v6632_v26 = vadd.f32 %v3151_v25, %v3150_v21  ;;  %v3153_v56 = vpop.f32.mrb[46].mxu1 }
 0x1f7   :  { %v3154_v27 = vpop.f32.mrb[47].mxu1 }
 0x1f8   :  { %v6634_v46 = vadd.f32 %v3154_v27, %v3153_v56 }
 0x1fc   :  { %v3156_v29 = vpop.f32.mrb[48].mxu1 }
 0x1fd   :  { %v3157_v18 = vpop.f32.mrb[49].mxu1 }
 0x1fe   :  { %v6636_v30 = vadd.f32 %v3157_v18, %v3156_v29  ;;  %v3159_v31 = vpop.f32.mrb[50].mxu1 }
 0x1ff   :  { %v3160_v57 = vpop.f32.mrb[51].mxu1 }
 0x200   :  { %v6638_v32 = vadd.f32 %v3160_v57, %v3159_v31 }
 0x204   :  { %v3162_v35 = vpop.f32.mrb[52].mxu1 }
 0x205   :  { %v3163_v38 = vpop.f32.mrb[53].mxu1 }
 0x206   :  { %v6640_v39 = vadd.f32 %v3163_v38, %v3162_v35  ;;  %v3165_v40 = vpop.f32.mrb[54].mxu1 }
 0x207   :  { %v3166_v43 = vpop.f32.mrb[55].mxu1 }
 0x208   :  { %v6642_v48 = vadd.f32 %v3166_v43, %v3165_v40 }
 0x20c   :  { %v3168_v19 = vpop.f32.mrb[56].mxu1 }
 0x20d   :  { %v3169_v16 = vpop.f32.mrb[57].mxu1 }
 0x20e   :  { %v6644_v52 = vadd.f32 %v3169_v16, %v3168_v19  ;;  %v3171_v53 = vpop.f32.mrb[58].mxu1 }
 0x20f   :  { %v3172_v55 = vpop.f32.mrb[59].mxu1 }
 0x210   :  { %v6646_v17 = vadd.f32 %v3172_v55, %v3171_v53 }
 0x214   :  { %v3174_v58 = vpop.f32.mrb[60].mxu1 }
 0x215   :  { %v3175_v59 = vpop.f32.mrb[61].mxu1 }
 0x216   :  { %v6648_v60 = vadd.f32 %v3175_v59, %v3174_v58  ;;  %v3177_v61 = vpop.f32.mrb[62].mxu1 }
 0x217   :  { %v3178_v62 = vpop.f32.mrb[63].mxu1 }
 0x218   :  { %v6650_v36 = vadd.f32 %v3178_v62, %v3177_v61 }
 0x21d   :  { %v3196_v3 = vpop.f32.mrb[64].mxu1 }
 0x21e   :  { %v3197_v4 = vpop.f32.mrb[65].mxu1 }
 0x21f   :  { %v3198_v5 = vadd.f32 %v3197_v4, %v3196_v3  ;;  %v3199_v45 = vpop.f32.mrb[66].mxu1 }
 0x220   :  { %v2726_v44 = vpop.f32.mrb[32].mxu0  ;;  %v3200_v7 = vpop.f32.mrb[67].mxu1 }
 0x221   :  { %3003 = vst [vmem:[%s6829_s3 + $0x20] sm:$0xff] %v2726_v44  ;;  %v2728_v6 = vpop.f32.mrb[33].mxu0  ;;  %v2937_v8 = vadd.f32 %v3198_v5, %v3134_v33  ;;  %v3201_v37 = vadd.f32 %v3200_v7, %v3199_v45 }
 0x222   :  { %3004 = vst [vmem:[%s6829_s3 + $0x28] sm:$0xff] %v2728_v6  ;;  %v2730_v11 = vpop.f32.mrb[34].mxu0 }
 0x223   :  { %3011 = vst [vmem:[%s6829_s3 + $0x58] sm:$0xff] %v2730_v11  ;;  %v2732_v2 = vpop.f32.mrb[35].mxu0  ;;  %3006 = vst.msk [vmem:[%s6829_s3 + $0x30] sm:$0xff] %vm3005_vm0, %v2937_v8  ;;  %v2940_v13 = vadd.f32 %v3201_v37, %v3137_v54 }
 0x224   :  { %3012 = vst [vmem:[%s6829_s3 + $0x60] sm:$0xff] %v2732_v2 }
 0x225   :  { %3013 = vst.msk [vmem:[%s6829_s3 + $0x68] sm:$0xff] %vm3005_vm0, %v2940_v13  ;;  %v3202_v12 = vpop.f32.mrb[68].mxu1 }
 0x226   :  { %v3203_v10 = vpop.f32.mrb[69].mxu1 }
 0x227   :  { %v3204_v15 = vadd.f32 %v3203_v10, %v3202_v12  ;;  %v3205_v47 = vpop.f32.mrb[70].mxu1 }
 0x228   :  { %v2736_v9 = vpop.f32.mrb[36].mxu0  ;;  %v3206_v33 = vpop.f32.mrb[71].mxu1 }
 0x229   :  { %3018 = vst [vmem:[%s6829_s3 + $0x90] sm:$0xff] %v2736_v9  ;;  %v2738_v22 = vpop.f32.mrb[37].mxu0  ;;  %v2945_v34 = vadd.f32 %v3204_v15, %v6624_v24  ;;  %v3207_v54 = vadd.f32 %v3206_v33, %v3205_v47 }
 0x22a   :  { %3019 = vst [vmem:[%s6829_s3 + $0x98] sm:$0xff] %v2738_v22  ;;  %v2740_v51 = vpop.f32.mrb[38].mxu0 }
 0x22b   :  { %3025 = vst [vmem:[%s6829_s3 + $0xc8] sm:$0xff] %v2740_v51  ;;  %v2742_v63 = vpop.f32.mrb[39].mxu0  ;;  %3020 = vst.msk [vmem:[%s6829_s3 + $0xa0] sm:$0xff] %vm3005_vm0, %v2945_v34  ;;  %v2948_v23 = vadd.f32 %v3207_v54, %v6626_v14 }
 0x22c   :  { %3026 = vst [vmem:[%s6829_s3 + $0xd0] sm:$0xff] %v2742_v63 }
 0x22d   :  { %3027 = vst.msk [vmem:[%s6829_s3 + $0xd8] sm:$0xff] %vm3005_vm0, %v2948_v23  ;;  %v3208_v24 = vpop.f32.mrb[72].mxu1 }
 0x22e   :  { %v3209_v49 = vpop.f32.mrb[73].mxu1 }
 0x22f   :  { %v3210_v28 = vadd.f32 %v3209_v49, %v3208_v24  ;;  %v3211_v0 = vpop.f32.mrb[74].mxu1 }
 0x230   :  { %v2746_v50 = vpop.f32.mrb[40].mxu0  ;;  %v3212_v42 = vpop.f32.mrb[75].mxu1 }
 0x231   :  { %3032 = vst [vmem:[%s6829_s3 + $0x100] sm:$0xff] %v2746_v50  ;;  %v2748_v41 = vpop.f32.mrb[41].mxu0  ;;  %v2953_v14 = vadd.f32 %v3210_v28, %v6628_v1  ;;  %v3213_v25 = vadd.f32 %v3212_v42, %v3211_v0 }
 0x232   :  { %3033 = vst [vmem:[%s6829_s3 + $0x108] sm:$0xff] %v2748_v41  ;;  %v2750_v21 = vpop.f32.mrb[42].mxu0 }
 0x233   :  { %3039 = vst [vmem:[%s6829_s3 + $0x138] sm:$0xff] %v2750_v21  ;;  %v2752_v56 = vpop.f32.mrb[43].mxu0  ;;  %3034 = vst.msk [vmem:[%s6829_s3 + $0x110] sm:$0xff] %vm3005_vm0, %v2953_v14  ;;  %v2956_v27 = vadd.f32 %v3213_v25, %v6630_v20 }
 0x234   :  { %3040 = vst [vmem:[%s6829_s3 + $0x140] sm:$0xff] %v2752_v56 }
 0x235   :  { %3041 = vst.msk [vmem:[%s6829_s3 + $0x148] sm:$0xff] %vm3005_vm0, %v2956_v27  ;;  %v3214_v1 = vpop.f32.mrb[76].mxu1 }
 0x236   :  { %v3215_v29 = vpop.f32.mrb[77].mxu1 }
 0x237   :  { %v3216_v31 = vadd.f32 %v3215_v29, %v3214_v1  ;;  %v3217_v57 = vpop.f32.mrb[78].mxu1 }
 0x238   :  { %v2756_v18 = vpop.f32.mrb[44].mxu0  ;;  %v3218_v38 = vpop.f32.mrb[79].mxu1 }
 0x239   :  { %3046 = vst [vmem:[%s6829_s3 + $0x170] sm:$0xff] %v2756_v18  ;;  %v2758_v35 = vpop.f32.mrb[45].mxu0  ;;  %v2961_v20 = vadd.f32 %v3216_v31, %v6632_v26  ;;  %v3219_v43 = vadd.f32 %v3218_v38, %v3217_v57 }
 0x23a   :  { %3047 = vst [vmem:[%s6829_s3 + $0x178] sm:$0xff] %v2758_v35  ;;  %v2760_v40 = vpop.f32.mrb[46].mxu0 }
 0x23b   :  { %3053 = vst [vmem:[%s6829_s3 + $0x1a8] sm:$0xff] %v2760_v40  ;;  %v2762_v19 = vpop.f32.mrb[47].mxu0  ;;  %3048 = vst.msk [vmem:[%s6829_s3 + $0x180] sm:$0xff] %vm3005_vm0, %v2961_v20  ;;  %v2964_v16 = vadd.f32 %v3219_v43, %v6634_v46 }
 0x23c   :  { %3054 = vst [vmem:[%s6829_s3 + $0x1b0] sm:$0xff] %v2762_v19 }
 0x23d   :  { %3055 = vst.msk [vmem:[%s6829_s3 + $0x1b8] sm:$0xff] %vm3005_vm0, %v2964_v16  ;;  %v3220_v26 = vpop.f32.mrb[80].mxu1 }
 0x23e   :  { %v3221_v53 = vpop.f32.mrb[81].mxu1 }
 0x23f   :  { %v3222_v58 = vadd.f32 %v3221_v53, %v3220_v26  ;;  %v3223_v59 = vpop.f32.mrb[82].mxu1 }
 0x240   :  { %v2766_v55 = vpop.f32.mrb[48].mxu0  ;;  %v3224_v62 = vpop.f32.mrb[83].mxu1 }
 0x241   :  { %3060 = vst [vmem:[%s6829_s3 + $0x1e0] sm:$0xff] %v2766_v55  ;;  %v2768_v61 = vpop.f32.mrb[49].mxu0  ;;  %v2969_v46 = vadd.f32 %v3222_v58, %v6636_v30  ;;  %v3225_v4 = vadd.f32 %v3224_v62, %v3223_v59 }
 0x242   :  { %3061 = vst [vmem:[%s6829_s3 + $0x1e8] sm:$0xff] %v2768_v61  ;;  %v2770_v3 = vpop.f32.mrb[50].mxu0 }
 0x243   :  { %3067 = vst [vmem:[%s6829_s3 + $0x218] sm:$0xff] %v2770_v3  ;;  %v2772_v44 = vpop.f32.mrb[51].mxu0  ;;  %3062 = vst.msk [vmem:[%s6829_s3 + $0x1f0] sm:$0xff] %vm3005_vm0, %v2969_v46  ;;  %v2972_v5 = vadd.f32 %v3225_v4, %v6638_v32 }
 0x244   :  { %3068 = vst [vmem:[%s6829_s3 + $0x220] sm:$0xff] %v2772_v44 }
 0x245   :  { %3069 = vst.msk [vmem:[%s6829_s3 + $0x228] sm:$0xff] %vm3005_vm0, %v2972_v5  ;;  %v3226_v30 = vpop.f32.mrb[84].mxu1 }
 0x246   :  { %v3227_v45 = vpop.f32.mrb[85].mxu1 }
 0x247   :  { %v3228_v7 = vadd.f32 %v3227_v45, %v3226_v30  ;;  %v3229_v8 = vpop.f32.mrb[86].mxu1 }
 0x248   :  { %v2776_v6 = vpop.f32.mrb[52].mxu0  ;;  %v3230_v37 = vpop.f32.mrb[87].mxu1 }
 0x249   :  { %3074 = vst [vmem:[%s6829_s3 + $0x250] sm:$0xff] %v2776_v6  ;;  %v2778_v11 = vpop.f32.mrb[53].mxu0  ;;  %v2977_v32 = vadd.f32 %v3228_v7, %v6640_v39  ;;  %v3231_v13 = vadd.f32 %v3230_v37, %v3229_v8 }
 0x24a   :  { %3075 = vst [vmem:[%s6829_s3 + $0x258] sm:$0xff] %v2778_v11  ;;  %v2780_v2 = vpop.f32.mrb[54].mxu0 }
 0x24b   :  { %3081 = vst [vmem:[%s6829_s3 + $0x288] sm:$0xff] %v2780_v2  ;;  %v2782_v12 = vpop.f32.mrb[55].mxu0  ;;  %3076 = vst.msk [vmem:[%s6829_s3 + $0x260] sm:$0xff] %vm3005_vm0, %v2977_v32  ;;  %v2980_v10 = vadd.f32 %v3231_v13, %v6642_v48 }
 0x24c   :  { %3082 = vst [vmem:[%s6829_s3 + $0x290] sm:$0xff] %v2782_v12 }
 0x24d   :  { %3083 = vst.msk [vmem:[%s6829_s3 + $0x298] sm:$0xff] %vm3005_vm0, %v2980_v10  ;;  %v3232_v39 = vpop.f32.mrb[88].mxu1 }
 0x24e   :  { %v3233_v9 = vpop.f32.mrb[89].mxu1 }
 0x24f   :  { %v3234_v47 = vadd.f32 %v3233_v9, %v3232_v39  ;;  %v3235_v22 = vpop.f32.mrb[90].mxu1 }
 0x250   :  { %v2786_v15 = vpop.f32.mrb[56].mxu0  ;;  %v3236_v34 = vpop.f32.mrb[91].mxu1 }
 0x251   :  { %3088 = vst [vmem:[%s6829_s3 + $0x2c0] sm:$0xff] %v2786_v15  ;;  %v2788_v33 = vpop.f32.mrb[57].mxu0  ;;  %v2985_v48 = vadd.f32 %v3234_v47, %v6644_v52  ;;  %v3237_v54 = vadd.f32 %v3236_v34, %v3235_v22 }
 0x252   :  { %3089 = vst [vmem:[%s6829_s3 + $0x2c8] sm:$0xff] %v2788_v33  ;;  %v2790_v51 = vpop.f32.mrb[58].mxu0 }
 0x253   :  { %3095 = vst [vmem:[%s6829_s3 + $0x2f8] sm:$0xff] %v2790_v51  ;;  %v2792_v63 = vpop.f32.mrb[59].mxu0  ;;  %3090 = vst.msk [vmem:[%s6829_s3 + $0x2d0] sm:$0xff] %vm3005_vm0, %v2985_v48  ;;  %v2988_v23 = vadd.f32 %v3237_v54, %v6646_v17 }
 0x254   :  { %3096 = vst [vmem:[%s6829_s3 + $0x300] sm:$0xff] %v2792_v63 }
 0x255   :  { %3097 = vst.msk [vmem:[%s6829_s3 + $0x308] sm:$0xff] %vm3005_vm0, %v2988_v23  ;;  %v3238_v52 = vpop.f32.mrb[92].mxu1 }
 0x256   :  { %v3239_v24 = vpop.f32.mrb[93].mxu1 }
 0x257   :  { %v3240_v50 = vadd.f32 %v3239_v24, %v3238_v52  ;;  %v3241_v28 = vpop.f32.mrb[94].mxu1 }
 0x258   :  { %v2796_v49 = vpop.f32.mrb[60].mxu0  ;;  %v3242_v41 = vpop.f32.mrb[95].mxu1 }
 0x259   :  { %3102 = vst [vmem:[%s6829_s3 + $0x330] sm:$0xff] %v2796_v49  ;;  %v2798_v0 = vpop.f32.mrb[61].mxu0  ;;  %v2993_v17 = vadd.f32 %v3240_v50, %v6648_v60  ;;  %v3243_v14 = vadd.f32 %v3242_v41, %v3241_v28 }
 0x25a   :  { %3103 = vst [vmem:[%s6829_s3 + $0x338] sm:$0xff] %v2798_v0  ;;  %v2800_v42 = vpop.f32.mrb[62].mxu0 }
 0x25b   :  { %3109 = vst [vmem:[%s6829_s3 + $0x368] sm:$0xff] %v2800_v42  ;;  %v2802_v21 = vpop.f32.mrb[63].mxu0  ;;  %3104 = vst.msk [vmem:[%s6829_s3 + $0x340] sm:$0xff] %vm3005_vm0, %v2993_v17  ;;  %v2996_v25 = vadd.f32 %v3243_v14, %v6650_v36 }
 0x25c   :  { %3110 = vst [vmem:[%s6829_s3 + $0x370] sm:$0xff] %v2802_v21 }
 0x25d   :  { %3111 = vst.msk [vmem:[%s6829_s3 + $0x378] sm:$0xff] %vm3005_vm0, %v2996_v25 }

</bundles_post_ra>
